<compile_context>
chip_gen: v5e
topology: v5e:2x2
jax: 0.10.0
libtpu: 0.0.40
codegen_flags: <defaults>
</compile_context>

<pallas_src>
import functools
import math

import jax
import jax.numpy as jnp
from jax.experimental import pallas as pl
from jax.experimental.pallas import tpu as pltpu


# ---------------------------------------------------------------------------
# Pallas kernel: one (batch-tile, L1-tile) block per grid step.
# ---------------------------------------------------------------------------
def _ca_kernel(xs_ref, xt_ref, wkv_ref, wq_ref, wg_ref, bg_ref, pbias_ref,
               out_ref, *, d_group, n_group):
    D, Bt, L2 = xs_ref.shape          # channel-first block of x_source
    TL1 = xt_ref.shape[2]             # channel-first block of x_target

    wkv = wkv_ref[...].astype(jnp.float32)      # (2D, D)  fused [Wk ; Wv_perm]
    wq = wq_ref[...].astype(jnp.float32)        # (D, D)
    bg = bg_ref[0]
    padd = pbias_ref[0]
    pmul = pbias_ref[1]

    xs_all = xs_ref[...].astype(jnp.float32)    # (D, Bt, L2)
    xt_all = xt_ref[...].astype(jnp.float32)    # (D, Bt, TL1)

    for b in range(Bt):                          # static unroll over the batch tile
        xs_b = xs_all[:, b, :]                   # (D, L2)
        xt_b = xt_all[:, b, :]                   # (D, TL1)

        # Fused K/V projection and Q projection on the MXU, computed as
        # W @ X^T so results come out channel-first (L2 / TL1 on lanes) and
        # no weight transpose is ever materialized.
        kv = jnp.dot(wkv, xs_b, preferred_element_type=jnp.float32)   # (2D, L2)
        qT = jnp.dot(wq, xt_b, preferred_element_type=jnp.float32)    # (D, TL1)

        kg = kv[:D].reshape(n_group, d_group, L2)    # K grouped (contiguous groups)
        vg = kv[D:].reshape(n_group, d_group, L2)    # V grouped (rows pre-permuted in wrapper)
        qg = qT.reshape(n_group, d_group, TL1)

        # group_MLP(Q_grouped - K_grouped): CustomReLU -> Linear(d_group,1) -> ReLU
        # TODO(synk): CustomReLU is not defined in the provided source; assumed == ReLU.
        logits = jnp.zeros((n_group, TL1, L2), jnp.float32)
        for p in range(d_group):                     # d_group is a small static const
            qp = qg[:, p, :]                         # (n_group, TL1)
            kp = kg[:, p, :]                         # (n_group, L2)
            diff = qp[:, :, None] - kp[:, None, :]   # (n_group, TL1, L2), L2 on lanes
            logits = logits + jnp.maximum(diff, 0.0) * wg_ref[p]
        logits = jnp.maximum(logits + bg, 0.0)

        # positional biases:  att * mul + add
        logits = logits * pmul + padd

        # softmax over the source-sequence axis (= lane axis) + EUP reciprocal
        m = jnp.max(logits, axis=-1, keepdims=True)
        e = jnp.exp(logits - m)
        s = jnp.sum(e, axis=-1, keepdims=True)
        attn = e * pl.reciprocal(s, approx=False)    # (n_group, TL1, L2)

        # out[g, i, k] = sum_j attn[g, i, j] * V[j, k*n_group + g]
        # batched MXU dot with the group as the batch dimension.
        outg = jnp.einsum('gij,gkj->gik', attn, vg,
                          preferred_element_type=jnp.float32)   # (n_group, TL1, d_group)

        # Re-interleave the groups into the module's channel order c = k*n_group + g
        # using small 2-D transposes + a lane concat (lane-dense final store).
        out2 = jnp.concatenate([outg[:, :, k].T for k in range(d_group)], axis=1)
        out_ref[b] = out2.astype(out_ref.dtype)      # (TL1, D)


# ---------------------------------------------------------------------------
# Wrapper: all layout plumbing (transposes / weight fusion / V permutation)
# happens once here in XLA, outside the kernel.
# ---------------------------------------------------------------------------
def ca_forward(x_source, x_target, wk, wv, wq, wg, bg,
               positional_adding_bias=0.0, positional_multiplying_bias=1.0,
               *, d_group, batch_tile=None, l1_tile=None):
    B, L1, D = x_target.shape
    _, L2, _ = x_source.shape
    if D % d_group:
        raise ValueError("incompatible `d_att` and `d_group`")
    n_group = D // d_group

    Bt = B if batch_tile is None else batch_tile
    TL1 = L1 if l1_tile is None else l1_tile
    if B % Bt or L1 % TL1:
        raise ValueError("batch_tile / l1_tile must divide B / L1")

    # channel-first activations: (D, B, L)
    xs_cf = jnp.transpose(x_source, (2, 0, 1))
    xt_cf = jnp.transpose(x_target, (2, 0, 1))

    # Permute V's output channels so row g*d_group + k of wv_perm corresponds to
    # original channel k*n_group + g; the kernel then reshapes V directly into
    # (n_group, d_group, L2) without any in-kernel transpose.
    wv_perm = jnp.asarray(wv, jnp.float32).reshape(d_group, n_group, D)
    wv_perm = jnp.transpose(wv_perm, (1, 0, 2)).reshape(D, D)
    w_kv = jnp.concatenate([jnp.asarray(wk, jnp.float32), wv_perm], axis=0)  # (2D, D)
    wq_m = jnp.asarray(wq, jnp.float32)

    wg_vec = jnp.asarray(wg, jnp.float32).reshape(d_group)   # Linear(d_group, 1).weight
    bg_vec = jnp.asarray(bg, jnp.float32).reshape(1)         # Linear(d_group, 1).bias
    pbias = jnp.array([positional_adding_bias, positional_multiplying_bias],
                      jnp.float32)
    # TODO(synk): tensor-valued positional_*_bias_ts are not supported (scalars only).

    kernel = functools.partial(_ca_kernel, d_group=d_group, n_group=n_group)
    smem_spec = pl.BlockSpec(memory_space=pltpu.MemorySpace.SMEM)

    out = pl.pallas_call(
        kernel,
        out_shape=jax.ShapeDtypeStruct((B, L1, D), x_target.dtype),
        grid_spec=pltpu.PrefetchScalarGridSpec(
            num_scalar_prefetch=0,
            grid=(B // Bt, L1 // TL1),
            in_specs=[
                pl.BlockSpec((D, Bt, L2), lambda bi, li: (0, bi, 0)),    # x_source (cf)
                pl.BlockSpec((D, Bt, TL1), lambda bi, li: (0, bi, li)),  # x_target (cf)
                pl.BlockSpec((2 * D, D), lambda bi, li: (0, 0)),         # fused [Wk; Wv]
                pl.BlockSpec((D, D), lambda bi, li: (0, 0)),             # Wq
                smem_spec,                                                # group MLP weight
                smem_spec,                                                # group MLP bias
                smem_spec,                                                # positional biases
            ],
            out_specs=pl.BlockSpec((Bt, TL1, D), lambda bi, li: (bi, li, 0)),
        ),
        compiler_params=pltpu.CompilerParams(
            dimension_semantics=("parallel", "parallel")),
    )(xs_cf, xt_cf, w_kv, wq_m, wg_vec, bg_vec, pbias)
    # nn.Dropout(p=0.0) is an identity; nothing to do.
    return out


# ---------------------------------------------------------------------------
# Pure-JAX reference (mirrors the PyTorch forward exactly) for verification.
# ---------------------------------------------------------------------------
def ca_reference(x_source, x_target, wk, wv, wq, wg, bg,
                 padd=0.0, pmul=1.0, *, d_group):
    B, L1, D = x_target.shape
    _, L2, _ = x_source.shape
    n_group = D // d_group
    K = x_source @ wk.T
    V = x_source @ wv.T
    Q = x_target @ wq.T
    Qg = Q.reshape(B, L1, 1, n_group, d_group)
    Kg = K.reshape(B, 1, L2, n_group, d_group)
    Vg = V.reshape(B, L2, d_group, n_group)
    diff = Qg - Kg
    h = jnp.maximum(diff, 0.0)                                        # CustomReLU ~ ReLU
    att = jnp.einsum('ijbgp,p->ijbg', h, wg.reshape(-1)) + bg.reshape(())
    att = jnp.maximum(att, 0.0)
    att = att * pmul + padd
    att = jax.nn.softmax(att, axis=2)
    out = jnp.einsum('ijbl,ibkl->ijkl', att, Vg)
    return out.reshape(B, L1, D)


# ---------------------------------------------------------------------------
# Deterministic parameter init (xavier_uniform / sqrt(d_att) like ResetParam).
# ---------------------------------------------------------------------------
def init_params(key, d_att, d_group):
    kk, kv, kq, kgw, kgb = jax.random.split(key, 5)
    xavier = math.sqrt(6.0 / (d_att + d_att))
    scale = 1.0 / math.sqrt(d_att)
    wk = jax.random.uniform(kk, (d_att, d_att), jnp.float32, -xavier, xavier) * scale
    wv = jax.random.uniform(kv, (d_att, d_att), jnp.float32, -xavier, xavier) * scale
    wq = jax.random.uniform(kq, (d_att, d_att), jnp.float32, -xavier, xavier) * scale
    # nn.Linear(d_group, 1) default init: U(-1/sqrt(d_group), 1/sqrt(d_group))
    bound = 1.0 / math.sqrt(d_group)
    wg = jax.random.uniform(kgw, (1, d_group), jnp.float32, -bound, bound)
    bg = jax.random.uniform(kgb, (1,), jnp.float32, -bound, bound)
    return wk, wv, wq, wg, bg


if __name__ == "__main__":
    B, L1, L2 = 2, 8, 16
    d_att, d_group = 32, 4

    key = jax.random.PRNGKey(0)
    kx_s, kx_t, kp = jax.random.split(key, 3)
    x_source = jax.random.normal(kx_s, (B, L2, d_att), jnp.float32)
    x_target = jax.random.normal(kx_t, (B, L1, d_att), jnp.float32)
    wk, wv, wq, wg, bg = init_params(kp, d_att, d_group)

    out = ca_forward(x_source, x_target, wk, wv, wq, wg, bg,
                     positional_adding_bias=0.0,
                     positional_multiplying_bias=1.0,
                     d_group=d_group)
    out = jax.block_until_ready(out)

    ref = ca_reference(x_source, x_target, wk, wv, wq, wg, bg,
                       padd=0.0, pmul=1.0, d_group=d_group)
    assert out.shape == (B, L1, d_att)
    assert jnp.allclose(out, ref, atol=1e-4, rtol=1e-4), \
        f"max abs err = {jnp.max(jnp.abs(out - ref))}"

    print("KERNEL_OK")
</pallas_src>

<mosaic_0001>
module attributes {stable_mosaic.version = 11 : i64} {
  func.func @_ca_kernel(%arg0: i32, %arg1: i32, %arg2: memref<32x2x16xf32, #tpu.memory_space<vmem>>, %arg3: memref<32x2x8xf32, #tpu.memory_space<vmem>>, %arg4: memref<64x32xf32, #tpu.memory_space<vmem>>, %arg5: memref<32x32xf32, #tpu.memory_space<vmem>>, %arg6: memref<4xf32, #tpu.memory_space<smem>>, %arg7: memref<1xf32, #tpu.memory_space<smem>>, %arg8: memref<2xf32, #tpu.memory_space<smem>>, %arg9: memref<2x8x32xf32, #tpu.memory_space<vmem>>) attributes {dimension_semantics = [#tpu.dimension_semantics<parallel>, #tpu.dimension_semantics<parallel>], iteration_bounds = array<i64: 1, 1>, scalar_prefetch = 0 : i64, scratch_operands = 0 : i64, tpu.core_type = #tpu.core_type<tc>, window_params = [{transform_indices = @transform_0, window_bounds = array<i64: 32, 2, 16>}, {transform_indices = @transform_1, window_bounds = array<i64: 32, 2, 8>}, {pipeline_mode = #tpu.pipeline_mode<synchronous>, transform_indices = @transform_2, window_bounds = array<i64: 64, 32>}, {pipeline_mode = #tpu.pipeline_mode<synchronous>, transform_indices = @transform_3, window_bounds = array<i64: 32, 32>}, {transform_indices = @transform_4, window_bounds = array<i64: 4>}, {transform_indices = @transform_5, window_bounds = array<i64: 1>}, {transform_indices = @transform_6, window_bounds = array<i64: 2>}, {transform_indices = @transform_7, window_bounds = array<i64: 2, 8, 32>}]} {
    %c0 = arith.constant 0 : index
    %c0_0 = arith.constant 0 : index
    %0 = vector.load %arg4[%c0, %c0_0] : memref<64x32xf32, #tpu.memory_space<vmem>>, vector<64x32xf32>
    %c0_1 = arith.constant 0 : index
    %c0_2 = arith.constant 0 : index
    %1 = vector.load %arg5[%c0_1, %c0_2] : memref<32x32xf32, #tpu.memory_space<vmem>>, vector<32x32xf32>
    %c0_3 = arith.constant 0 : index
    %2 = memref.load %arg7[%c0_3] : memref<1xf32, #tpu.memory_space<smem>>
    %c0_4 = arith.constant 0 : index
    %3 = memref.load %arg8[%c0_4] : memref<2xf32, #tpu.memory_space<smem>>
    %c1 = arith.constant 1 : index
    %4 = memref.load %arg8[%c1] : memref<2xf32, #tpu.memory_space<smem>>
    %c0_5 = arith.constant 0 : index
    %c0_6 = arith.constant 0 : index
    %c0_7 = arith.constant 0 : index
    %5 = vector.load %arg2[%c0_5, %c0_6, %c0_7] : memref<32x2x16xf32, #tpu.memory_space<vmem>>, vector<32x2x16xf32>
    %c0_8 = arith.constant 0 : index
    %c0_9 = arith.constant 0 : index
    %c0_10 = arith.constant 0 : index
    %6 = vector.load %arg3[%c0_8, %c0_9, %c0_10] : memref<32x2x8xf32, #tpu.memory_space<vmem>>, vector<32x2x8xf32>
    %7 = vector.extract_strided_slice %5 {offsets = [0, 0, 0], sizes = [32, 1, 16], strides = [1, 1, 1]} : vector<32x2x16xf32> to vector<32x1x16xf32>
    %8 = vector.shape_cast %7 : vector<32x1x16xf32> to vector<32x16xf32>
    %9 = vector.extract_strided_slice %6 {offsets = [0, 0, 0], sizes = [32, 1, 8], strides = [1, 1, 1]} : vector<32x2x8xf32> to vector<32x1x8xf32>
    %10 = vector.shape_cast %9 : vector<32x1x8xf32> to vector<32x8xf32>
    %cst = arith.constant dense<0.000000e+00> : vector<64x16xf32>
    %11 = tpu.matmul %0, %8, %cst {dimension_numbers = #tpu.dot_dimension_numbers<[1], [0], [0], [1], [0, 0, 1, 1], [], []>} : vector<64x32xf32>, vector<32x16xf32>, vector<64x16xf32> -> vector<64x16xf32>
    %cst_11 = arith.constant dense<0.000000e+00> : vector<32x8xf32>
    %12 = tpu.matmul %1, %10, %cst_11 {dimension_numbers = #tpu.dot_dimension_numbers<[1], [0], [0], [1], [0, 0, 1, 1], [], []>} : vector<32x32xf32>, vector<32x8xf32>, vector<32x8xf32> -> vector<32x8xf32>
    %13 = vector.extract_strided_slice %11 {offsets = [0, 0], sizes = [32, 16], strides = [1, 1]} : vector<64x16xf32> to vector<32x16xf32>
    %14 = vector.shape_cast %13 : vector<32x16xf32> to vector<8x4x16xf32>
    %15 = vector.extract_strided_slice %11 {offsets = [32, 0], sizes = [32, 16], strides = [1, 1]} : vector<64x16xf32> to vector<32x16xf32>
    %16 = vector.shape_cast %15 : vector<32x16xf32> to vector<8x4x16xf32>
    %17 = vector.shape_cast %12 : vector<32x8xf32> to vector<8x4x8xf32>
    %cst_12 = arith.constant 0.000000e+00 : f32
    %18 = vector.broadcast %cst_12 : f32 to vector<8x8x16xf32>
    %19 = vector.extract_strided_slice %17 {offsets = [0, 0, 0], sizes = [8, 1, 8], strides = [1, 1, 1]} : vector<8x4x8xf32> to vector<8x1x8xf32>
    %20 = vector.shape_cast %19 : vector<8x1x8xf32> to vector<8x8xf32>
    %21 = vector.extract_strided_slice %14 {offsets = [0, 0, 0], sizes = [8, 1, 16], strides = [1, 1, 1]} : vector<8x4x16xf32> to vector<8x1x16xf32>
    %22 = vector.shape_cast %21 : vector<8x1x16xf32> to vector<8x16xf32>
    %23 = vector.shape_cast %20 : vector<8x8xf32> to vector<8x8x1xf32>
    %24 = vector.shape_cast %22 : vector<8x16xf32> to vector<8x1x16xf32>
    %25 = vector.broadcast %23 : vector<8x8x1xf32> to vector<8x8x16xf32>
    %26 = vector.broadcast %24 : vector<8x1x16xf32> to vector<8x8x16xf32>
    %27 = arith.subf %25, %26 : vector<8x8x16xf32>
    %cst_13 = arith.constant 0.000000e+00 : f32
    %28 = vector.broadcast %cst_13 : f32 to vector<8x8x16xf32>
    %29 = arith.maximumf %27, %28 : vector<8x8x16xf32>
    %c0_14 = arith.constant 0 : index
    %30 = memref.load %arg6[%c0_14] : memref<4xf32, #tpu.memory_space<smem>>
    %31 = vector.broadcast %30 : f32 to vector<8x8x16xf32>
    %32 = arith.mulf %29, %31 : vector<8x8x16xf32>
    %33 = arith.addf %18, %32 : vector<8x8x16xf32>
    %34 = vector.extract_strided_slice %17 {offsets = [0, 1, 0], sizes = [8, 1, 8], strides = [1, 1, 1]} : vector<8x4x8xf32> to vector<8x1x8xf32>
    %35 = vector.shape_cast %34 : vector<8x1x8xf32> to vector<8x8xf32>
    %36 = vector.extract_strided_slice %14 {offsets = [0, 1, 0], sizes = [8, 1, 16], strides = [1, 1, 1]} : vector<8x4x16xf32> to vector<8x1x16xf32>
    %37 = vector.shape_cast %36 : vector<8x1x16xf32> to vector<8x16xf32>
    %38 = vector.shape_cast %35 : vector<8x8xf32> to vector<8x8x1xf32>
    %39 = vector.shape_cast %37 : vector<8x16xf32> to vector<8x1x16xf32>
    %40 = vector.broadcast %38 : vector<8x8x1xf32> to vector<8x8x16xf32>
    %41 = vector.broadcast %39 : vector<8x1x16xf32> to vector<8x8x16xf32>
    %42 = arith.subf %40, %41 : vector<8x8x16xf32>
    %cst_15 = arith.constant 0.000000e+00 : f32
    %43 = vector.broadcast %cst_15 : f32 to vector<8x8x16xf32>
    %44 = arith.maximumf %42, %43 : vector<8x8x16xf32>
    %c1_16 = arith.constant 1 : index
    %45 = memref.load %arg6[%c1_16] : memref<4xf32, #tpu.memory_space<smem>>
    %46 = vector.broadcast %45 : f32 to vector<8x8x16xf32>
    %47 = arith.mulf %44, %46 : vector<8x8x16xf32>
    %48 = arith.addf %33, %47 : vector<8x8x16xf32>
    %49 = vector.extract_strided_slice %17 {offsets = [0, 2, 0], sizes = [8, 1, 8], strides = [1, 1, 1]} : vector<8x4x8xf32> to vector<8x1x8xf32>
    %50 = vector.shape_cast %49 : vector<8x1x8xf32> to vector<8x8xf32>
    %51 = vector.extract_strided_slice %14 {offsets = [0, 2, 0], sizes = [8, 1, 16], strides = [1, 1, 1]} : vector<8x4x16xf32> to vector<8x1x16xf32>
    %52 = vector.shape_cast %51 : vector<8x1x16xf32> to vector<8x16xf32>
    %53 = vector.shape_cast %50 : vector<8x8xf32> to vector<8x8x1xf32>
    %54 = vector.shape_cast %52 : vector<8x16xf32> to vector<8x1x16xf32>
    %55 = vector.broadcast %53 : vector<8x8x1xf32> to vector<8x8x16xf32>
    %56 = vector.broadcast %54 : vector<8x1x16xf32> to vector<8x8x16xf32>
    %57 = arith.subf %55, %56 : vector<8x8x16xf32>
    %cst_17 = arith.constant 0.000000e+00 : f32
    %58 = vector.broadcast %cst_17 : f32 to vector<8x8x16xf32>
    %59 = arith.maximumf %57, %58 : vector<8x8x16xf32>
    %c2 = arith.constant 2 : index
    %60 = memref.load %arg6[%c2] : memref<4xf32, #tpu.memory_space<smem>>
    %61 = vector.broadcast %60 : f32 to vector<8x8x16xf32>
    %62 = arith.mulf %59, %61 : vector<8x8x16xf32>
    %63 = arith.addf %48, %62 : vector<8x8x16xf32>
    %64 = vector.extract_strided_slice %17 {offsets = [0, 3, 0], sizes = [8, 1, 8], strides = [1, 1, 1]} : vector<8x4x8xf32> to vector<8x1x8xf32>
    %65 = vector.shape_cast %64 : vector<8x1x8xf32> to vector<8x8xf32>
    %66 = vector.extract_strided_slice %14 {offsets = [0, 3, 0], sizes = [8, 1, 16], strides = [1, 1, 1]} : vector<8x4x16xf32> to vector<8x1x16xf32>
    %67 = vector.shape_cast %66 : vector<8x1x16xf32> to vector<8x16xf32>
    %68 = vector.shape_cast %65 : vector<8x8xf32> to vector<8x8x1xf32>
    %69 = vector.shape_cast %67 : vector<8x16xf32> to vector<8x1x16xf32>
    %70 = vector.broadcast %68 : vector<8x8x1xf32> to vector<8x8x16xf32>
    %71 = vector.broadcast %69 : vector<8x1x16xf32> to vector<8x8x16xf32>
    %72 = arith.subf %70, %71 : vector<8x8x16xf32>
    %cst_18 = arith.constant 0.000000e+00 : f32
    %73 = vector.broadcast %cst_18 : f32 to vector<8x8x16xf32>
    %74 = arith.maximumf %72, %73 : vector<8x8x16xf32>
    %c3 = arith.constant 3 : index
    %75 = memref.load %arg6[%c3] : memref<4xf32, #tpu.memory_space<smem>>
    %76 = vector.broadcast %75 : f32 to vector<8x8x16xf32>
    %77 = arith.mulf %74, %76 : vector<8x8x16xf32>
    %78 = arith.addf %63, %77 : vector<8x8x16xf32>
    %79 = vector.broadcast %2 : f32 to vector<8x8x16xf32>
    %80 = arith.addf %78, %79 : vector<8x8x16xf32>
    %cst_19 = arith.constant 0.000000e+00 : f32
    %81 = vector.broadcast %cst_19 : f32 to vector<8x8x16xf32>
    %82 = arith.maximumf %80, %81 : vector<8x8x16xf32>
    %83 = vector.broadcast %4 : f32 to vector<8x8x16xf32>
    %84 = arith.mulf %82, %83 : vector<8x8x16xf32>
    %85 = vector.broadcast %3 : f32 to vector<8x8x16xf32>
    %86 = arith.addf %84, %85 : vector<8x8x16xf32>
    %cst_20 = arith.constant dense<0xFF800000> : vector<8x8xf32>
    %87 = vector.multi_reduction <maximumf>, %86, %cst_20 [2] : vector<8x8x16xf32> to vector<8x8xf32>
    %88 = vector.shape_cast %87 : vector<8x8xf32> to vector<8x8x1xf32>
    %89 = vector.broadcast %88 : vector<8x8x1xf32> to vector<8x8x16xf32>
    %90 = arith.subf %86, %89 : vector<8x8x16xf32>
    %91 = math.exp %90 : vector<8x8x16xf32>
    %cst_21 = arith.constant dense<0.000000e+00> : vector<8x8xf32>
    %92 = vector.multi_reduction <add>, %91, %cst_21 [2] : vector<8x8x16xf32> to vector<8x8xf32>
    %93 = vector.shape_cast %92 : vector<8x8xf32> to vector<8x8x1xf32>
    %94 = tpu.reciprocal %93 : vector<8x8x1xf32> -> vector<8x8x1xf32>
    %95 = vector.broadcast %94 : vector<8x8x1xf32> to vector<8x8x16xf32>
    %96 = arith.mulf %91, %95 : vector<8x8x16xf32>
    "tpu.trace_start"() <{level = 10 : i32, message = "gij,gkj->gik"}> : () -> ()
    %cst_22 = arith.constant dense<0.000000e+00> : vector<8x8x4xf32>
    %97 = tpu.matmul %96, %16, %cst_22 {dimension_numbers = #tpu.dot_dimension_numbers<[2], [2], [1], [1], [0, 0, 0, 1, 1, 1], [0], [0]>} : vector<8x8x16xf32>, vector<8x4x16xf32>, vector<8x8x4xf32> -> vector<8x8x4xf32>
    "tpu.trace_stop"() : () -> ()
    %98 = vector.extract_strided_slice %97 {offsets = [0, 0, 0], sizes = [8, 8, 1], strides = [1, 1, 1]} : vector<8x8x4xf32> to vector<8x8x1xf32>
    %99 = vector.shape_cast %98 : vector<8x8x1xf32> to vector<8x8xf32>
    %100 = tpu.transpose %99, [1, 0] : vector<8x8xf32> -> vector<8x8xf32>
    %101 = vector.extract_strided_slice %97 {offsets = [0, 0, 1], sizes = [8, 8, 1], strides = [1, 1, 1]} : vector<8x8x4xf32> to vector<8x8x1xf32>
    %102 = vector.shape_cast %101 : vector<8x8x1xf32> to vector<8x8xf32>
    %103 = tpu.transpose %102, [1, 0] : vector<8x8xf32> -> vector<8x8xf32>
    %104 = vector.extract_strided_slice %97 {offsets = [0, 0, 2], sizes = [8, 8, 1], strides = [1, 1, 1]} : vector<8x8x4xf32> to vector<8x8x1xf32>
    %105 = vector.shape_cast %104 : vector<8x8x1xf32> to vector<8x8xf32>
    %106 = tpu.transpose %105, [1, 0] : vector<8x8xf32> -> vector<8x8xf32>
    %107 = vector.extract_strided_slice %97 {offsets = [0, 0, 3], sizes = [8, 8, 1], strides = [1, 1, 1]} : vector<8x8x4xf32> to vector<8x8x1xf32>
    %108 = vector.shape_cast %107 : vector<8x8x1xf32> to vector<8x8xf32>
    %109 = tpu.transpose %108, [1, 0] : vector<8x8xf32> -> vector<8x8xf32>
    %110 = tpu.concatenate %100, %103, %106, %109 in 1 : vector<8x8xf32>, vector<8x8xf32>, vector<8x8xf32>, vector<8x8xf32> -> vector<8x32xf32>
    %c0_23 = arith.constant 0 : index
    %c0_24 = arith.constant 0 : index
    %c0_25 = arith.constant 0 : index
    %111 = vector.load %arg9[%c0_23, %c0_24, %c0_25] : memref<2x8x32xf32, #tpu.memory_space<vmem>>, vector<1x8x32xf32>
    %112 = vector.shape_cast %111 : vector<1x8x32xf32> to vector<8x32xf32>
    %113 = vector.shape_cast %110 : vector<8x32xf32> to vector<1x8x32xf32>
    tpu.vector_store %arg9[%c0_23, %c0_24, %c0_25], %113 {strides = array<i32>} : memref<2x8x32xf32, #tpu.memory_space<vmem>>, vector<1x8x32xf32>,
    %114 = vector.extract_strided_slice %5 {offsets = [0, 1, 0], sizes = [32, 1, 16], strides = [1, 1, 1]} : vector<32x2x16xf32> to vector<32x1x16xf32>
    %115 = vector.shape_cast %114 : vector<32x1x16xf32> to vector<32x16xf32>
    %116 = vector.extract_strided_slice %6 {offsets = [0, 1, 0], sizes = [32, 1, 8], strides = [1, 1, 1]} : vector<32x2x8xf32> to vector<32x1x8xf32>
    %117 = vector.shape_cast %116 : vector<32x1x8xf32> to vector<32x8xf32>
    %cst_26 = arith.constant dense<0.000000e+00> : vector<64x16xf32>
    %118 = tpu.matmul %0, %115, %cst_26 {dimension_numbers = #tpu.dot_dimension_numbers<[1], [0], [0], [1], [0, 0, 1, 1], [], []>} : vector<64x32xf32>, vector<32x16xf32>, vector<64x16xf32> -> vector<64x16xf32>
    %cst_27 = arith.constant dense<0.000000e+00> : vector<32x8xf32>
    %119 = tpu.matmul %1, %117, %cst_27 {dimension_numbers = #tpu.dot_dimension_numbers<[1], [0], [0], [1], [0, 0, 1, 1], [], []>} : vector<32x32xf32>, vector<32x8xf32>, vector<32x8xf32> -> vector<32x8xf32>
    %120 = vector.extract_strided_slice %118 {offsets = [0, 0], sizes = [32, 16], strides = [1, 1]} : vector<64x16xf32> to vector<32x16xf32>
    %121 = vector.shape_cast %120 : vector<32x16xf32> to vector<8x4x16xf32>
    %122 = vector.extract_strided_slice %118 {offsets = [32, 0], sizes = [32, 16], strides = [1, 1]} : vector<64x16xf32> to vector<32x16xf32>
    %123 = vector.shape_cast %122 : vector<32x16xf32> to vector<8x4x16xf32>
    %124 = vector.shape_cast %119 : vector<32x8xf32> to vector<8x4x8xf32>
    %cst_28 = arith.constant 0.000000e+00 : f32
    %125 = vector.broadcast %cst_28 : f32 to vector<8x8x16xf32>
    %126 = vector.extract_strided_slice %124 {offsets = [0, 0, 0], sizes = [8, 1, 8], strides = [1, 1, 1]} : vector<8x4x8xf32> to vector<8x1x8xf32>
    %127 = vector.shape_cast %126 : vector<8x1x8xf32> to vector<8x8xf32>
    %128 = vector.extract_strided_slice %121 {offsets = [0, 0, 0], sizes = [8, 1, 16], strides = [1, 1, 1]} : vector<8x4x16xf32> to vector<8x1x16xf32>
    %129 = vector.shape_cast %128 : vector<8x1x16xf32> to vector<8x16xf32>
    %130 = vector.shape_cast %127 : vector<8x8xf32> to vector<8x8x1xf32>
    %131 = vector.shape_cast %129 : vector<8x16xf32> to vector<8x1x16xf32>
    %132 = vector.broadcast %130 : vector<8x8x1xf32> to vector<8x8x16xf32>
    %133 = vector.broadcast %131 : vector<8x1x16xf32> to vector<8x8x16xf32>
    %134 = arith.subf %132, %133 : vector<8x8x16xf32>
    %cst_29 = arith.constant 0.000000e+00 : f32
    %135 = vector.broadcast %cst_29 : f32 to vector<8x8x16xf32>
    %136 = arith.maximumf %134, %135 : vector<8x8x16xf32>
    %c0_30 = arith.constant 0 : index
    %137 = memref.load %arg6[%c0_30] : memref<4xf32, #tpu.memory_space<smem>>
    %138 = vector.broadcast %137 : f32 to vector<8x8x16xf32>
    %139 = arith.mulf %136, %138 : vector<8x8x16xf32>
    %140 = arith.addf %125, %139 : vector<8x8x16xf32>
    %141 = vector.extract_strided_slice %124 {offsets = [0, 1, 0], sizes = [8, 1, 8], strides = [1, 1, 1]} : vector<8x4x8xf32> to vector<8x1x8xf32>
    %142 = vector.shape_cast %141 : vector<8x1x8xf32> to vector<8x8xf32>
    %143 = vector.extract_strided_slice %121 {offsets = [0, 1, 0], sizes = [8, 1, 16], strides = [1, 1, 1]} : vector<8x4x16xf32> to vector<8x1x16xf32>
    %144 = vector.shape_cast %143 : vector<8x1x16xf32> to vector<8x16xf32>
    %145 = vector.shape_cast %142 : vector<8x8xf32> to vector<8x8x1xf32>
    %146 = vector.shape_cast %144 : vector<8x16xf32> to vector<8x1x16xf32>
    %147 = vector.broadcast %145 : vector<8x8x1xf32> to vector<8x8x16xf32>
    %148 = vector.broadcast %146 : vector<8x1x16xf32> to vector<8x8x16xf32>
    %149 = arith.subf %147, %148 : vector<8x8x16xf32>
    %cst_31 = arith.constant 0.000000e+00 : f32
    %150 = vector.broadcast %cst_31 : f32 to vector<8x8x16xf32>
    %151 = arith.maximumf %149, %150 : vector<8x8x16xf32>
    %c1_32 = arith.constant 1 : index
    %152 = memref.load %arg6[%c1_32] : memref<4xf32, #tpu.memory_space<smem>>
    %153 = vector.broadcast %152 : f32 to vector<8x8x16xf32>
    %154 = arith.mulf %151, %153 : vector<8x8x16xf32>
    %155 = arith.addf %140, %154 : vector<8x8x16xf32>
    %156 = vector.extract_strided_slice %124 {offsets = [0, 2, 0], sizes = [8, 1, 8], strides = [1, 1, 1]} : vector<8x4x8xf32> to vector<8x1x8xf32>
    %157 = vector.shape_cast %156 : vector<8x1x8xf32> to vector<8x8xf32>
    %158 = vector.extract_strided_slice %121 {offsets = [0, 2, 0], sizes = [8, 1, 16], strides = [1, 1, 1]} : vector<8x4x16xf32> to vector<8x1x16xf32>
    %159 = vector.shape_cast %158 : vector<8x1x16xf32> to vector<8x16xf32>
    %160 = vector.shape_cast %157 : vector<8x8xf32> to vector<8x8x1xf32>
    %161 = vector.shape_cast %159 : vector<8x16xf32> to vector<8x1x16xf32>
    %162 = vector.broadcast %160 : vector<8x8x1xf32> to vector<8x8x16xf32>
    %163 = vector.broadcast %161 : vector<8x1x16xf32> to vector<8x8x16xf32>
    %164 = arith.subf %162, %163 : vector<8x8x16xf32>
    %cst_33 = arith.constant 0.000000e+00 : f32
    %165 = vector.broadcast %cst_33 : f32 to vector<8x8x16xf32>
    %166 = arith.maximumf %164, %165 : vector<8x8x16xf32>
    %c2_34 = arith.constant 2 : index
    %167 = memref.load %arg6[%c2_34] : memref<4xf32, #tpu.memory_space<smem>>
    %168 = vector.broadcast %167 : f32 to vector<8x8x16xf32>
    %169 = arith.mulf %166, %168 : vector<8x8x16xf32>
    %170 = arith.addf %155, %169 : vector<8x8x16xf32>
    %171 = vector.extract_strided_slice %124 {offsets = [0, 3, 0], sizes = [8, 1, 8], strides = [1, 1, 1]} : vector<8x4x8xf32> to vector<8x1x8xf32>
    %172 = vector.shape_cast %171 : vector<8x1x8xf32> to vector<8x8xf32>
    %173 = vector.extract_strided_slice %121 {offsets = [0, 3, 0], sizes = [8, 1, 16], strides = [1, 1, 1]} : vector<8x4x16xf32> to vector<8x1x16xf32>
    %174 = vector.shape_cast %173 : vector<8x1x16xf32> to vector<8x16xf32>
    %175 = vector.shape_cast %172 : vector<8x8xf32> to vector<8x8x1xf32>
    %176 = vector.shape_cast %174 : vector<8x16xf32> to vector<8x1x16xf32>
    %177 = vector.broadcast %175 : vector<8x8x1xf32> to vector<8x8x16xf32>
    %178 = vector.broadcast %176 : vector<8x1x16xf32> to vector<8x8x16xf32>
    %179 = arith.subf %177, %178 : vector<8x8x16xf32>
    %cst_35 = arith.constant 0.000000e+00 : f32
    %180 = vector.broadcast %cst_35 : f32 to vector<8x8x16xf32>
    %181 = arith.maximumf %179, %180 : vector<8x8x16xf32>
    %c3_36 = arith.constant 3 : index
    %182 = memref.load %arg6[%c3_36] : memref<4xf32, #tpu.memory_space<smem>>
    %183 = vector.broadcast %182 : f32 to vector<8x8x16xf32>
    %184 = arith.mulf %181, %183 : vector<8x8x16xf32>
    %185 = arith.addf %170, %184 : vector<8x8x16xf32>
    %186 = vector.broadcast %2 : f32 to vector<8x8x16xf32>
    %187 = arith.addf %185, %186 : vector<8x8x16xf32>
    %cst_37 = arith.constant 0.000000e+00 : f32
    %188 = vector.broadcast %cst_37 : f32 to vector<8x8x16xf32>
    %189 = arith.maximumf %187, %188 : vector<8x8x16xf32>
    %190 = vector.broadcast %4 : f32 to vector<8x8x16xf32>
    %191 = arith.mulf %189, %190 : vector<8x8x16xf32>
    %192 = vector.broadcast %3 : f32 to vector<8x8x16xf32>
    %193 = arith.addf %191, %192 : vector<8x8x16xf32>
    %cst_38 = arith.constant dense<0xFF800000> : vector<8x8xf32>
    %194 = vector.multi_reduction <maximumf>, %193, %cst_38 [2] : vector<8x8x16xf32> to vector<8x8xf32>
    %195 = vector.shape_cast %194 : vector<8x8xf32> to vector<8x8x1xf32>
    %196 = vector.broadcast %195 : vector<8x8x1xf32> to vector<8x8x16xf32>
    %197 = arith.subf %193, %196 : vector<8x8x16xf32>
    %198 = math.exp %197 : vector<8x8x16xf32>
    %cst_39 = arith.constant dense<0.000000e+00> : vector<8x8xf32>
    %199 = vector.multi_reduction <add>, %198, %cst_39 [2] : vector<8x8x16xf32> to vector<8x8xf32>
    %200 = vector.shape_cast %199 : vector<8x8xf32> to vector<8x8x1xf32>
    %201 = tpu.reciprocal %200 : vector<8x8x1xf32> -> vector<8x8x1xf32>
    %202 = vector.broadcast %201 : vector<8x8x1xf32> to vector<8x8x16xf32>
    %203 = arith.mulf %198, %202 : vector<8x8x16xf32>
    "tpu.trace_start"() <{level = 10 : i32, message = "gij,gkj->gik"}> : () -> ()
    %cst_40 = arith.constant dense<0.000000e+00> : vector<8x8x4xf32>
    %204 = tpu.matmul %203, %123, %cst_40 {dimension_numbers = #tpu.dot_dimension_numbers<[2], [2], [1], [1], [0, 0, 0, 1, 1, 1], [0], [0]>} : vector<8x8x16xf32>, vector<8x4x16xf32>, vector<8x8x4xf32> -> vector<8x8x4xf32>
    "tpu.trace_stop"() : () -> ()
    %205 = vector.extract_strided_slice %204 {offsets = [0, 0, 0], sizes = [8, 8, 1], strides = [1, 1, 1]} : vector<8x8x4xf32> to vector<8x8x1xf32>
    %206 = vector.shape_cast %205 : vector<8x8x1xf32> to vector<8x8xf32>
    %207 = tpu.transpose %206, [1, 0] : vector<8x8xf32> -> vector<8x8xf32>
    %208 = vector.extract_strided_slice %204 {offsets = [0, 0, 1], sizes = [8, 8, 1], strides = [1, 1, 1]} : vector<8x8x4xf32> to vector<8x8x1xf32>
    %209 = vector.shape_cast %208 : vector<8x8x1xf32> to vector<8x8xf32>
    %210 = tpu.transpose %209, [1, 0] : vector<8x8xf32> -> vector<8x8xf32>
    %211 = vector.extract_strided_slice %204 {offsets = [0, 0, 2], sizes = [8, 8, 1], strides = [1, 1, 1]} : vector<8x8x4xf32> to vector<8x8x1xf32>
    %212 = vector.shape_cast %211 : vector<8x8x1xf32> to vector<8x8xf32>
    %213 = tpu.transpose %212, [1, 0] : vector<8x8xf32> -> vector<8x8xf32>
    %214 = vector.extract_strided_slice %204 {offsets = [0, 0, 3], sizes = [8, 8, 1], strides = [1, 1, 1]} : vector<8x8x4xf32> to vector<8x8x1xf32>
    %215 = vector.shape_cast %214 : vector<8x8x1xf32> to vector<8x8xf32>
    %216 = tpu.transpose %215, [1, 0] : vector<8x8xf32> -> vector<8x8xf32>
    %217 = tpu.concatenate %207, %210, %213, %216 in 1 : vector<8x8xf32>, vector<8x8xf32>, vector<8x8xf32>, vector<8x8xf32> -> vector<8x32xf32>
    %c1_41 = arith.constant 1 : index
    %c0_42 = arith.constant 0 : index
    %c0_43 = arith.constant 0 : index
    %218 = vector.load %arg9[%c1_41, %c0_42, %c0_43] : memref<2x8x32xf32, #tpu.memory_space<vmem>>, vector<1x8x32xf32>
    %219 = vector.shape_cast %218 : vector<1x8x32xf32> to vector<8x32xf32>
    %220 = vector.shape_cast %217 : vector<8x32xf32> to vector<1x8x32xf32>
    tpu.vector_store %arg9[%c1_41, %c0_42, %c0_43], %220 {strides = array<i32>} : memref<2x8x32xf32, #tpu.memory_space<vmem>>, vector<1x8x32xf32>,
    return
  }
  func.func @transform_0(%arg0: i32, %arg1: i32) -> (i32, i32, i32) {
    %c0_i32 = arith.constant 0 : i32
    %c0_i32_0 = arith.constant 0 : i32
    %c0_i32_1 = arith.constant 0 : i32
    return %c0_i32, %arg0, %c0_i32_0 : i32, i32, i32
  }
  func.func @transform_1(%arg0: i32, %arg1: i32) -> (i32, i32, i32) {
    %c0_i32 = arith.constant 0 : i32
    %c0_i32_0 = arith.constant 0 : i32
    return %c0_i32, %arg0, %arg1 : i32, i32, i32
  }
  func.func @transform_2(%arg0: i32, %arg1: i32) -> (i32, i32) {
    %c0_i32 = arith.constant 0 : i32
    %c0_i32_0 = arith.constant 0 : i32
    %c0_i32_1 = arith.constant 0 : i32
    return %c0_i32, %c0_i32_0 : i32, i32
  }
  func.func @transform_3(%arg0: i32, %arg1: i32) -> (i32, i32) {
    %c0_i32 = arith.constant 0 : i32
    %c0_i32_0 = arith.constant 0 : i32
    %c0_i32_1 = arith.constant 0 : i32
    return %c0_i32, %c0_i32_0 : i32, i32
  }
  func.func @transform_4(%arg0: i32, %arg1: i32) -> i32 {
    %c0_i32 = arith.constant 0 : i32
    %c0_i32_0 = arith.constant 0 : i32
    return %c0_i32 : i32
  }
  func.func @transform_5(%arg0: i32, %arg1: i32) -> i32 {
    %c0_i32 = arith.constant 0 : i32
    %c0_i32_0 = arith.constant 0 : i32
    return %c0_i32 : i32
  }
  func.func @transform_6(%arg0: i32, %arg1: i32) -> i32 {
    %c0_i32 = arith.constant 0 : i32
    %c0_i32_0 = arith.constant 0 : i32
    return %c0_i32 : i32
  }
  func.func @transform_7(%arg0: i32, %arg1: i32) -> (i32, i32, i32) {
    %c0_i32 = arith.constant 0 : i32
    %c0_i32_0 = arith.constant 0 : i32
    return %arg0, %arg1, %c0_i32 : i32, i32, i32
  }
}

</mosaic_0001>

<bundles_post_ra>
// kernel: tpu_custom_call.1
= control target key start
LH: loop header
LB: loop body
LE: loop exit
PB: predicated region body
PF: predicated region fallthrough
CT: control target
= control target key end

     0   :  { %13 = vsyncpa [#allocation5], 0  ;;  %s4631_s0 = inlined_call_operand.vmem [shape: f32[32,2,16], index: 0, kind: input, shape index: {}]   ;;  %s4632_s1 = inlined_call_operand.vmem [shape: f32[32,2,8], index: 1, kind: input, shape index: {}]   ;;  %s4633_s2 = inlined_call_operand.vmem [shape: f32[64,32], index: 2, kind: input, shape index: {}]   ;;  %s4634_s3 = inlined_call_operand.vmem [shape: f32[32,32], index: 3, kind: input, shape index: {}]   ;;  %s4635_s4 = inlined_call_operand.vmem [shape: f32[4], index: 4, kind: input, shape index: {}]   ;;  %s4636_s5 = inlined_call_operand.<no memory space> [shape: f32[1], index: 5, kind: input, shape index: {}]   ;;  %s4637_s6 = inlined_call_operand.vmem [shape: f32[2], index: 6, kind: input, shape index: {}]   ;;  %s4638_s7 = inlined_call_operand.hbm [shape: f32[2,8,32], index: 7, kind: output, shape index: {}]  }
   0x1   :  { %14 = vsyncpa [#allocation7], 0 }
   0x2   :  { %15 = vsyncpa [#allocation4], 0  ;;  %s29_s26 = sshll.u32 %s4635_s4, 4  ;;  %s40_s29 = sshll.u32 %s4637_s6, 4  ;;  %s30_s26 = int_to_ptr.vmem [resolvable:$true] %s29_s26  ;;  %s41_s29 = int_to_ptr.vmem [resolvable:$true] %s40_s29 }
   0x3   :  { %s3288_s30 = smov [#allocation3]   ;;  %s3289_s8 = smov [#allocation6]  }
   0x4   :  { %32 = dma.vmem_to_smem %s30_s26, 16, %s3288_s30, [#allocation5]  }
   0x5   :  { %43 = dma.vmem_to_smem %s41_s29, 16, %s3289_s8, [#allocation7]  }
   0x6   :  { %3282 = dma.done.wait [#allocation5], 16  }
   0x7   :  { %3283 = vsyncadd [#allocation5], 4294967280 }
   0x8   :  { %3284 = dma.done.wait [#allocation7], 16  }
   0x9   :  { %3285 = vsyncadd [#allocation7], 4294967280 }
   0xa   :  { %52 = sfence }
   0xb   :  { %v125_v0 = vld [vmem:[%s4632_s1 + $0x32] sm:$0x3]  ;;  %v126_v1 = vld [vmem:[%s4632_s1 + $0x34] sm:$0x3]  ;;  %v127_v2 = vld [vmem:[%s4632_s1 + $0x36] sm:$0x3] }
   0xc   :  { %v124_v3 = vld [vmem:[%s4632_s1 + $0x30] sm:$0x3]  ;;  %v128_v4 = vld [vmem:[%s4632_s1 + $0x38] sm:$0x3]  ;;  %v129_v5 = vld [vmem:[%s4632_s1 + $0x3a] sm:$0x3] }
   0xd   :  { %v130_v6 = vld [vmem:[%s4632_s1 + $0x3c] sm:$0x3]  ;;  %vm165_vm0 = vcmask 1041409   ;;  %v131_v7 = vld [vmem:[%s4632_s1 + $0x3e] sm:$0x3]  ;;  %vm168_vm1 = vcmask 1042434  }
   0xe   :  { %v371_v8 = vrot.slane %v125_v0, 7  ;;  %v373_v9 = vrot.slane %v126_v1, 6  ;;  %v375_v10 = vrot.slane %v127_v2, 5  ;;  %vm171_vm2 = vcmask 1043459   ;;  %v117_v12 = vld [vmem:[%s4632_s1 + $0x22] sm:$0x3] }
   0xf   :  { %vm174_vm3 = vcmask 1044484   ;;  %vm177_vm4 = vcmask 1045509   ;;  %v377_v11 = vrot.slane %v128_v4, 4  ;;  %vm180_vm5 = vcmask 1046534   ;;  %v118_v15 = vld [vmem:[%s4632_s1 + $0x24] sm:$0x3] }
  0x10   :  { %v372_v13 = vsel %vm165_vm0, %v371_v8, %v124_v3  ;;  %v379_v14 = vrot.slane %v129_v5, 3  ;;  %v119_v16 = vld [vmem:[%s4632_s1 + $0x26] sm:$0x3]  ;;  %vm183_vm6 = vcmask 1047559   ;;  %v381_v18 = vrot.slane %v130_v6, 2  ;;  %s542_s26 = sld [smem:[#allocation3]] }
  0x11   :  { %v374_v17 = vsel %vm168_vm1, %v373_v9, %v372_v13  ;;  %v116_v19 = vld [vmem:[%s4632_s1 + $0x20] sm:$0x3]  ;;  %v120_v20 = vld [vmem:[%s4632_s1 + $0x28] sm:$0x3]  ;;  %v383_v22 = vrot.slane %v131_v7, 1  ;;  %v357_v25 = vrot.slane %v117_v12, 7 }
  0x12   :  { %v376_v21 = vsel %vm171_vm2, %v375_v10, %v374_v17  ;;  %v121_v23 = vld [vmem:[%s4632_s1 + $0x2a] sm:$0x3]  ;;  %v122_v24 = vld [vmem:[%s4632_s1 + $0x2c] sm:$0x3]  ;;  %v123_v27 = vld [vmem:[%s4632_s1 + $0x2e] sm:$0x3] }
  0x13   :  { %v378_v26 = vsel %vm174_vm3, %v377_v11, %v376_v21  ;;  %v359_v28 = vrot.slane %v118_v15, 6  ;;  %v361_v29 = vrot.slane %v119_v16, 5  ;;  %v363_v30 = vrot.slane %v120_v20, 4  ;;  %v108_v34 = vld [vmem:[%s4632_s1 + $0x10] sm:$0x3]  ;;  %s2982_s27 = sld [smem:[#allocation3 + $0x1]] }
  0x14   :  { %v380_v31 = vsel %vm177_vm4, %v379_v14, %v378_v26  ;;  %v358_v32 = vsel %vm165_vm0, %v357_v25, %v116_v19  ;;  %v365_v33 = vrot.slane %v121_v23, 3  ;;  %v109_v35 = vld [vmem:[%s4632_s1 + $0x12] sm:$0x3]  ;;  %v367_v38 = vrot.slane %v122_v24, 2  ;;  %v110_v40 = vld [vmem:[%s4632_s1 + $0x14] sm:$0x3] }
  0x15   :  { %v382_v36 = vsel %vm180_vm5, %v381_v18, %v380_v31  ;;  %v360_v37 = vsel %vm168_vm1, %v359_v28, %v358_v32  ;;  %v369_v39 = vrot.slane %v123_v27, 1  ;;  %v111_v41 = vld [vmem:[%s4632_s1 + $0x16] sm:$0x3]  ;;  %v112_v44 = vld [vmem:[%s4632_s1 + $0x18] sm:$0x3]  ;;  %v343_v49 = vrot.slane %v109_v35, 7 }
  0x16   :  { %v384_v42 = vsel %vm183_vm6, %v383_v22, %v382_v36  ;;  %v362_v43 = vsel %vm171_vm2, %v361_v29, %v360_v37  ;;  %v113_v45 = vld [vmem:[%s4632_s1 + $0x1a] sm:$0x3]  ;;  %v114_v46 = vld [vmem:[%s4632_s1 + $0x1c] sm:$0x3]  ;;  %v115_v48 = vld [vmem:[%s4632_s1 + $0x1e] sm:$0x3] }
  0x17   :  { %413 = vmatpush.msra.mxu1 %v384_v42  ;;  %v364_v47 = vsel %vm174_vm3, %v363_v30, %v362_v43  ;;  %v345_v50 = vrot.slane %v110_v40, 6  ;;  %v347_v51 = vrot.slane %v111_v41, 5  ;;  %v349_v53 = vrot.slane %v112_v44, 4  ;;  %v100_v55 = vld [vmem:[%s4632_s1] sm:$0x3]  ;;  %s2983_s28 = sld [smem:[#allocation3 + $0x2]] }
  0x18   :  { %v366_v52 = vsel %vm177_vm4, %v365_v33, %v364_v47  ;;  %v351_v54 = vrot.slane %v113_v45, 3  ;;  %v344_v57 = vsel %vm165_vm0, %v343_v49, %v108_v34  ;;  %v353_v58 = vrot.slane %v114_v46, 2  ;;  %v101_v60 = vld [vmem:[%s4632_s1 + $0x2] sm:$0x3]  ;;  %v102_v61 = vld [vmem:[%s4632_s1 + $0x4] sm:$0x3] }
  0x19   :  { %v368_v56 = vsel %vm180_vm5, %v367_v38, %v366_v52  ;;  %v355_v59 = vrot.slane %v115_v48, 1  ;;  %v346_v63 = vsel %vm168_vm1, %v345_v50, %v344_v57  ;;  %v103_v0 = vld [vmem:[%s4632_s1 + $0x6] sm:$0x3]  ;;  %v104_v1 = vld [vmem:[%s4632_s1 + $0x8] sm:$0x3]  ;;  %v329_v6 = vrot.slane %v101_v60, 7 }
  0x1a   :  { %v370_v62 = vsel %vm183_vm6, %v369_v39, %v368_v56  ;;  %v105_v2 = vld [vmem:[%s4632_s1 + $0xa] sm:$0x3]  ;;  %v348_v3 = vsel %vm171_vm2, %v347_v51, %v346_v63  ;;  %v106_v4 = vld [vmem:[%s4632_s1 + $0xc] sm:$0x3]  ;;  %v107_v5 = vld [vmem:[%s4632_s1 + $0xe] sm:$0x3] }
  0x1b   :  { %414 = vmatpush.msra.mxu1 %v370_v62  ;;  %v331_v7 = vrot.slane %v102_v61, 6  ;;  %v350_v8 = vsel %vm174_vm3, %v349_v53, %v348_v3  ;;  %v333_v9 = vrot.slane %v103_v0, 5  ;;  %v335_v10 = vrot.slane %v104_v1, 4  ;;  %v93_v16 = vld [vmem:[%s4631_s0 + $0x32] sm:$0x3]  ;;  %v61_v35 = vld [vmem:[%s4634_s3] sm:$0xff] }
  0x1c   :  { %v337_v11 = vrot.slane %v105_v2, 3  ;;  %v352_v12 = vsel %vm177_vm4, %v351_v54, %v350_v8  ;;  %v330_v13 = vsel %vm165_vm0, %v329_v6, %v100_v55  ;;  %v339_v14 = vrot.slane %v106_v4, 2  ;;  %v92_v19 = vld [vmem:[%s4631_s0 + $0x30] sm:$0x3]  ;;  %v94_v20 = vld [vmem:[%s4631_s0 + $0x34] sm:$0x3] }
  0x1d   :  { %v341_v15 = vrot.slane %v107_v5, 1  ;;  %v354_v17 = vsel %vm180_vm5, %v353_v58, %v352_v12  ;;  %v332_v18 = vsel %vm168_vm1, %v331_v7, %v330_v13  ;;  %v95_v21 = vld [vmem:[%s4631_s0 + $0x36] sm:$0x3]  ;;  %v96_v24 = vld [vmem:[%s4631_s0 + $0x38] sm:$0x3]  ;;  %v213_v28 = vrot.slane %v93_v16, 7 }
  0x1e   :  { %v356_v22 = vsel %vm183_vm6, %v355_v59, %v354_v17  ;;  %v334_v23 = vsel %vm171_vm2, %v333_v9, %v332_v18  ;;  %v97_v25 = vld [vmem:[%s4631_s0 + $0x3a] sm:$0x3]  ;;  %v98_v26 = vld [vmem:[%s4631_s0 + $0x3c] sm:$0x3]  ;;  %v215_v29 = vrot.slane %v94_v20, 6  ;;  %v217_v30 = vrot.slane %v95_v21, 5 }
  0x1f   :  { %415 = vmatpush.msra.mxu1 %v356_v22  ;;  %v336_v27 = vsel %vm174_vm3, %v335_v10, %v334_v23  ;;  %vm4639_vm7 = vcmask 261120   ;;  %v99_v32 = vld [vmem:[%s4631_s0 + $0x3e] sm:$0x3]  ;;  %v219_v33 = vrot.slane %v96_v24, 4  ;;  %v214_v36 = vsel %vm165_vm0, %v213_v28, %v92_v19  ;;  %v85_v39 = vld [vmem:[%s4631_s0 + $0x22] sm:$0x3] }
  0x20   :  { %v338_v31 = vsel %vm177_vm4, %v337_v11, %v336_v27  ;;  %v221_v37 = vrot.slane %v97_v25, 3  ;;  %v223_v38 = vrot.slane %v98_v26, 2  ;;  %v216_v41 = vsel %vm168_vm1, %v215_v29, %v214_v36  ;;  %v86_v42 = vld [vmem:[%s4631_s0 + $0x24] sm:$0x3]  ;;  %v87_v43 = vld [vmem:[%s4631_s0 + $0x26] sm:$0x3] }
  0x21   :  { %v340_v34 = vsel %vm180_vm5, %v339_v14, %v338_v31  ;;  %v88_v44 = vld [vmem:[%s4631_s0 + $0x28] sm:$0x3]  ;;  %v218_v45 = vsel %vm171_vm2, %v217_v30, %v216_v41  ;;  %v225_v46 = vrot.slane %v99_v32, 1  ;;  %v84_v47 = vld [vmem:[%s4631_s0 + $0x20] sm:$0x3]  ;;  %v199_v51 = vrot.slane %v85_v39, 7 }
  0x22   :  { %v342_v40 = vsel %vm183_vm6, %v341_v15, %v340_v34  ;;  %v89_v48 = vld [vmem:[%s4631_s0 + $0x2a] sm:$0x3]  ;;  %v220_v49 = vsel %vm174_vm3, %v219_v33, %v218_v45  ;;  %v90_v50 = vld [vmem:[%s4631_s0 + $0x2c] sm:$0x3]  ;;  %v91_v53 = vld [vmem:[%s4631_s0 + $0x2e] sm:$0x3]  ;;  %v463_v23 = vlaneseq }
  0x23   :  { %416 = vmatpush.msra.mxu1 %v342_v40  ;;  %v222_v52 = vsel %vm177_vm4, %v221_v37, %v220_v49  ;;  %v201_v54 = vrot.slane %v86_v42, 6  ;;  %v203_v55 = vrot.slane %v87_v43, 5  ;;  %v205_v56 = vrot.slane %v88_v44, 4  ;;  %v76_v60 = vld [vmem:[%s4631_s0 + $0x10] sm:$0x3]  ;;  %v62_v8 = vld [vmem:[%s4634_s3 + $0x8] sm:$0xff] }
  0x24   :  { %2978 = vmatmul.msk.f32.vlgmr.msra.gmra.mxu1 %vm4639_vm7, %v61_v35  ;;  %v224_v57 = vsel %vm180_vm5, %v223_v38, %v222_v52  ;;  %v200_v58 = vsel %vm165_vm0, %v199_v51, %v84_v47  ;;  %v207_v59 = vrot.slane %v89_v48, 3  ;;  %v77_v61 = vld [vmem:[%s4631_s0 + $0x12] sm:$0x3]  ;;  %v78_v62 = vld [vmem:[%s4631_s0 + $0x14] sm:$0x3]  ;;  %v209_v1 = vrot.slane %v90_v50, 2 }
  0x25   :  { %v226_v63 = vsel %vm183_vm6, %v225_v46, %v224_v57  ;;  %v202_v0 = vsel %vm168_vm1, %v201_v54, %v200_v58  ;;  %v79_v2 = vld [vmem:[%s4631_s0 + $0x16] sm:$0x3]  ;;  %v80_v3 = vld [vmem:[%s4631_s0 + $0x18] sm:$0x3]  ;;  %v211_v5 = vrot.slane %v91_v53, 1  ;;  %v185_v11 = vrot.slane %v77_v61, 7 }
  0x26   :  { %268 = vmatpush.msra.mxu0 %v226_v63  ;;  %v204_v4 = vsel %vm171_vm2, %v203_v55, %v202_v0  ;;  %v81_v6 = vld [vmem:[%s4631_s0 + $0x1a] sm:$0x3]  ;;  %v82_v7 = vld [vmem:[%s4631_s0 + $0x1c] sm:$0x3]  ;;  %v83_v10 = vld [vmem:[%s4631_s0 + $0x1e] sm:$0x3] }
  0x27   :  { %v206_v9 = vsel %vm174_vm3, %v205_v56, %v204_v4  ;;  %v187_v12 = vrot.slane %v78_v62, 6  ;;  %v189_v13 = vrot.slane %v79_v2, 5  ;;  %v191_v15 = vrot.slane %v80_v3, 4  ;;  %v68_v16 = vld [vmem:[%s4631_s0] sm:$0x3]  ;;  %v63_v45 = vld [vmem:[%s4634_s3 + $0x10] sm:$0xff] }
  0x28   :  { %v208_v14 = vsel %vm177_vm4, %v207_v59, %v206_v9  ;;  %v69_v17 = vld [vmem:[%s4631_s0 + $0x2] sm:$0x3]  ;;  %v186_v19 = vsel %vm165_vm0, %v185_v11, %v76_v60  ;;  %v193_v20 = vrot.slane %v81_v6, 3  ;;  %v70_v21 = vld [vmem:[%s4631_s0 + $0x4] sm:$0x3]  ;;  %v195_v26 = vrot.slane %v82_v7, 2 }
  0x29   :  { %v210_v18 = vsel %vm180_vm5, %v209_v1, %v208_v14  ;;  %v71_v22 = vld [vmem:[%s4631_s0 + $0x6] sm:$0x3]  ;;  %v188_v25 = vsel %vm168_vm1, %v187_v12, %v186_v19  ;;  %v197_v27 = vrot.slane %v83_v10, 1  ;;  %v72_v28 = vld [vmem:[%s4631_s0 + $0x8] sm:$0x3]  ;;  %v164_v32 = vrot.slane %v69_v17, 7 }
  0x2a   :  { %v212_v24 = vsel %vm183_vm6, %v211_v5, %v210_v18  ;;  %v73_v29 = vld [vmem:[%s4631_s0 + $0xa] sm:$0x3]  ;;  %v190_v30 = vsel %vm171_vm2, %v189_v13, %v188_v25  ;;  %v74_v31 = vld [vmem:[%s4631_s0 + $0xc] sm:$0x3]  ;;  %v167_v33 = vrot.slane %v70_v21, 6  ;;  %v170_v34 = vrot.slane %v71_v22, 5 }
  0x2b   :  { %269 = vmatpush.msra.mxu0 %v212_v24  ;;  %v192_v35 = vsel %vm174_vm3, %v191_v15, %v190_v30  ;;  %v75_v36 = vld [vmem:[%s4631_s0 + $0xe] sm:$0x3]  ;;  %v173_v37 = vrot.slane %v72_v28, 4  ;;  %v166_v39 = vsel %vm165_vm0, %v164_v32, %v68_v16  ;;  %v176_v40 = vrot.slane %v73_v29, 3  ;;  %v53_v52 = vld [vmem:[%s4633_s2] sm:$0xff]  ;;  %v64_v54 = vld [vmem:[%s4634_s3 + $0x18] sm:$0xff] }
  0x2c   :  { %2979 = vmatmul.msk.f32.gmra.mxu1 %vm4639_vm7, %v62_v8  ;;  %v194_v38 = vsel %vm177_vm4, %v193_v20, %v192_v35  ;;  %v169_v42 = vsel %vm168_vm1, %v167_v33, %v166_v39  ;;  %v179_v43 = vrot.slane %v74_v31, 2  ;;  %v3596_v44 = vshrl.u32 %v463_v23, 7  ;;  %v54_v55 = vld [vmem:[%s4633_s2 + $0x8] sm:$0xff]  ;;  %v55_v56 = vld [vmem:[%s4633_s2 + $0x10] sm:$0xff]  ;;  %v56_v57 = vld [vmem:[%s4633_s2 + $0x18] sm:$0xff]  ;;  %s2984_s29 = sld [smem:[#allocation3 + $0x3]] }
  0x2d   :  { %v196_v41 = vsel %vm180_vm5, %v195_v26, %v194_v38  ;;  %v172_v47 = vsel %vm171_vm2, %v170_v34, %v169_v42  ;;  %v182_v48 = vrot.slane %v75_v36, 1  ;;  %s2969_s30 = sld [smem:[#allocation6 + $0x1]]  ;;  %vm889_vm8 = vcmask 130048   ;;  %s3298_s10 = smov 128  }
  0x2e   :  { %v198_v46 = vsel %vm183_vm6, %v197_v27, %v196_v41  ;;  %v175_v49 = vsel %vm174_vm3, %v173_v37, %v172_v47  ;;  %3046 = vset.pattern.permute.xlu1 %v3596_v44  ;;  %3045 = vset.pattern.permute.xlu2 %v3596_v44  ;;  %v3633_v47 = vstv %s542_s26  ;;  %s66_s8 = sld [smem:[#allocation6]]  ;;  %s3294_s26 = smov 8  }
  0x2f   :  { %270 = vmatpush.msra.mxu0 %v198_v46  ;;  %v178_v50 = vsel %vm177_vm4, %v176_v40, %v175_v49  ;;  %3044 = vset.pattern.permute.xlu0 %v3596_v44  ;;  %s3013_s23 = sld [smem:[#allocation3 + $0x1]] }
  0x30   :  { %v181_v51 = vsel %vm180_vm5, %v179_v43, %v178_v50  ;;  %s3014_s24 = sld [smem:[#allocation3 + $0x2]] }
  0x31   :  { %v184_v53 = vsel %vm183_vm6, %v182_v48, %v181_v51  ;;  %v3635_v51 = vstv %s2982_s27  ;;  %s3015_s25 = sld [smem:[#allocation3 + $0x3]]  ;;  %s3295_s27 = smov 16  }
  0x32   :  { %271 = vmatpush.msra.mxu0 %v184_v53 }
  0x33   :  { %2970 = vmatmul.msk.f32.vlgmr.msra.gmra.mxu0 %vm4639_vm7, %v53_v52 }
  0x34   :  { %2980 = vmatmul.msk.f32.gmra.mxu1 %vm4639_vm7, %v63_v45 }
  0x3b   :  { %2971 = vmatmul.msk.f32.gmra.mxu0 %vm4639_vm7, %v54_v55 }
  0x3c   :  { %2981 = vmatmul.msk.f32.gmra.mxu1 %vm4639_vm7, %v64_v54 }
  0x43   :  { %2972 = vmatmul.msk.f32.gmra.mxu0 %vm4639_vm7, %v55_v56 }
  0x4b   :  { %2973 = vmatmul.msk.f32.gmra.mxu0 %vm4639_vm7, %v56_v57 }
  0xa1   :  { %v418_v58 = vpop.f32.mrf.mxu1 }
  0xa2   :  { %v658_v59 = vperm.slane %v418_v58, 2  ;;  %v560_v60 = vperm.slane %v418_v58, 1  ;;  %v462_v61 = vperm.slane %v418_v58, 0  ;;  %v454_v62 = vrot.slane %v418_v58, 4 }
  0xa3   :  { %v756_v1 = vperm.slane %v418_v58, 3 }
  0xa4   :  { %663 = vperm.xlu1 %3046, %v658_v59   ;;  %565 = vperm.xlu2 %3045, %v560_v60   ;;  %v763_v63 = vperm.slane %v454_v62, 3  ;;  %v665_v0 = vperm.slane %v454_v62, 2  ;;  %v469_v5 = vperm.slane %v454_v62, 0  ;;  %v567_v9 = vperm.slane %v454_v62, 1 }
  0xa5   :  { %467 = vperm.xlu0 %3044, %v462_v61   ;;  %v3639_v60 = vstv %s2983_s28 }
  0xa9   :  { %v421_v2 = vpop.f32.mrf.mxu1 }
  0xaa   :  { %v770_v3 = vperm.slane %v421_v2, 3  ;;  %v476_v4 = vperm.slane %v421_v2, 0  ;;  %v455_v6 = vrot.slane %v421_v2, 4  ;;  %v574_v7 = vperm.slane %v421_v2, 1 }
  0xab   :  { %v672_v13 = vperm.slane %v421_v2, 2 }
  0xac   :  { %768 = vperm.xlu1 %3046, %v763_v63   ;;  %670 = vperm.xlu2 %3045, %v665_v0   ;;  %v581_v8 = vperm.slane %v455_v6, 1  ;;  %v483_v12 = vperm.slane %v455_v6, 0  ;;  %v679_v15 = vperm.slane %v455_v6, 2  ;;  %v777_v16 = vperm.slane %v455_v6, 3 }
  0xad   :  { %761 = vperm.xlu0 %3044, %v756_v1   ;;  %v3642_v0 = vstv %s2984_s29 }
  0xb0   :  { %v273_v37 = vpop.f32.mrf.mxu0 }
  0xb1   :  { %v424_v10 = vpop.f32.mrf.mxu1  ;;  %v616_v38 = vperm.slane %v273_v37, 1  ;;  %v518_v39 = vperm.slane %v273_v37, 0  ;;  %v714_v42 = vperm.slane %v273_v37, 2  ;;  %v812_v53 = vperm.slane %v273_v37, 3 }
  0xb2   :  { %v490_v11 = vperm.slane %v424_v10, 0  ;;  %v686_v14 = vperm.slane %v424_v10, 2  ;;  %v456_v17 = vrot.slane %v424_v10, 4  ;;  %v784_v18 = vperm.slane %v424_v10, 3 }
  0xb3   :  { %v588_v20 = vperm.slane %v424_v10, 1  ;;  %v3651_v10 = vstv %s2969_s30  ;;  %s2955_s30 = sshll.u32 %s4638_s7, 4  ;;  %s2956_s30 = int_to_ptr.hbm [resolvable:$true] %s2955_s30 }
  0xb4   :  { %775 = vperm.xlu2 %3045, %v770_v3   ;;  %481 = vperm.xlu1 %3046, %v476_v4   ;;  %v497_v19 = vperm.slane %v456_v17, 0  ;;  %v595_v21 = vperm.slane %v456_v17, 1  ;;  %v791_v22 = vperm.slane %v456_v17, 3  ;;  %v693_v24 = vperm.slane %v456_v17, 2 }
  0xb5   :  { %474 = vperm.xlu0 %3044, %v469_v5   ;;  %v3648_v3 = vstv %s4636_s5  ;;  %v434_v4 = vrot.slane %v273_v37, 4 }
  0xb9   :  { %v427_v25 = vpop.f32.mrf.mxu1 }
  0xba   :  { %v700_v26 = vperm.slane %v427_v25, 2  ;;  %v602_v27 = vperm.slane %v427_v25, 1  ;;  %v504_v28 = vperm.slane %v427_v25, 0  ;;  %v457_v29 = vrot.slane %v427_v25, 4 }
  0xbb   :  { %v798_v32 = vperm.slane %v427_v25, 3 }
  0xbc   :  { %579 = vperm.xlu1 %3046, %v574_v7   ;;  %586 = vperm.xlu2 %3045, %v581_v8   ;;  %v707_v30 = vperm.slane %v457_v29, 2  ;;  %v511_v31 = vperm.slane %v457_v29, 0  ;;  %v805_v33 = vperm.slane %v457_v29, 3  ;;  %v609_v34 = vperm.slane %v457_v29, 1 }
  0xbd   :  { %572 = vperm.xlu0 %3044, %v567_v9   ;;  %v519_v8 = vperm.slane %v434_v4, 0 }
  0xc4   :  { %488 = vperm.xlu1 %3046, %v483_v12   ;;  %495 = vperm.xlu2 %3045, %v490_v11   ;;  %v715_v11 = vperm.slane %v434_v4, 2 }
  0xc5   :  { %677 = vperm.xlu0 %3044, %v672_v13   ;;  %v276_v13 = vpop.f32.mrf.mxu0 }
  0xcc   :  { %684 = vperm.xlu1 %3046, %v679_v15   ;;  %691 = vperm.xlu2 %3045, %v686_v14   ;;  %v813_v14 = vperm.slane %v434_v4, 3 }
  0xcd   :  { %782 = vperm.xlu0 %3044, %v777_v16   ;;  %v3655_v16 = vstv %s66_s8  ;;  %s3297_s8 = smov [#allocation8]  }
  0xce   :  { %s2953_s9 = sshll.u32 %s3297_s8, 4  ;;  %s2954_s9 = int_to_ptr.vmem [resolvable:$true] %s2953_s9 }
  0xd4   :  { %789 = vperm.xlu1 %3046, %v784_v18   ;;  %502 = vperm.xlu2 %3045, %v497_v19   ;;  %v617_v18 = vperm.slane %v434_v4, 1  ;;  %v618_v19 = vperm.slane %v276_v13, 1 }
  0xd5   :  { %593 = vperm.xlu0 %3044, %v588_v20  }
  0xdc   :  { %600 = vperm.xlu1 %3046, %v595_v21   ;;  %796 = vperm.xlu2 %3045, %v791_v22   ;;  %v520_v22 = vperm.slane %v276_v13, 0 }
  0xdd   :  { %698 = vperm.xlu0 %3044, %v693_v24  }
  0xe4   :  { %705 = vperm.xlu1 %3046, %v700_v26   ;;  %607 = vperm.xlu2 %3045, %v602_v27  }
  0xe5   :  { %509 = vperm.xlu0 %3044, %v504_v28  }
  0xec   :  { %712 = vperm.xlu2 %3045, %v707_v30   ;;  %516 = vperm.xlu1 %3046, %v511_v31  }
  0xed   :  { %803 = vperm.xlu0 %3044, %v798_v32   ;;  %v435_v32 = vrot.slane %v276_v13, 4 }
  0xf4   :  { %810 = vperm.xlu1 %3046, %v805_v33  }
  0xf5   :  { %614 = vperm.xlu0 %3044, %v609_v34   ;;  %v814_v34 = vperm.slane %v276_v13, 3 }
  0xfe   :  { %v566_v35 = vpop.permute.xlu2 %565 }
  0xff   :  { %v624_v40 = vsub.f32 %v566_v35, %v616_v38  ;;  %v521_v38 = vperm.slane %v435_v32, 0 }
 0x101   :  { %v632_v48 = vmax.f32 %v624_v40, 0.0 }
 0x103   :  { %v642_v54 = vmul.f32 %v3635_v51, %v632_v48 }
 0x106   :  { %v671_v36 = vpop.permute.xlu2 %670 }
 0x107   :  { %v723_v21 = vsub.f32 %v671_v36, %v715_v11  ;;  %v716_v36 = vperm.slane %v276_v13, 2  ;;  %v717_v11 = vperm.slane %v435_v32, 2 }
 0x109   :  { %v731_v33 = vmax.f32 %v723_v21, 0.0 }
 0x10b   :  { %v741_v48 = vmul.f32 %v3639_v60, %v731_v33 }
 0x10e   :  { %v3631_v43 = vpop.permute.xlu2 %775 }
 0x116   :  { %v664_v41 = vpop.permute.xlu1 %663  ;;  %v587_v61 = vpop.permute.xlu2 %586 }
 0x117   :  { %v468_v45 = vpop.permute.xlu0 %467  ;;  %v722_v49 = vsub.f32 %v664_v41, %v714_v42 }
 0x118   :  { %v526_v46 = vsub.f32 %v468_v45, %v518_v39  ;;  %v619_v45 = vperm.slane %v435_v32, 1 }
 0x119   :  { %v730_v55 = vmax.f32 %v722_v49, 0.0  ;;  %v822_v49 = vsub.f32 %v3631_v43, %v814_v34 }
 0x11a   :  { %v534_v50 = vmax.f32 %v526_v46, 0.0 }
 0x11b   :  { %v740_v62 = vmul.f32 %v3639_v60, %v730_v55 }
 0x11c   :  { %v544_v52 = vmul.f32 %v3633_v47, %v534_v50 }
 0x11e   :  { %v769_v56 = vpop.permute.xlu1 %768  ;;  %v650_v58 = vadd.f32 %v642_v54, %v544_v52  ;;  %v3653_v15 = vpop.permute.xlu2 %495 }
 0x11f   :  { %v762_v57 = vpop.permute.xlu0 %761  ;;  %v821_v26 = vsub.f32 %v769_v56, %v813_v14  ;;  %v815_v14 = vperm.slane %v435_v32, 3 }
 0x120   :  { %v820_v59 = vsub.f32 %v762_v57, %v812_v53  ;;  %v748_v1 = vadd.f32 %v740_v62, %v650_v58  ;;  %v627_v62 = vsub.f32 %v587_v61, %v619_v45 }
 0x121   :  { %v829_v39 = vmax.f32 %v821_v26, 0.0 }
 0x122   :  { %v828_v63 = vmax.f32 %v820_v59, 0.0 }
 0x123   :  { %v839_v56 = vmul.f32 %v3642_v0, %v829_v39 }
 0x124   :  { %v838_v2 = vmul.f32 %v3642_v0, %v828_v63 }
 0x126   :  { %v846_v5 = vadd.f32 %v838_v2, %v748_v1  ;;  %v482_v6 = vpop.permute.xlu1 %481  ;;  %v692_v46 = vpop.permute.xlu2 %691  ;;  %v830_v2 = vmax.f32 %v822_v49, 0.0 }
 0x127   :  { %v475_v7 = vpop.permute.xlu0 %474  ;;  %v528_v35 = vsub.f32 %v482_v6, %v520_v22  ;;  %v279_v6 = vpop.f32.mrf.mxu0 }
 0x128   :  { %v855_v9 = vadd.f32 %v3648_v3, %v846_v5  ;;  %v527_v17 = vsub.f32 %v475_v7, %v519_v8  ;;  %v840_v13 = vmul.f32 %v3642_v0, %v830_v2  ;;  %v436_v34 = vrot.slane %v279_v6, 4 }
 0x129   :  { %v536_v50 = vmax.f32 %v528_v35, 0.0  ;;  %v816_v39 = vperm.slane %v279_v6, 3 }
 0x12a   :  { %v863_v12 = vmax.f32 %v855_v9, 0.0  ;;  %v535_v28 = vmax.f32 %v527_v17, 0.0  ;;  %v635_v9 = vmax.f32 %v627_v62, 0.0  ;;  %v817_v2 = vperm.slane %v436_v34, 3 }
 0x12b   :  { %v546_v63 = vmul.f32 %v3633_v47, %v536_v50 }
 0x12c   :  { %v872_v20 = vmul.f32 %v3651_v10, %v863_v12  ;;  %v545_v40 = vmul.f32 %v3633_v47, %v535_v28  ;;  %v645_v28 = vmul.f32 %v3635_v51, %v635_v9 }
 0x12e   :  { %v580_v24 = vpop.permute.xlu1 %579  ;;  %v3659_v25 = vadd.f32 %v3655_v16, %v872_v20 }
 0x12f   :  { %v573_v27 = vpop.permute.xlu0 %572  ;;  %v626_v30 = vsub.f32 %v580_v24, %v618_v19  ;;  %v503_v19 = vpop.permute.xlu2 %502 }
 0x130   :  { %v625_v29 = vsub.f32 %v573_v27, %v617_v18  ;;  %v890_v31 = vsel %vm889_vm8, %v3659_v25, -inf  ;;  %v522_v18 = vperm.slane %v279_v6, 0 }
 0x131   :  { %891 = vmax.xlane.f32.xlu2 %v890_v31  ;;  %v634_v42 = vmax.f32 %v626_v30, 0.0  ;;  %v718_v30 = vperm.slane %v279_v6, 2 }
 0x132   :  { %v633_v37 = vmax.f32 %v625_v29, 0.0 }
 0x133   :  { %v644_v58 = vmul.f32 %v3635_v51, %v634_v42 }
 0x134   :  { %v643_v41 = vmul.f32 %v3635_v51, %v633_v37 }
 0x135   :  { %v652_v43 = vadd.f32 %v644_v58, %v546_v63 }
 0x136   :  { %v651_v52 = vadd.f32 %v643_v41, %v545_v40  ;;  %v489_v53 = vpop.permute.xlu1 %488  ;;  %v620_v40 = vperm.slane %v279_v6, 1 }
 0x137   :  { %v678_v54 = vpop.permute.xlu0 %677  ;;  %v529_v55 = vsub.f32 %v489_v53, %v521_v38  ;;  %v797_v58 = vpop.permute.xlu2 %796 }
 0x138   :  { %v749_v57 = vadd.f32 %v741_v48, %v651_v52  ;;  %v724_v59 = vsub.f32 %v678_v54, %v716_v36  ;;  %v530_v36 = vsub.f32 %v3653_v15, %v522_v18  ;;  %v726_v48 = vsub.f32 %v692_v46, %v718_v30 }
 0x139   :  { %v537_v5 = vmax.f32 %v529_v55, 0.0  ;;  %v523_v52 = vperm.slane %v436_v34, 0 }
 0x13a   :  { %v732_v1 = vmax.f32 %v724_v59, 0.0  ;;  %v847_v4 = vadd.f32 %v839_v56, %v749_v57  ;;  %v538_v56 = vmax.f32 %v530_v36, 0.0  ;;  %v734_v62 = vmax.f32 %v726_v48, 0.0 }
 0x13b   :  { %v547_v20 = vmul.f32 %v3633_v47, %v537_v5 }
 0x13c   :  { %v742_v7 = vmul.f32 %v3639_v60, %v732_v1  ;;  %v856_v8 = vadd.f32 %v3648_v3, %v847_v4  ;;  %v531_v1 = vsub.f32 %v503_v19, %v523_v52  ;;  %v548_v6 = vmul.f32 %v3633_v47, %v538_v56 }
 0x13d   :  { %v653_v35 = vadd.f32 %v645_v28, %v547_v20  ;;  %v744_v9 = vmul.f32 %v3639_v60, %v734_v62 }
 0x13e   :  { %v750_v12 = vadd.f32 %v742_v7, %v652_v43  ;;  %v685_v17 = vpop.permute.xlu1 %684  ;;  %v864_v61 = vmax.f32 %v856_v8, 0.0  ;;  %v621_v7 = vperm.slane %v436_v34, 1 }
 0x13f   :  { %v783_v21 = vpop.permute.xlu0 %782  ;;  %v725_v22 = vsub.f32 %v685_v17, %v717_v11  ;;  %v825_v17 = vsub.f32 %v797_v58, %v817_v2  ;;  %v3718_v2 = vld [vmem:[%s4633_s2 + $0x20] sm:$0xff] }
 0x140   :  { %v848_v24 = vadd.f32 %v840_v13, %v750_v12  ;;  %v823_v26 = vsub.f32 %v783_v21, %v815_v14  ;;  %v873_v27 = vmul.f32 %v3651_v10, %v864_v61  ;;  %v719_v12 = vperm.slane %v436_v34, 2  ;;  %v282_v61 = vpop.f32.mrf.mxu0  ;;  %v608_v34 = vpop.permute.xlu2 %607  ;;  %2974 = vmatmul.msk.f32.gmra.mxu0 %vm4639_vm7, %v3718_v2 }
 0x141   :  { %v733_v29 = vmax.f32 %v725_v22, 0.0  ;;  %v539_v14 = vmax.f32 %v531_v1, 0.0  ;;  %v622_v28 = vperm.slane %v282_v61, 1 }
 0x142   :  { %v831_v31 = vmax.f32 %v823_v26, 0.0  ;;  %v3677_v33 = vadd.f32 %v3655_v16, %v873_v27  ;;  %v857_v32 = vadd.f32 %v3648_v3, %v848_v24 }
 0x143   :  { %v743_v37 = vmul.f32 %v3639_v60, %v733_v29 }
 0x144   :  { %v893_v38 = vsel %vm889_vm8, %v3677_v33, -inf  ;;  %v865_v41 = vmax.f32 %v857_v32, 0.0  ;;  %v841_v42 = vmul.f32 %v3642_v0, %v831_v31  ;;  %v549_v31 = vmul.f32 %v3633_v47, %v539_v14 }
 0x145   :  { %v751_v45 = vadd.f32 %v743_v37, %v653_v35  ;;  %894 = vmax.xlane.f32.xlu0 %v893_v38  ;;  %v833_v32 = vmax.f32 %v825_v17, 0.0  ;;  %v524_v37 = vperm.slane %v282_v61, 0 }
 0x146   :  { %v790_v49 = vpop.permute.xlu1 %789  ;;  %v874_v50 = vmul.f32 %v3651_v10, %v865_v41 }
 0x147   :  { %v849_v53 = vadd.f32 %v841_v42, %v751_v45  ;;  %v594_v54 = vpop.permute.xlu0 %593  ;;  %v824_v55 = vsub.f32 %v790_v49, %v816_v39  ;;  %v720_v42 = vperm.slane %v282_v61, 2  ;;  %v843_v48 = vmul.f32 %v3642_v0, %v833_v32 }
 0x148   :  { %v628_v15 = vsub.f32 %v594_v54, %v620_v40  ;;  %v3687_v57 = vadd.f32 %v3655_v16, %v874_v50  ;;  %v630_v40 = vsub.f32 %v608_v34, %v622_v28 }
 0x149   :  { %v858_v59 = vadd.f32 %v3648_v3, %v849_v53  ;;  %v832_v5 = vmax.f32 %v824_v55, 0.0 }
 0x14a   :  { %v636_v63 = vmax.f32 %v628_v15, 0.0  ;;  %v896_v46 = vsel %vm889_vm8, %v3687_v57, -inf  ;;  %v638_v55 = vmax.f32 %v630_v40, 0.0 }
 0x14b   :  { %897 = vmax.xlane.f32.xlu1 %v896_v46  ;;  %v866_v4 = vmax.f32 %v858_v59, 0.0  ;;  %v842_v21 = vmul.f32 %v3642_v0, %v832_v5  ;;  %v818_v46 = vperm.slane %v282_v61, 3 }
 0x14c   :  { %v646_v43 = vmul.f32 %v3635_v51, %v636_v63  ;;  %v648_v5 = vmul.f32 %v3635_v51, %v638_v55 }
 0x14d   :  { %v875_v8 = vmul.f32 %v3651_v10, %v866_v4  ;;  %v437_v4 = vrot.slane %v282_v61, 4 }
 0x14e   :  { %v654_v11 = vadd.f32 %v646_v43, %v548_v6  ;;  %v601_v13 = vpop.permute.xlu1 %600 }
 0x14f   :  { %v699_v18 = vpop.permute.xlu0 %698  ;;  %v629_v19 = vsub.f32 %v601_v13, %v621_v7  ;;  %v3697_v20 = vadd.f32 %v3655_v16, %v875_v8  ;;  %v721_v14 = vperm.slane %v437_v4, 2  ;;  %v623_v28 = vperm.slane %v437_v4, 1 }
 0x150   :  { %v752_v22 = vadd.f32 %v744_v9, %v654_v11  ;;  %v727_v24 = vsub.f32 %v699_v18, %v719_v12  ;;  %v525_v12 = vperm.slane %v437_v4, 0  ;;  %v713_v18 = vpop.permute.xlu2 %712 }
 0x151   :  { %v637_v26 = vmax.f32 %v629_v19, 0.0  ;;  %v899_v27 = vsel %vm889_vm8, %v3697_v20, -inf }
 0x152   :  { %v735_v29 = vmax.f32 %v727_v24, 0.0  ;;  %900 = vmax.xlane.f32.xlu2 %v899_v27  ;;  %v850_v30 = vadd.f32 %v842_v21, %v752_v22 }
 0x153   :  { %v647_v35 = vmul.f32 %v3635_v51, %v637_v26  ;;  %v729_v26 = vsub.f32 %v713_v18, %v721_v14 }
 0x154   :  { %v859_v36 = vadd.f32 %v3648_v3, %v850_v30  ;;  %v745_v38 = vmul.f32 %v3639_v60, %v735_v29  ;;  %v819_v30 = vperm.slane %v437_v4, 3 }
 0x155   :  { %v655_v39 = vadd.f32 %v647_v35, %v549_v31 }
 0x156   :  { %v706_v41 = vpop.permute.xlu1 %705  ;;  %v867_v45 = vmax.f32 %v859_v36, 0.0  ;;  %v737_v36 = vmax.f32 %v729_v26, 0.0 }
 0x157   :  { %v753_v49 = vadd.f32 %v745_v38, %v655_v39  ;;  %v510_v50 = vpop.permute.xlu0 %509  ;;  %v728_v56 = vsub.f32 %v706_v41, %v720_v42 }
 0x158   :  { %v532_v52 = vsub.f32 %v510_v50, %v524_v37  ;;  %v876_v53 = vmul.f32 %v3651_v10, %v867_v45 }
 0x159   :  { %v851_v54 = vadd.f32 %v843_v48, %v753_v49  ;;  %v736_v6 = vmax.f32 %v728_v56, 0.0  ;;  %v747_v48 = vmul.f32 %v3639_v60, %v737_v36 }
 0x15a   :  { %v540_v15 = vmax.f32 %v532_v52, 0.0  ;;  %v3709_v58 = vadd.f32 %v3655_v16, %v876_v53 }
 0x15b   :  { %v860_v59 = vadd.f32 %v3648_v3, %v851_v54  ;;  %v746_v17 = vmul.f32 %v3639_v60, %v736_v6 }
 0x15c   :  { %v550_v62 = vmul.f32 %v3633_v47, %v540_v15  ;;  %v902_v63 = vsel %vm889_vm8, %v3709_v58, -inf }
 0x15d   :  { %903 = vmax.xlane.f32.xlu2 %v902_v63  ;;  %v868_v1 = vmax.f32 %v860_v59, 0.0 }
 0x15e   :  { %v517_v43 = vpop.permute.xlu1 %516  ;;  %v656_v9 = vadd.f32 %v648_v5, %v550_v62 }
 0x15f   :  { %v804_v7 = vpop.permute.xlu0 %803  ;;  %v877_v8 = vmul.f32 %v3651_v10, %v868_v1  ;;  %v533_v24 = vsub.f32 %v517_v43, %v525_v12  ;;  %v3765_v43 = vld [vmem:[%s4633_s2 + $0x30] sm:$0xff] }
 0x160   :  { %v826_v11 = vsub.f32 %v804_v7, %v818_v46  ;;  %v754_v21 = vadd.f32 %v746_v17, %v656_v9 }
 0x161   :  { %v3725_v13 = vadd.f32 %v3655_v16, %v877_v8  ;;  %v541_v32 = vmax.f32 %v533_v24, 0.0 }
 0x162   :  { %v834_v61 = vmax.f32 %v826_v11, 0.0 }
 0x163   :  { %v905_v19 = vsel %vm889_vm8, %v3725_v13, -inf  ;;  %v551_v40 = vmul.f32 %v3633_v47, %v541_v32 }
 0x164   :  { %v844_v22 = vmul.f32 %v3642_v0, %v834_v61  ;;  %906 = vmax.xlane.f32.xlu0 %v905_v19 }
 0x166   :  { %v852_v27 = vadd.f32 %v844_v22, %v754_v21  ;;  %v811_v29 = vpop.permute.xlu1 %810 }
 0x167   :  { %v615_v31 = vpop.permute.xlu0 %614  ;;  %v827_v35 = vsub.f32 %v811_v29, %v819_v30 }
 0x168   :  { %v631_v34 = vsub.f32 %v615_v31, %v623_v28  ;;  %v861_v37 = vadd.f32 %v3648_v3, %v852_v27 }
 0x169   :  { %v835_v42 = vmax.f32 %v827_v35, 0.0 }
 0x16a   :  { %v639_v38 = vmax.f32 %v631_v34, 0.0  ;;  %v869_v39 = vmax.f32 %v861_v37, 0.0 }
 0x16b   :  { %v845_v53 = vmul.f32 %v3642_v0, %v835_v42  ;;  %v3752_v0 = vld [vmem:[%s4633_s2 + $0x28] sm:$0xff] }
 0x16c   :  { %v649_v41 = vmul.f32 %v3635_v51, %v639_v38  ;;  %v878_v45 = vmul.f32 %v3651_v10, %v869_v39  ;;  %2975 = vmatmul.msk.f32.gmra.mxu0 %vm4639_vm7, %v3752_v0 }
 0x16e   :  { %v657_v49 = vadd.f32 %v649_v41, %v551_v40  ;;  %v3737_v50 = vadd.f32 %v3655_v16, %v878_v45 }
 0x170   :  { %v755_v52 = vadd.f32 %v747_v48, %v657_v49  ;;  %v908_v54 = vsel %vm889_vm8, %v3737_v50, -inf }
 0x171   :  { %909 = vmax.xlane.f32.xlu1 %v908_v54 }
 0x172   :  { %v853_v55 = vadd.f32 %v845_v53, %v755_v52 }
 0x174   :  { %v862_v47 = vadd.f32 %v3648_v3, %v853_v55  ;;  %2976 = vmatmul.msk.f32.gmra.mxu0 %vm4639_vm7, %v3765_v43 }
 0x176   :  { %v870_v51 = vmax.f32 %v862_v47, 0.0 }
 0x178   :  { %v879_v56 = vmul.f32 %v3651_v10, %v870_v51 }
 0x17a   :  { %v3745_v15 = vadd.f32 %v3655_v16, %v879_v56 }
 0x17c   :  { %v911_v60 = vsel %vm889_vm8, %v3745_v15, -inf }
 0x17d   :  { %912 = vmax.xlane.f32.xlu2 %v911_v60 }
 0x1a4   :  { %v892_v59 = vpop.xlane.xlu2 %891 }
 0x1a5   :  { %v914_v62 = vsub.f32 %v3659_v25, %v892_v59 }
 0x1a7   :  { %v922_v63 = vmul.f32 1.442695, %v914_v62 }
 0x1a9   :  { %3098 = vpow2.f32 %v922_v63 }
 0x1af   :  { %v3757_v46 = vpop.eup %3098 }
 0x1b0   :  { %v938_v1 = vsel %vm889_vm8, %v3757_v46, 0.0 }
 0x1b1   :  { %939 = vadd.xlane.f32.xlu0 %v938_v1 }
 0x1b8   :  { %v895_v4 = vpop.xlane.xlu0 %894 }
 0x1b9   :  { %v915_v5 = vsub.f32 %v3677_v33, %v895_v4 }
 0x1bb   :  { %v924_v6 = vmul.f32 1.442695, %v915_v5 }
 0x1bd   :  { %3100 = vpow2.f32 %v924_v6  ;;  %v285_v29 = vpop.f32.mrf.mxu0 }
 0x1be   :  { %v898_v7 = vpop.xlane.xlu1 %897  ;;  %2985 = vmatpush.xpose.msk.msrb.mxu0 %vm889_vm8, %v285_v29  ;;  %v446_v30 = vrot.slane %v285_v29, 4 }
 0x1bf   :  { %v916_v25 = vsub.f32 %v3687_v57, %v898_v7 }
 0x1c0   :  { %2987 = vmatpush.xpose.msk.msra.mxu3 %vm889_vm8, %v446_v30 }
 0x1c1   :  { %v926_v8 = vmul.f32 1.442695, %v916_v25 }
 0x1c3   :  { %v3770_v9 = vpop.eup %3100  ;;  %3102 = vpow2.f32 %v926_v8 }
 0x1c4   :  { %v941_v33 = vsel %vm889_vm8, %v3770_v9, 0.0 }
 0x1c5   :  { %942 = vadd.xlane.f32.xlu1 %v941_v33  ;;  %v901_v11 = vpop.xlane.xlu2 %900 }
 0x1c6   :  { %v917_v12 = vsub.f32 %v3697_v20, %v901_v11  ;;  %v3787_v20 = vld [vmem:[%s4633_s2 + $0x38] sm:$0xff] }
 0x1c7   :  { %2977 = vmatmul.msk.f32.gmra.mxu0 %vm4639_vm7, %v3787_v20 }
 0x1c8   :  { %v928_v14 = vmul.f32 1.442695, %v917_v12 }
 0x1c9   :  { %v3775_v17 = vpop.eup %3102 }
 0x1ca   :  { %3104 = vpow2.f32 %v928_v14  ;;  %v944_v61 = vsel %vm889_vm8, %v3775_v17, 0.0 }
 0x1cb   :  { %945 = vadd.xlane.f32.xlu2 %v944_v61 }
 0x1d0   :  { %v3779_v57 = vpop.eup %3104  ;;  %v904_v18 = vpop.xlane.xlu2 %903 }
 0x1d1   :  { %v918_v19 = vsub.f32 %v3709_v58, %v904_v18  ;;  %v947_v21 = vsel %vm889_vm8, %v3779_v57, 0.0 }
 0x1d2   :  { %948 = vadd.xlane.f32.xlu0 %v947_v21 }
 0x1d3   :  { %v930_v22 = vmul.f32 1.442695, %v918_v19 }
 0x1d5   :  { %3106 = vpow2.f32 %v930_v22 }
 0x1d7   :  { %v907_v24 = vpop.xlane.xlu0 %906 }
 0x1d8   :  { %v919_v26 = vsub.f32 %v3725_v13, %v907_v24 }
 0x1da   :  { %v932_v27 = vmul.f32 1.442695, %v919_v26 }
 0x1db   :  { %v3792_v28 = vpop.eup %3106 }
 0x1dc   :  { %3108 = vpow2.f32 %v932_v27  ;;  %v950_v58 = vsel %vm889_vm8, %v3792_v28, 0.0 }
 0x1dd   :  { %951 = vadd.xlane.f32.xlu1 %v950_v58 }
 0x1e2   :  { %v3798_v31 = vpop.eup %3108 }
 0x1e3   :  { %v953_v32 = vsel %vm889_vm8, %v3798_v31, 0.0 }
 0x1e4   :  { %v910_v13 = vpop.xlane.xlu1 %909  ;;  %954 = vadd.xlane.f32.xlu2 %v953_v32 }
 0x1e5   :  { %v920_v34 = vsub.f32 %v3737_v50, %v910_v13 }
 0x1e7   :  { %v934_v35 = vmul.f32 1.442695, %v920_v34 }
 0x1e9   :  { %3110 = vpow2.f32 %v934_v35  ;;  %v288_v45 = vpop.f32.mrf.mxu0 }
 0x1ea   :  { %v447_v48 = vrot.slane %v288_v45, 4  ;;  %2989 = vmatpush.xpose.msk.msrb.mxu1 %vm889_vm8, %v288_v45 }
 0x1ec   :  { %2991 = vmatpush.xpose.msk.msrb.mxu3 %vm889_vm8, %v447_v48 }
 0x1ef   :  { %v3803_v37 = vpop.eup %3110 }
 0x1f0   :  { %v913_v36 = vpop.xlane.xlu2 %912  ;;  %v956_v38 = vsel %vm889_vm8, %v3803_v37, 0.0 }
 0x1f1   :  { %v921_v39 = vsub.f32 %v3745_v15, %v913_v36  ;;  %957 = vadd.xlane.f32.xlu0 %v956_v38  ;;  %v291_v5 = vpop.f32.mrf.mxu0 }
 0x1f2   :  { %2993 = vmatpush.xpose.msk.msra.mxu2 %vm889_vm8, %v291_v5  ;;  %v448_v26 = vrot.slane %v291_v5, 4 }
 0x1f3   :  { %v936_v40 = vmul.f32 1.442695, %v921_v39 }
 0x1f5   :  { %3112 = vpow2.f32 %v936_v40 }
 0x1fb   :  { %v3808_v41 = vpop.eup %3112 }
 0x1fc   :  { %v959_v42 = vsel %vm889_vm8, %v3808_v41, 0.0 }
 0x1fd   :  { %960 = vadd.xlane.f32.xlu1 %v959_v42 }
 0x224   :  { %v940_v49 = vpop.xlane.xlu0 %939 }
 0x225   :  { %3114 = vrcp.f32 %v940_v49  ;;  %v973_v54 = vand.u32 2147483648, %v940_v49  ;;  %v971_v47 = vand.u32 2147483647, %v940_v49  ;;  %vm967_vm10 = vweird.f32 %v940_v49 }
 0x227   :  { %v974_v56 = vor.u32 1.1754944e-38, %v973_v54  ;;  %vm972_vm12 = vcmp.eq.f32.partialorder %v971_v47, 8.507059e+37 }
 0x22b   :  { %v3115_v50 = vpop.eup %3114 }
 0x22c   :  { %v963_v52 = vmul.f32 %v3115_v50, %v940_v49  ;;  %vm968_vm9 = vweird.f32 %v3115_v50 }
 0x22d   :  { %vm969_vm11 = vmor %vm967_vm10, %vm968_vm9 }
 0x22e   :  { %v964_v53 = vsub.f32 1.0, %v963_v52 }
 0x230   :  { %v965_v55 = vmul.f32 %v3115_v50, %v964_v53 }
 0x232   :  { %v966_v51 = vadd.f32 %v3115_v50, %v965_v55 }
 0x234   :  { %v970_v15 = vsel %vm969_vm11, %v3115_v50, %v966_v51 }
 0x235   :  { %v975_v60 = vsel %vm972_vm12, %v974_v56, %v970_v15 }
 0x236   :  { %v1074_v59 = vmul.f32 %v3757_v46, %v975_v60 }
 0x238   :  { %v943_v62 = vpop.xlane.xlu1 %942  ;;  %2986 = vmatmul.msk.f32.vlgmr.msrb.gmra.mxu0 %vm889_vm8, %v1074_v59 }
 0x239   :  { %3116 = vrcp.f32 %v943_v62  ;;  %v987_v25 = vand.u32 2147483648, %v943_v62  ;;  %v985_v11 = vand.u32 2147483647, %v943_v62  ;;  %vm981_vm14 = vweird.f32 %v943_v62 }
 0x23b   :  { %v988_v61 = vor.u32 1.1754944e-38, %v987_v25  ;;  %vm986_vm9 = vcmp.eq.f32.partialorder %v985_v11, 8.507059e+37  ;;  %v3166_v11 = vld [vmem:[%s4632_s1 + $0x38] sm:$0x3] }
 0x23e   :  { %v946_v63 = vpop.xlane.xlu2 %945 }
 0x23f   :  { %v3117_v1 = vpop.eup %3116  ;;  %3118 = vrcp.f32 %v946_v63  ;;  %v1001_v18 = vand.u32 2147483648, %v946_v63  ;;  %v999_v21 = vand.u32 2147483647, %v946_v63  ;;  %vm995_vm11 = vweird.f32 %v946_v63 }
 0x240   :  { %v977_v4 = vmul.f32 %v3117_v1, %v943_v62  ;;  %vm982_vm13 = vweird.f32 %v3117_v1  ;;  %v3162_v62 = vld [vmem:[%s4632_s1 + $0x30] sm:$0x3] }
 0x241   :  { %vm983_vm15 = vmor %vm981_vm14, %vm982_vm13  ;;  %v1002_v30 = vor.u32 1.1754944e-38, %v1001_v18  ;;  %vm1000_vm13 = vcmp.eq.f32.partialorder %v999_v21, 8.507059e+37 }
 0x242   :  { %v978_v6 = vsub.f32 1.0, %v977_v4  ;;  %v3163_v4 = vld [vmem:[%s4632_s1 + $0x34] sm:$0x3] }
 0x243   :  { %v1743_v5 = vrot.slane %v3163_v4, 7 }
 0x244   :  { %v979_v7 = vmul.f32 %v3117_v1, %v978_v6  ;;  %v294_v49 = vpop.f32.mrf.mxu0  ;;  %v3164_v6 = vld [vmem:[%s4632_s1 + $0x20] sm:$0x3] }
 0x245   :  { %v3119_v8 = vpop.eup %3118  ;;  %v949_v33 = vpop.xlane.xlu0 %948  ;;  %2997 = vmatpush.xpose.msk.msrb.mxu2 %vm889_vm8, %v294_v49  ;;  %v449_v15 = vrot.slane %v294_v49, 4 }
 0x246   :  { %v991_v12 = vmul.f32 %v3119_v8, %v946_v63  ;;  %3120 = vrcp.f32 %v949_v33  ;;  %v980_v46 = vadd.f32 %v3117_v1, %v979_v7  ;;  %vm996_vm10 = vweird.f32 %v3119_v8 }
 0x247   :  { %vm997_vm12 = vmor %vm995_vm11, %vm996_vm10  ;;  %v1015_v36 = vand.u32 2147483648, %v949_v33  ;;  %v1741_v63 = vrot.slane %v3162_v62, 1  ;;  %v1727_v7 = vrot.slane %v3164_v6, 1 }
 0x248   :  { %v992_v14 = vsub.f32 1.0, %v991_v12  ;;  %v984_v19 = vsel %vm983_vm15, %v3117_v1, %v980_v46  ;;  %vm1009_vm15 = vweird.f32 %v949_v33  ;;  %v1747_v12 = vrot.slane %v3166_v11, 5 }
 0x249   :  { %v989_v24 = vsel %vm986_vm9, %v988_v61, %v984_v19  ;;  %v1016_v45 = vor.u32 1.1754944e-38, %v1015_v36  ;;  %v3167_v61 = vld [vmem:[%s4632_s1 + $0x3a] sm:$0x3]  ;;  %v3168_v19 = vld [vmem:[%s4632_s1 + $0x3c] sm:$0x3] }
 0x24a   :  { %v993_v22 = vmul.f32 %v3119_v8, %v992_v14  ;;  %v1075_v27 = vmul.f32 %v3770_v9, %v989_v24  ;;  %v1013_v9 = vand.u32 2147483647, %v949_v33  ;;  %v1749_v18 = vrot.slane %v3167_v61, 4  ;;  %v3183_v61 = vld [vmem:[%s4632_s1 + $0x18] sm:$0x3] }
 0x24b   :  { %v1751_v21 = vrot.slane %v3168_v19, 3 }
 0x24c   :  { %v3121_v58 = vpop.eup %3120  ;;  %v994_v29 = vadd.f32 %v3119_v8, %v993_v22  ;;  %2988 = vmatmul.msk.f32.vlgmr.msra.gmra.mxu3 %vm889_vm8, %v1075_v27  ;;  %vm1014_vm10 = vcmp.eq.f32.partialorder %v1013_v9, 8.507059e+37 }
 0x24d   :  { %v1005_v32 = vmul.f32 %v3121_v58, %v949_v33  ;;  %2995 = vmatpush.xpose.msk.msra.mxu3 %vm889_vm8, %v448_v26  ;;  %vm1010_vm14 = vweird.f32 %v3121_v58  ;;  %v3169_v26 = vld [vmem:[%s4632_s1 + $0x3e] sm:$0x3] }
 0x24e   :  { %v998_v13 = vsel %vm997_vm12, %v3119_v8, %v994_v29  ;;  %vm1011_vm9 = vmor %vm1009_vm15, %vm1010_vm14  ;;  %v3165_v8 = vld [vmem:[%s4632_s1 + $0x36] sm:$0x3]  ;;  %v1753_v27 = vrot.slane %v3169_v26, 2 }
 0x24f   :  { %v1006_v34 = vsub.f32 1.0, %v1005_v32  ;;  %v1003_v35 = vsel %vm1000_vm13, %v1002_v30, %v998_v13  ;;  %v1745_v33 = vrot.slane %v3165_v8, 6  ;;  %v3170_v32 = vld [vmem:[%s4632_s1 + $0x32] sm:$0x3] }
 0x250   :  { %v952_v38 = vpop.xlane.xlu1 %951  ;;  %v1076_v39 = vmul.f32 %v3775_v17, %v1003_v35  ;;  %v1742_v13 = vsel %vm165_vm0, %v3170_v32, %v1741_v63  ;;  %v3172_v35 = vld [vmem:[%s4632_s1 + $0x24] sm:$0x3]  ;;  %v3185_v32 = vld [vmem:[%s4632_s1 + $0x1c] sm:$0x3] }
 0x251   :  { %v1007_v40 = vmul.f32 %v3121_v58, %v1006_v34  ;;  %3122 = vrcp.f32 %v952_v38  ;;  %v1029_v47 = vand.u32 2147483648, %v952_v38  ;;  %v1027_v56 = vand.u32 2147483647, %v952_v38 }
 0x252   :  { %2990 = vmatmul.msk.f32.vlgmr.msrb.gmra.mxu1 %vm889_vm8, %v1076_v39  ;;  %vm1023_vm12 = vweird.f32 %v952_v38  ;;  %v1729_v36 = vrot.slane %v3172_v35, 7 }
 0x253   :  { %v1008_v42 = vadd.f32 %v3121_v58, %v1007_v40  ;;  %vm1028_vm14 = vcmp.eq.f32.partialorder %v1027_v56, 8.507059e+37  ;;  %v3174_v40 = vld [vmem:[%s4632_s1 + $0x10] sm:$0x3] }
 0x254   :  { %v1713_v9 = vrot.slane %v3174_v40, 1  ;;  %v3187_v40 = vld [vmem:[%s4632_s1 + $0x2] sm:$0x3] }
 0x255   :  { %v1012_v48 = vsel %vm1011_vm9, %v3121_v58, %v1008_v42 }
 0x256   :  { %v1017_v50 = vsel %vm1014_vm10, %v1016_v45, %v1012_v48  ;;  %v1744_v48 = vsel %vm168_vm1, %v1743_v5, %v1742_v13  ;;  %v3179_v5 = vld [vmem:[%s4632_s1 + $0x2e] sm:$0x3]  ;;  %v1723_v13 = vrot.slane %v3185_v32, 3  ;;  %v3196_v32 = vld [vmem:[%s4634_s3 + $0x10] sm:$0xff] }
 0x257   :  { %v3123_v52 = vpop.eup %3122  ;;  %v3823_v53 = vpop.xlane.xlu2 %954  ;;  %v1077_v17 = vmul.f32 %v3779_v57, %v1017_v50  ;;  %v1030_v57 = vor.u32 1.1754944e-38, %v1029_v47  ;;  %v3175_v50 = vld [vmem:[%s4632_s1 + $0x28] sm:$0x3]  ;;  %v1739_v6 = vrot.slane %v3179_v5, 2 }
 0x258   :  { %v1019_v54 = vmul.f32 %v3123_v52, %v952_v38  ;;  %3124 = vrcp.f32 %v3823_v53  ;;  %vm1024_vm11 = vweird.f32 %v3123_v52  ;;  %v1043_v22 = vand.u32 2147483648, %v3823_v53  ;;  %v3173_v38 = vld [vmem:[%s4632_s1 + $0x26] sm:$0x3] }
 0x259   :  { %2992 = vmatmul.msk.f32.vlgmr.msrb.gmra.mxu3 %vm889_vm8, %v1077_v17  ;;  %vm1025_vm13 = vmor %vm1023_vm12, %vm1024_vm11  ;;  %v1041_v29 = vand.u32 2147483647, %v3823_v53  ;;  %v1731_v39 = vrot.slane %v3173_v38, 6  ;;  %vm1037_vm9 = vweird.f32 %v3823_v53 }
 0x25a   :  { %v1020_v55 = vsub.f32 1.0, %v1019_v54  ;;  %2999 = vmatpush.xpose.msk.msrb.mxu3 %vm889_vm8, %v449_v15  ;;  %v1044_v45 = vor.u32 1.1754944e-38, %v1043_v22  ;;  %v1746_v54 = vsel %vm171_vm2, %v1745_v33, %v1744_v48  ;;  %v3189_v48 = vld [vmem:[%s4632_s1 + $0x6] sm:$0x3] }
 0x25b   :  { %vm1042_vm11 = vcmp.eq.f32.partialorder %v1041_v29, 8.507059e+37  ;;  %v1748_v56 = vsel %vm174_vm3, %v1747_v12, %v1746_v54  ;;  %v3190_v54 = vld [vmem:[%s4632_s1 + $0x8] sm:$0x3] }
 0x25c   :  { %v1021_v51 = vmul.f32 %v3123_v52, %v1020_v55  ;;  %v3176_v55 = vld [vmem:[%s4632_s1] sm:$0x3]  ;;  %v1750_v62 = vsel %vm177_vm4, %v1749_v18, %v1748_v56  ;;  %v1719_v18 = vrot.slane %v3183_v61, 5 }
 0x25d   :  { %v1699_v47 = vrot.slane %v3176_v55, 1  ;;  %v1752_v4 = vsel %vm180_vm5, %v1751_v21, %v1750_v62  ;;  %v3192_v62 = vld [vmem:[%s4632_s1 + $0xc] sm:$0x3]  ;;  %v3204_v55 = vld [vmem:[%s4631_s0 + $0x10] sm:$0x3] }
 0x25e   :  { %v3125_v60 = vpop.eup %3124  ;;  %v1022_v59 = vadd.f32 %v3123_v52, %v1021_v51  ;;  %v1754_v11 = vsel %vm183_vm6, %v1753_v27, %v1752_v4 }
 0x25f   :  { %v1033_v1 = vmul.f32 %v3125_v60, %v3823_v53  ;;  %vm1038_vm15 = vweird.f32 %v3125_v60 }
 0x260   :  { %v1026_v25 = vsel %vm1025_vm13, %v3123_v52, %v1022_v59  ;;  %vm1039_vm10 = vmor %vm1037_vm9, %vm1038_vm15  ;;  %v1733_v52 = vrot.slane %v3175_v50, 5 }
 0x261   :  { %v1034_v46 = vsub.f32 1.0, %v1033_v1  ;;  %v1031_v14 = vsel %vm1028_vm14, %v1030_v57, %v1026_v25  ;;  %v3178_v57 = vld [vmem:[%s4632_s1 + $0x2c] sm:$0x3]  ;;  %v3181_v25 = vld [vmem:[%s4632_s1 + $0x14] sm:$0x3] }
 0x262   :  { %v1078_v24 = vmul.f32 %v3792_v28, %v1031_v14  ;;  %v3171_v28 = vld [vmem:[%s4632_s1 + $0x22] sm:$0x3]  ;;  %v1737_v1 = vrot.slane %v3178_v57, 3  ;;  %v1715_v8 = vrot.slane %v3181_v25, 7  ;;  %v3193_v57 = vld [vmem:[%s4632_s1 + $0xe] sm:$0x3] }
 0x263   :  { %v1035_v58 = vmul.f32 %v3125_v60, %v1034_v46  ;;  %v1728_v34 = vsel %vm165_vm0, %v3171_v28, %v1727_v7  ;;  %v3182_v46 = vld [vmem:[%s4632_s1 + $0x16] sm:$0x3]  ;;  %v3291_v25 = vmov 2  }
 0x264   :  { %v3857_v30 = vpop.xlane.xlu0 %957  ;;  %2994 = vmatmul.msk.f32.vlgmr.msra.gmra.mxu2 %vm889_vm8, %v1078_v24  ;;  %v1730_v49 = vsel %vm168_vm1, %v1729_v36, %v1728_v34  ;;  %v1717_v14 = vrot.slane %v3182_v46, 6  ;;  %v3186_v36 = vld [vmem:[%s4632_s1 + $0x1e] sm:$0x3]  ;;  %3049 = vset.pattern.permute.xlu0 %v3291_v25 }
 0x265   :  { %v1036_v42 = vadd.f32 %v3125_v60, %v1035_v58  ;;  %3126 = vrcp.f32 %v3857_v30  ;;  %v1732_v53 = vsel %vm171_vm2, %v1731_v39, %v1730_v49  ;;  %v1055_v21 = vand.u32 2147483647, %v3857_v30  ;;  %v3184_v58 = vld [vmem:[%s4632_s1 + $0x1a] sm:$0x3] }
 0x266   :  { %v1734_v15 = vsel %vm174_vm3, %v1733_v52, %v1732_v53  ;;  %v1721_v29 = vrot.slane %v3184_v58, 4  ;;  %v1057_v34 = vand.u32 2147483648, %v3857_v30  ;;  %v1725_v38 = vrot.slane %v3186_v36, 2  ;;  %v3194_v58 = vld [vmem:[%s4634_s3] sm:$0xff] }
 0x267   :  { %v1040_v17 = vsel %vm1039_vm10, %v3125_v60, %v1036_v42  ;;  %v3177_v60 = vld [vmem:[%s4632_s1 + $0x2a] sm:$0x3]  ;;  %v3188_v42 = vld [vmem:[%s4632_s1 + $0x4] sm:$0x3]  ;;  %v1703_v49 = vrot.slane %v3189_v48, 6  ;;  %v1705_v53 = vrot.slane %v3190_v54, 5  ;;  %vm1051_vm13 = vweird.f32 %v3857_v30 }
 0x268   :  { %v1045_v51 = vsel %vm1042_vm11, %v1044_v45, %v1040_v17  ;;  %v1735_v63 = vrot.slane %v3177_v60, 4  ;;  %v1701_v45 = vrot.slane %v3188_v42, 7  ;;  %vm3953_vm14 = vcmp.eq.f32.partialorder %v1055_v21, 8.507059e+37  ;;  %v3203_v54 = vld [vmem:[%s4631_s0 + $0x3a] sm:$0x3] }
 0x269   :  { %v1079_v59 = vmul.f32 %v3798_v31, %v1045_v51  ;;  %v3180_v31 = vld [vmem:[%s4632_s1 + $0x12] sm:$0x3]  ;;  %v1058_v60 = vor.u32 1.1754944e-38, %v1057_v34 }
 0x26a   :  { %v1714_v7 = vsel %vm165_vm0, %v3180_v31, %v1713_v9  ;;  %v1736_v12 = vsel %vm177_vm4, %v1735_v63, %v1734_v15  ;;  %v1700_v9 = vsel %vm165_vm0, %v3187_v40, %v1699_v47  ;;  %v3191_v47 = vld [vmem:[%s4632_s1 + $0xa] sm:$0x3]  ;;  %s3296_s1 = smov 24  }
 0x26b   :  { %v3127_v33 = vpop.eup %3126  ;;  %2996 = vmatmul.msk.f32.vlgmr.msra.gmra.mxu3 %vm889_vm8, %v1079_v59  ;;  %v1738_v22 = vsel %vm180_vm5, %v1737_v1, %v1736_v12  ;;  %v1716_v24 = vsel %vm168_vm1, %v1715_v8, %v1714_v7  ;;  %v1707_v51 = vrot.slane %v3191_v47, 4  ;;  %v1702_v59 = vsel %vm168_vm1, %v1701_v45, %v1700_v9  ;;  %v3199_v9 = vld [vmem:[%s4631_s0 + $0x34] sm:$0x3]  ;;  %v3200_v45 = vld [vmem:[%s4631_s0 + $0x36] sm:$0x3] }
 0x26c   :  { %v1047_v19 = vmul.f32 %v3127_v33, %v3857_v30  ;;  %1771 = vmatpush.msra.mxu3 %v1754_v11  ;;  %v1740_v26 = vsel %vm183_vm6, %v1739_v6, %v1738_v22  ;;  %v1718_v27 = vsel %vm171_vm2, %v1717_v14, %v1716_v24  ;;  %vm1052_vm12 = vweird.f32 %v3127_v33 }
 0x26d   :  { %v1720_v35 = vsel %vm174_vm3, %v1719_v18, %v1718_v27  ;;  %v1709_v30 = vrot.slane %v3192_v62, 3  ;;  %vm1053_vm15 = vmor %vm1051_vm13, %vm1052_vm12  ;;  %v1704_v63 = vsel %vm171_vm2, %v1703_v49, %v1702_v59  ;;  %v1711_v1 = vrot.slane %v3193_v57, 2  ;;  %v3201_v49 = vld [vmem:[%s4631_s0 + $0x20] sm:$0x3]  ;;  %v3207_v62 = vld [vmem:[%s4631_s0 + $0x3e] sm:$0x3] }
 0x26e   :  { %v1048_v28 = vsub.f32 1.0, %v1047_v19  ;;  %1772 = vmatpush.msra.mxu3 %v1740_v26  ;;  %v1722_v39 = vsel %vm177_vm4, %v1721_v29, %v1720_v35  ;;  %v1706_v5 = vsel %vm174_vm3, %v1705_v53, %v1704_v63  ;;  %v3290_v6 = vmov 0   ;;  %v3195_v29 = vld [vmem:[%s4634_s3 + $0x8] sm:$0xff]  ;;  %v3208_v63 = vld [vmem:[%s4631_s0 + $0x24] sm:$0x3] }
 0x26f   :  { %v1724_v17 = vsel %vm180_vm5, %v1723_v13, %v1722_v39  ;;  %3047 = vset.pattern.permute.xlu2 %v3290_v6  ;;  %v1708_v7 = vsel %vm177_vm4, %v1707_v51, %v1706_v5  ;;  %v3292_v8 = vmov 1   ;;  %v3198_v39 = vld [vmem:[%s4631_s0 + $0x30] sm:$0x3]  ;;  %v1642_v42 = vrot.slane %v3199_v9, 7  ;;  %v3205_v51 = vld [vmem:[%s4631_s0 + $0x32] sm:$0x3] }
 0x270   :  { %v1049_v50 = vmul.f32 %v3127_v33, %v1048_v28  ;;  %v961_v52 = vpop.xlane.xlu1 %960  ;;  %v1726_v15 = vsel %vm183_vm6, %v1725_v38, %v1724_v17  ;;  %3048 = vset.pattern.permute.xlu1 %v3292_v8  ;;  %v3293_v28 = vmov 3   ;;  %v1640_v40 = vrot.slane %v3198_v39, 1  ;;  %v3217_v39 = vld [vmem:[%s4631_s0 + $0x2e] sm:$0x3]  ;;  %v3218_v9 = vld [vmem:[%s4631_s0 + $0x16] sm:$0x3] }
 0x271   :  { %3128 = vrcp.f32 %v961_v52  ;;  %1773 = vmatpush.msra.mxu3 %v1726_v15  ;;  %v1071_v18 = vand.u32 2147483648, %v961_v52  ;;  %v1069_v21 = vand.u32 2147483647, %v961_v52  ;;  %vm1065_vm10 = vweird.f32 %v961_v52  ;;  %v3206_v15 = vld [vmem:[%s4631_s0 + $0x3c] sm:$0x3] }
 0x272   :  { %v1050_v56 = vadd.f32 %v3127_v33, %v1049_v50  ;;  %v1644_v48 = vrot.slane %v3200_v45, 6  ;;  %v1626_v50 = vrot.slane %v3201_v49, 1  ;;  %v1648_v53 = vrot.slane %v3203_v54, 4 }
 0x273   :  { %v1072_v24 = vor.u32 1.1754944e-38, %v1071_v18  ;;  %vm1070_vm12 = vcmp.eq.f32.partialorder %v1069_v21, 8.507059e+37  ;;  %v1612_v47 = vrot.slane %v3204_v55, 1  ;;  %v1650_v59 = vrot.slane %v3206_v15, 3  ;;  %v3213_v18 = vld [vmem:[%s4631_s0 + $0x14] sm:$0x3] }
 0x274   :  { %v1054_v4 = vsel %vm1053_vm15, %v3127_v33, %v1050_v56  ;;  %v1710_v33 = vsel %vm180_vm5, %v1709_v30, %v1708_v7  ;;  %v1641_v56 = vsel %vm165_vm0, %v3205_v51, %v1640_v40  ;;  %v1652_v30 = vrot.slane %v3207_v62, 2  ;;  %v3224_v62 = vld [vmem:[%s4631_s0 + $0x4] sm:$0x3] }
 0x275   :  { %v1059_v31 = vsel %vm3953_vm14, %v1058_v60, %v1054_v4  ;;  %v1712_v46 = vsel %vm183_vm6, %v1711_v1, %v1710_v33  ;;  %v1643_v60 = vsel %vm168_vm1, %v1642_v42, %v1641_v56  ;;  %v1628_v57 = vrot.slane %v3208_v63, 7  ;;  %v3209_v1 = vld [vmem:[%s4631_s0] sm:$0x3]  ;;  %v3223_v56 = vld [vmem:[%s4631_s0 + $0x2] sm:$0x3] }
 0x276   :  { %v1080_v11 = vmul.f32 %v3803_v37, %v1059_v31  ;;  %1774 = vmatpush.msra.mxu3 %v1712_v46  ;;  %v1598_v4 = vrot.slane %v3209_v1, 1  ;;  %v1645_v5 = vsel %vm171_vm2, %v1644_v48, %v1643_v60  ;;  %v3210_v31 = vld [vmem:[%s4631_s0 + $0x22] sm:$0x3]  ;;  %v1638_v40 = vrot.slane %v3217_v39, 2  ;;  %v3219_v48 = vld [vmem:[%s4631_s0 + $0x18] sm:$0x3] }
 0x277   :  { %v3129_v12 = vpop.eup %3128  ;;  %v1627_v7 = vsel %vm165_vm0, %v3210_v31, %v1626_v50  ;;  %v1616_v42 = vrot.slane %v3218_v9, 6  ;;  %v1618_v49 = vrot.slane %v3219_v48, 5  ;;  %v3220_v50 = vld [vmem:[%s4631_s0 + $0x1a] sm:$0x3]  ;;  %v3225_v60 = vld [vmem:[%s4631_s0 + $0x6] sm:$0x3] }
 0x278   :  { %v1061_v14 = vmul.f32 %v3129_v12, %v961_v52  ;;  %2998 = vmatmul.msk.f32.vlgmr.msrb.gmra.mxu2 %vm889_vm8, %v1080_v11  ;;  %vm1066_vm9 = vweird.f32 %v3129_v12  ;;  %v3202_v52 = vld [vmem:[%s4631_s0 + $0x38] sm:$0x3]  ;;  %v3211_v11 = vld [vmem:[%s4631_s0 + $0x26] sm:$0x3]  ;;  %v1629_v46 = vsel %vm168_vm1, %v1628_v57, %v1627_v7  ;;  %v1599_v15 = vsel %vm165_vm0, %v3223_v56, %v1598_v4  ;;  %v3226_v57 = vld [vmem:[%s4631_s0 + $0x8] sm:$0x3] }
 0x279   :  { %vm1067_vm11 = vmor %vm1065_vm10, %vm1066_vm9  ;;  %v1646_v17 = vrot.slane %v3202_v52, 5  ;;  %v1630_v33 = vrot.slane %v3211_v11, 6  ;;  %v1620_v52 = vrot.slane %v3220_v50, 4  ;;  %v1602_v63 = vrot.slane %v3225_v60, 6  ;;  %v3227_v31 = vld [vmem:[%s4631_s0 + $0xa] sm:$0x3] }
 0x27a   :  { %v1062_v61 = vsub.f32 1.0, %v1061_v14  ;;  %v3212_v14 = vld [vmem:[%s4631_s0 + $0x28] sm:$0x3]  ;;  %v1604_v1 = vrot.slane %v3226_v57, 5  ;;  %v1606_v7 = vrot.slane %v3227_v31, 4  ;;  %vm1592_vm13 = vcmask 64512  }
 0x27b   :  { %vm4640_vm14 = vcmask 195584  }
 0x27c   :  { %v1063_v19 = vmul.f32 %v3129_v12, %v1062_v61  ;;  %v1632_v61 = vrot.slane %v3212_v14, 5 }
 0x27e   :  { %v1064_v22 = vadd.f32 %v3129_v12, %v1063_v19  ;;  %v1614_v19 = vrot.slane %v3213_v18, 7 }
 0x280   :  { %v1068_v26 = vsel %vm1067_vm11, %v3129_v12, %v1064_v22  ;;  %v1647_v12 = vsel %vm174_vm3, %v1646_v17, %v1645_v5  ;;  %v1631_v22 = vsel %vm171_vm2, %v1630_v33, %v1629_v46  ;;  %v3221_v17 = vld [vmem:[%s4631_s0 + $0x1c] sm:$0x3] }
 0x281   :  { %v1073_v37 = vsel %vm1070_vm12, %v1072_v24, %v1068_v26  ;;  %v1649_v21 = vsel %vm177_vm4, %v1648_v53, %v1647_v12  ;;  %v3214_v24 = vld [vmem:[%s4631_s0 + $0x2a] sm:$0x3]  ;;  %v1622_v54 = vrot.slane %v3221_v17, 3  ;;  %v3228_v12 = vld [vmem:[%s4631_s0 + $0xc] sm:$0x3] }
 0x282   :  { %v1081_v27 = vmul.f32 %v3808_v41, %v1073_v37  ;;  %v3197_v41 = vld [vmem:[%s4634_s3 + $0x18] sm:$0xff]  ;;  %v1634_v26 = vrot.slane %v3214_v24, 4  ;;  %v3215_v37 = vld [vmem:[%s4631_s0 + $0x12] sm:$0x3]  ;;  %v1608_v46 = vrot.slane %v3228_v12, 3 }
 0x284   :  { %3000 = vmatmul.msk.f32.vlgmr.msrb.gmra.mxu3 %vm889_vm8, %v1081_v27  ;;  %v1613_v27 = vsel %vm165_vm0, %v3215_v37, %v1612_v47  ;;  %v3222_v47 = vld [vmem:[%s4631_s0 + $0x1e] sm:$0x3] }
 0x285   :  { %v1624_v51 = vrot.slane %v3222_v47, 2 }
 0x28c   :  { %3009 = vmatmul.msk.f32.vlgmr.msra.gmra.mxu3 %vm4639_vm7, %v3194_v58  ;;  %v1651_v58 = vsel %vm180_vm5, %v1650_v59, %v1649_v21 }
 0x294   :  { %3010 = vmatmul.msk.f32.gmra.mxu3 %vm4639_vm7, %v3195_v29  ;;  %v1633_v29 = vsel %vm174_vm3, %v1632_v61, %v1631_v22 }
 0x29c   :  { %3011 = vmatmul.msk.f32.gmra.mxu3 %vm4639_vm7, %v3196_v32  ;;  %v3216_v32 = vld [vmem:[%s4631_s0 + $0x2c] sm:$0x3] }
 0x2a4   :  { %3012 = vmatmul.msk.f32.gmra.mxu3 %vm4639_vm7, %v3197_v41  ;;  %v1636_v41 = vrot.slane %v3216_v32, 3  ;;  %v3233_v32 = vld [vmem:[%s4633_s2 + $0x18] sm:$0xff] }
 0x2b5   :  { %v1104_v13 = vpop.f32.mrf.mxu0 }
 0x2b6   :  { %1437 = vperm.xlu0 %3049, %v1104_v13   ;;  %1365 = vperm.xlu1 %3048, %v1104_v13  }
 0x2b7   :  { %1291 = vperm.xlu2 %3047, %v1104_v13  }
 0x2be   :  { %3051 = vset.pattern.permute.xlu0 %v3290_v6  ;;  %3052 = vset.pattern.permute.xlu1 %v3290_v6 }
 0x2bf   :  { %3050 = vset.pattern.permute.xlu2 %v3293_v28 }
 0x2c0   :  { %1509 = vperm.xlu2 %3050, %v1104_v13   ;;  %v1615_v13 = vsel %vm168_vm1, %v1614_v19, %v1613_v27  ;;  %v3229_v19 = vld [vmem:[%s4631_s0 + $0xe] sm:$0x3]  ;;  %v3230_v27 = vld [vmem:[%s4633_s2] sm:$0xff] }
 0x2c1   :  { %v1617_v55 = vsel %vm171_vm2, %v1616_v42, %v1615_v13  ;;  %v1610_v21 = vrot.slane %v3229_v19, 2 }
 0x2c2   :  { %v1619_v59 = vsel %vm174_vm3, %v1618_v49, %v1617_v55 }
 0x2c3   :  { %v1621_v4 = vsel %vm177_vm4, %v1620_v52, %v1619_v59 }
 0x2c4   :  { %v1623_v11 = vsel %vm180_vm5, %v1622_v54, %v1621_v4 }
 0x2c5   :  { %v1625_v61 = vsel %vm183_vm6, %v1624_v51, %v1623_v11 }
 0x2c8   :  { %3053 = vset.pattern.permute.xlu2 %v3292_v8 }
 0x2cf   :  { %v1154_v34 = vpop.f32.mrf.mxu1  ;;  %v1129_v35 = vpop.f32.mrf.mxu3 }
 0x2d0   :  { %1297 = vperm.xlu1 %3052, %v1154_v34   ;;  %1294 = vperm.xlu0 %3051, %v1129_v35  }
 0x2d1   :  { %1368 = vperm.xlu2 %3053, %v1129_v35  }
 0x2d8   :  { %3054 = vset.pattern.permute.xlu1 %v3292_v8  ;;  %3056 = vset.pattern.permute.xlu0 %v3293_v28 }
 0x2d9   :  { %3055 = vset.pattern.permute.xlu2 %v3291_v25  ;;  %1512 = vperm.xlu0 %3056, %v1129_v35  }
 0x2da   :  { %1371 = vperm.xlu1 %3054, %v1154_v34   ;;  %1440 = vperm.xlu2 %3055, %v1129_v35   ;;  %v1635_v35 = vsel %vm177_vm4, %v1634_v26, %v1633_v29 }
 0x2db   :  { %v1637_v45 = vsel %vm180_vm5, %v1636_v41, %v1635_v35 }
 0x2dc   :  { %v4010_v38 = vpop.f32.mrf.mxu3  ;;  %v1639_v53 = vsel %vm183_vm6, %v1638_v40, %v1637_v45 }
 0x2e1   :  { %1515 = vperm.xlu0 %3056, %v1154_v34  }
 0x2e2   :  { %3060 = vset.pattern.permute.xlu1 %v3290_v6  ;;  %1443 = vperm.xlu2 %3055, %v1154_v34   ;;  %v1653_v34 = vsel %vm183_vm6, %v1652_v30, %v1651_v58  ;;  %v1600_v30 = vrot.slane %v3224_v62, 7  ;;  %v3232_v58 = vld [vmem:[%s4633_s2 + $0x10] sm:$0xff] }
 0x2e3   :  { %1670 = vmatpush.msra.mxu2 %v1653_v34 }
 0x2e4   :  { %v1601_v33 = vsel %vm168_vm1, %v1600_v30, %v1599_v15 }
 0x2e5   :  { %1671 = vmatpush.msra.mxu2 %v1639_v53  ;;  %v1603_v18 = vsel %vm171_vm2, %v1602_v63, %v1601_v33 }
 0x2e6   :  { %v1605_v22 = vsel %vm174_vm3, %v1604_v1, %v1603_v18 }
 0x2e7   :  { %v4007_v36 = vpop.f32.mrf.mxu2  ;;  %1672 = vmatpush.msra.mxu2 %v1625_v61  ;;  %v1607_v24 = vsel %vm177_vm4, %v1606_v7, %v1605_v22 }
 0x2e8   :  { %1303 = vperm.xlu1 %3060, %v4007_v36   ;;  %v1609_v26 = vsel %vm180_vm5, %v1608_v46, %v1607_v24 }
 0x2e9   :  { %1518 = vperm.xlu0 %3056, %v4010_v38   ;;  %v1611_v37 = vsel %vm183_vm6, %v1610_v21, %v1609_v26 }
 0x2ea   :  { %3057 = vset.pattern.permute.xlu2 %v3290_v6  ;;  %1673 = vmatpush.msra.mxu2 %v1611_v37 }
 0x2eb   :  { %1300 = vperm.xlu2 %3057, %v4010_v38   ;;  %3001 = vmatmul.msk.f32.vlgmr.msra.gmra.mxu2 %vm4639_vm7, %v3230_v27 }
 0x2ee   :  { %v1229_v5 = vpop.f32.mrf.mxu3 }
 0x2f0   :  { %3061 = vset.pattern.permute.xlu1 %v3292_v8 }
 0x2f1   :  { %1377 = vperm.xlu1 %3061, %v4007_v36   ;;  %1521 = vperm.xlu0 %3056, %v4007_v36  }
 0x2f3   :  { %3058 = vset.pattern.permute.xlu2 %v3292_v8 }
 0x2f4   :  { %1374 = vperm.xlu2 %3058, %v4010_v38  }
 0x2f9   :  { %3065 = vset.pattern.permute.xlu1 %v3293_v28 }
 0x2fa   :  { %1524 = vperm.xlu1 %3065, %v1229_v5  }
 0x2fb   :  { %v1254_v14 = vpop.f32.mrf.mxu2 }
 0x2fc   :  { %1527 = vperm.xlu0 %3056, %v1254_v14   ;;  %3059 = vset.pattern.permute.xlu2 %v3291_v25 }
 0x2fd   :  { %1446 = vperm.xlu2 %3059, %v4010_v38   ;;  %v3231_v38 = vld [vmem:[%s4633_s2 + $0x8] sm:$0xff]  ;;  %s1900_s2 = sld [smem:[#allocation3]] }
 0x2fe   :  { %3002 = vmatmul.msk.f32.gmra.mxu2 %vm4639_vm7, %v3231_v38 }
 0x302   :  { %3066 = vset.pattern.permute.xlu1 %v3290_v6 }
 0x303   :  { %1309 = vperm.xlu1 %3066, %v1254_v14  }
 0x304   :  { %3074 = vset.pattern.permute.xlu0 %v3596_v44 }
 0x305   :  { %1449 = vperm.xlu2 %3059, %v4007_v36  }
 0x306   :  { %3003 = vmatmul.msk.f32.gmra.mxu2 %vm4639_vm7, %v3232_v58 }
 0x307   :  { %v1279_v29 = vpop.f32.mrf.mxu3 }
 0x30b   :  { %3067 = vset.pattern.permute.xlu1 %v3292_v8 }
 0x30c   :  { %1383 = vperm.xlu1 %3067, %v1254_v14  }
 0x30d   :  { %3062 = vset.pattern.permute.xlu2 %v3290_v6 }
 0x30e   :  { %1306 = vperm.xlu2 %3062, %v1229_v5   ;;  %3004 = vmatmul.msk.f32.gmra.mxu2 %vm4639_vm7, %v3233_v32 }
 0x30f   :  { %v1776_v13 = vpop.f32.mrf.mxu3 }
 0x310   :  { %v1820_v34 = vperm.slane %v1776_v13, 0  ;;  %v1918_v40 = vperm.slane %v1776_v13, 1  ;;  %v2114_v55 = vperm.slane %v1776_v13, 3  ;;  %v1812_v47 = vrot.slane %v1776_v13, 4 }
 0x311   :  { %v4166_v36 = vpop.permute.xlu2 %1291 }
 0x312   :  { %v1925_v51 = vperm.slane %v1812_v47, 1  ;;  %v1827_v30 = vperm.slane %v1812_v47, 0  ;;  %v2023_v4 = vperm.slane %v1812_v47, 2  ;;  %v2121_v12 = vperm.slane %v1812_v47, 3 }
 0x314   :  { %3070 = vset.pattern.permute.xlu1 %v3291_v25 }
 0x315   :  { %1458 = vperm.xlu1 %3070, %v1279_v29  }
 0x316   :  { %3063 = vset.pattern.permute.xlu2 %v3292_v8  ;;  %3005 = vmatmul.msk.f32.gmra.mxu2 %vm4639_vm7, %v3718_v2  ;;  %v4185_v2 = vand.u32 127, %v463_v23  ;;  %v2016_v23 = vperm.slane %v1776_v13, 2 }
 0x317   :  { %1380 = vperm.xlu2 %3063, %v1229_v5   ;;  %v4187_v42 = vpop.f32.mrf.mxu3 }
 0x318   :  { %v1834_v48 = vperm.slane %v4187_v42, 0  ;;  %v1932_v7 = vperm.slane %v4187_v42, 1  ;;  %v2030_v61 = vperm.slane %v4187_v42, 2  ;;  %v1813_v18 = vrot.slane %v4187_v42, 4 }
 0x319   :  { %v2128_v38 = vperm.slane %v4187_v42, 3 }
 0x31a   :  { %v4176_v41 = vpop.permute.xlu2 %1509  ;;  %1839 = vperm.xlu0 %3074, %v1834_v48   ;;  %v1841_v24 = vperm.slane %v1813_v18, 0  ;;  %v1939_v13 = vperm.slane %v1813_v18, 1 }
 0x31d   :  { %3071 = vset.pattern.permute.xlu1 %v3293_v28 }
 0x31e   :  { %1530 = vperm.xlu1 %3071, %v1279_v29   ;;  %3006 = vmatmul.msk.f32.gmra.mxu2 %vm4639_vm7, %v3752_v0 }
 0x31f   :  { %3064 = vset.pattern.permute.xlu2 %v3291_v25  ;;  %v4201_v53 = vpop.f32.mrf.mxu3 }
 0x320   :  { %1452 = vperm.xlu2 %3064, %v1229_v5   ;;  %v1946_v42 = vperm.slane %v4201_v53, 1 }
 0x326   :  { %3072 = vset.pattern.permute.xlu1 %v3596_v44  ;;  %3007 = vmatmul.msk.f32.gmra.mxu2 %vm4639_vm7, %v3765_v43 }
 0x327   :  { %v4206_v15 = vpop.f32.mrf.mxu3 }
 0x328   :  { %1455 = vperm.xlu2 %3064, %v1254_v14   ;;  %v1438_v39 = vpop.permute.xlu0 %1437  ;;  %v1366_v43 = vpop.permute.xlu1 %1365  ;;  %v2156_v60 = vperm.slane %v4206_v15, 3 }
 0x329   :  { %v1460_v45 = vperm.slane %v1438_v39, %v4185_v2  ;;  %v1388_v59 = vperm.slane %v1366_v43, %v4185_v2  ;;  %v2037_v39 = vperm.slane %v1813_v18, 2 }
 0x32a   :  { %2161 = vperm.xlu0 %3074, %v2156_v60  }
 0x32b   :  { %v1369_v35 = vpop.permute.xlu2 %1368 }
 0x32c   :  { %v1389_v56 = vperm.slane %v1369_v35, %v4185_v2 }
 0x32e   :  { %1825 = vperm.xlu1 %3072, %v1820_v34   ;;  %3008 = vmatmul.msk.f32.gmra.mxu2 %vm4639_vm7, %v3787_v20  ;;  %v1396_v63 = vsel %vm165_vm0, %v1389_v56, %v1388_v59  ;;  %v1848_v34 = vperm.slane %v4201_v53, 0 }
 0x330   :  { %3068 = vset.pattern.permute.xlu2 %v3290_v6 }
 0x331   :  { %1312 = vperm.xlu2 %3068, %v1279_v29  }
 0x334   :  { %v1441_v9 = vpop.permute.xlu2 %1440 }
 0x335   :  { %v1461_v0 = vperm.slane %v1441_v9, %v4185_v2 }
 0x336   :  { %1923 = vperm.xlu1 %3072, %v1918_v40  }
 0x337   :  { %v1468_v49 = vsel %vm165_vm0, %v1461_v0, %v1460_v45 }
 0x339   :  { %3069 = vset.pattern.permute.xlu2 %v3292_v8 }
 0x33a   :  { %1386 = vperm.xlu2 %3069, %v1279_v29  }
 0x33c   :  { %v1444_v50 = vpop.permute.xlu2 %1443 }
 0x33d   :  { %v1462_v52 = vperm.slane %v1444_v50, %v4185_v2  ;;  %v2044_v50 = vperm.slane %v4201_v53, 2 }
 0x33e   :  { %2021 = vperm.xlu1 %3072, %v2016_v23  }
 0x33f   :  { %v1469_v17 = vsel %vm168_vm1, %v1462_v52, %v1468_v49  ;;  %v2135_v49 = vperm.slane %v1813_v18, 3 }
 0x342   :  { %v4198_v54 = vpop.permute.xlu1 %1297  ;;  %3073 = vset.pattern.permute.xlu2 %v3596_v44  ;;  %v1295_v19 = vpop.permute.xlu0 %1294 }
 0x343   :  { %v1317_v56 = vperm.slane %v1295_v19, %v4185_v2 }
 0x345   :  { %v4203_v20 = vpop.permute.xlu2 %1300 }
 0x346   :  { %2119 = vperm.xlu1 %3072, %v2114_v55  }
 0x34a   :  { %1930 = vperm.xlu2 %3073, %v1925_v51  }
 0x34b   :  { %v4227_v29 = vpop.permute.xlu0 %1512 }
 0x34c   :  { %v1372_v62 = vpop.permute.xlu1 %1371  ;;  %v1533_v18 = vperm.slane %v4227_v29, %v4185_v2 }
 0x34d   :  { %v1390_v44 = vperm.slane %v1372_v62, %v4185_v2 }
 0x34e   :  { %1832 = vperm.xlu1 %3072, %v1827_v30   ;;  %v1375_v1 = vpop.permute.xlu2 %1374  ;;  %v1316_v30 = vperm.slane %v4166_v36, %v4185_v2 }
 0x34f   :  { %v1397_v57 = vsel %vm168_vm1, %v1390_v44, %v1396_v63  ;;  %v1391_v5 = vperm.slane %v1375_v1, %v4185_v2  ;;  %v1318_v44 = vperm.slane %v4198_v54, %v4185_v2 }
 0x350   :  { %v1324_v1 = vsel %vm165_vm0, %v1317_v56, %v1316_v30 }
 0x351   :  { %v1398_v31 = vsel %vm171_vm2, %v1391_v5, %v1397_v57  ;;  %v2142_v57 = vperm.slane %v4201_v53, 3  ;;  %v1325_v36 = vsel %vm168_vm1, %v1318_v44, %v1324_v1  ;;  %v4299_v1 = vstv %s1900_s2 }
 0x352   :  { %2028 = vperm.xlu2 %3073, %v2023_v4   ;;  %v1319_v4 = vperm.slane %v4203_v20, %v4185_v2 }
 0x353   :  { %v1516_v9 = vpop.permute.xlu0 %1515 }
 0x354   :  { %v1326_v20 = vsel %vm171_vm2, %v1319_v4, %v1325_v36  ;;  %v4301_v4 = vstv %s3013_s23 }
 0x356   :  { %1937 = vperm.xlu1 %3072, %v1932_v7  }
 0x357   :  { %v1447_v11 = vpop.permute.xlu2 %1446 }
 0x358   :  { %v1463_v33 = vperm.slane %v1447_v11, %v4185_v2 }
 0x35a   :  { %v4217_v46 = vpop.permute.xlu1 %1303  ;;  %v1470_v14 = vsel %vm171_vm2, %v1463_v33, %v1469_v17  ;;  %2126 = vperm.xlu2 %3073, %v2121_v12   ;;  %v1814_v17 = vrot.slane %v4201_v53, 4 }
 0x35b   :  { %v1519_v52 = vpop.permute.xlu0 %1518  ;;  %v1320_v11 = vperm.slane %v4217_v46, %v4185_v2  ;;  %v1534_v46 = vperm.slane %v1516_v9, %v4185_v2 }
 0x35c   :  { %v1855_v59 = vperm.slane %v1814_v17, 0  ;;  %v1953_v53 = vperm.slane %v1814_v17, 1 }
 0x35d   :  { %v1327_v19 = vsel %vm174_vm3, %v1320_v11, %v1326_v20 }
 0x35e   :  { %2035 = vperm.xlu1 %3072, %v2030_v61  }
 0x35f   :  { %v1450_v21 = vpop.permute.xlu2 %1449 }
 0x360   :  { %v1464_v22 = vperm.slane %v1450_v21, %v4185_v2 }
 0x362   :  { %v1471_v26 = vsel %vm174_vm3, %v1464_v22, %v1470_v14  ;;  %1846 = vperm.xlu2 %3073, %v1841_v24   ;;  %v1862_v14 = vperm.slane %v4206_v15, 0  ;;  %v1532_v22 = vperm.slane %v4176_v41, %v4185_v2  ;;  %v1535_v24 = vperm.slane %v1519_v52, %v4185_v2 }
 0x363   :  { %v1378_v37 = vpop.permute.xlu1 %1377  ;;  %v1815_v52 = vrot.slane %v4206_v15, 4 }
 0x364   :  { %v1392_v27 = vperm.slane %v1378_v37, %v4185_v2 }
 0x365   :  { %v2163_v30 = vperm.slane %v1815_v52, 3 }
 0x366   :  { %v1399_v58 = vsel %vm174_vm3, %v1392_v27, %v1398_v31  ;;  %2133 = vperm.xlu1 %3072, %v2128_v38   ;;  %v1522_v31 = vpop.permute.xlu0 %1521 }
 0x367   :  { %v1536_v27 = vperm.slane %v1522_v31, %v4185_v2 }
 0x368   :  { %v1307_v32 = vpop.permute.xlu2 %1306 }
 0x369   :  { %v1321_v33 = vperm.slane %v1307_v32, %v4185_v2 }
 0x36a   :  { %1944 = vperm.xlu2 %3073, %v1939_v13  }
 0x36c   :  { %v4230_v35 = vpop.permute.xlu1 %1524 }
 0x36d   :  { %v1537_v29 = vperm.slane %v4230_v35, %v4185_v2  ;;  %v1960_v35 = vperm.slane %v4206_v15, 1 }
 0x36e   :  { %1853 = vperm.xlu1 %3072, %v1848_v34   ;;  %v1528_v32 = vpop.permute.xlu0 %1527 }
 0x371   :  { %v1381_v40 = vpop.permute.xlu2 %1380 }
 0x372   :  { %v1393_v45 = vperm.slane %v1381_v40, %v4185_v2  ;;  %2042 = vperm.xlu2 %3073, %v2037_v39   ;;  %v2051_v40 = vperm.slane %v1814_v17, 2 }
 0x374   :  { %v1400_v0 = vsel %vm177_vm4, %v1393_v45, %v1399_v58  ;;  %v1540_v58 = vsel %vm165_vm0, %v1533_v18, %v1532_v22  ;;  %v1538_v45 = vperm.slane %v1528_v32, %v4185_v2  ;;  %v4308_v18 = vstv %s3014_s24 }
 0x375   :  { %v1310_v48 = vpop.permute.xlu1 %1309  ;;  %v1541_v41 = vsel %vm168_vm1, %v1534_v46, %v1540_v58  ;;  %v4314_v58 = vstv %s3015_s25 }
 0x376   :  { %1951 = vperm.xlu1 %3072, %v1946_v42   ;;  %v1322_v12 = vperm.slane %v1310_v48, %v4185_v2  ;;  %v1542_v39 = vsel %vm171_vm2, %v1535_v24, %v1541_v41 }
 0x377   :  { %v1543_v9 = vsel %vm174_vm3, %v1536_v27, %v1542_v39 }
 0x378   :  { %v1544_v42 = vsel %vm177_vm4, %v1537_v29, %v1543_v9 }
 0x379   :  { %v1545_v48 = vsel %vm180_vm5, %v1538_v45, %v1544_v42 }
 0x37a   :  { %v1453_v43 = vpop.permute.xlu2 %1452  ;;  %2140 = vperm.xlu2 %3073, %v2135_v49  }
 0x37b   :  { %v1465_v23 = vperm.slane %v1453_v43, %v4185_v2  ;;  %v2149_v43 = vperm.slane %v1814_v17, 3 }
 0x37d   :  { %v1472_v55 = vsel %vm177_vm4, %v1465_v23, %v1471_v26  ;;  %v1328_v26 = vsel %vm177_vm4, %v1321_v33, %v1327_v19  ;;  %v4289_v23 = vpop.f32.mrf.mxu2 }
 0x37e   :  { %v1384_v47 = vpop.permute.xlu1 %1383  ;;  %2049 = vperm.xlu1 %3072, %v2044_v50   ;;  %v1329_v38 = vsel %vm180_vm5, %v1322_v12, %v1328_v26  ;;  %v2058_v50 = vperm.slane %v4206_v15, 2  ;;  %v2072_v11 = vperm.slane %v4289_v23, 2  ;;  %v2065_v12 = vperm.slane %v1815_v52, 2 }
 0x37f   :  { %v1394_v51 = vperm.slane %v1384_v47, %v4185_v2  ;;  %v1876_v47 = vperm.slane %v4289_v23, 0 }
 0x381   :  { %v4242_v62 = vsel %vm180_vm5, %v1394_v51, %v1400_v0 }
 0x382   :  { %v1456_v60 = vpop.permute.xlu2 %1455  ;;  %1860 = vperm.xlu2 %3073, %v1855_v59   ;;  %v1869_v59 = vperm.slane %v1815_v52, 0 }
 0x383   :  { %v1466_v63 = vperm.slane %v1456_v60, %v4185_v2  ;;  %v1974_v60 = vperm.slane %v4289_v23, 1 }
 0x385   :  { %v1473_v5 = vsel %vm180_vm5, %v1466_v63, %v1472_v55  ;;  %v1678_v20 = vpop.f32.mrf.mxu2 }
 0x386   :  { %2147 = vperm.xlu1 %3072, %v2142_v57   ;;  %v1967_v57 = vperm.slane %v1815_v52, 1  ;;  %v1793_v22 = vrot.slane %v1678_v20, 4  ;;  %v1976_v9 = vperm.slane %v1678_v20, 1  ;;  %v1878_v45 = vperm.slane %v1678_v20, 0 }
 0x387   :  { %v1459_v7 = vpop.permute.xlu1 %1458 }
 0x388   :  { %v1467_v54 = vperm.slane %v1459_v7, %v4185_v2  ;;  %v1879_v27 = vperm.slane %v1793_v22, 0  ;;  %v1977_v39 = vperm.slane %v1793_v22, 1 }
 0x38a   :  { %v4262_v61 = vsel %vm183_vm6, %v1467_v54, %v1473_v5  ;;  %1958 = vperm.xlu2 %3073, %v1953_v53  }
 0x38b   :  { %v1313_v21 = vpop.permute.xlu2 %1312 }
 0x38c   :  { %v1323_v37 = vperm.slane %v1313_v21, %v4185_v2  ;;  %v2170_v21 = vperm.slane %v4289_v23, 3 }
 0x38e   :  { %1867 = vperm.xlu1 %3072, %v1862_v14   ;;  %v1330_v13 = vsel %vm183_vm6, %v1323_v37, %v1329_v38 }
 0x38f   :  { %1332 = vxpose.xlu0.b32.start.end [1/1] (short) (narrow) %v1330_v13, 8 }
 0x390   :  { %v1531_v34 = vpop.permute.xlu1 %1530 }
 0x391   :  { %v1539_v0 = vperm.slane %v1531_v34, %v4185_v2 }
 0x392   :  { %2056 = vperm.xlu2 %3073, %v2051_v40  }
 0x393   :  { %v1546_v49 = vsel %vm183_vm6, %v1539_v0, %v1545_v48 }
 0x394   :  { %v4293_v55 = vpop.permute.xlu2 %1386 }
 0x396   :  { %1965 = vperm.xlu1 %3072, %v1960_v35   ;;  %v1840_v35 = vpop.permute.xlu0 %1839 }
 0x397   :  { %1548 = vxpose.xlu0.b32.start.end [1/1] (short) (narrow) %v1546_v49, 8 }
 0x39a   :  { %2154 = vperm.xlu2 %3073, %v2149_v43  }
 0x39e   :  { %2063 = vperm.xlu1 %3072, %v2058_v50   ;;  %v1886_v50 = vsub.f32 %v1840_v35, %v1878_v45 }
 0x3a0   :  { %v1826_v51 = vpop.permute.xlu1 %1825 }
 0x3a1   :  { %v1884_v56 = vsub.f32 %v1826_v51, %v1876_v47  ;;  %v2075_v51 = vperm.slane %v1793_v22, 2 }
 0x3a2   :  { %1874 = vperm.xlu2 %3073, %v1869_v59  }
 0x3a3   :  { %v1892_v63 = vmax.f32 %v1884_v56, 0.0 }
 0x3a4   :  { %v4296_v17 = vpop.permute.xlu2 %1930 }
 0x3a5   :  { %v1902_v31 = vmul.f32 %v4299_v1, %v1892_v63 }
 0x3a6   :  { %2168 = vperm.xlu1 %3072, %v2163_v30   ;;  %v1894_v30 = vmax.f32 %v1886_v50, 0.0 }
 0x3a8   :  { %v1924_v44 = vpop.permute.xlu1 %1923 }
 0x3a9   :  { %v1982_v15 = vsub.f32 %v1924_v44, %v1974_v60  ;;  %v2074_v44 = vperm.slane %v1678_v20, 2 }
 0x3aa   :  { %1972 = vperm.xlu2 %3073, %v1967_v57  }
 0x3ab   :  { %v1990_v5 = vmax.f32 %v1982_v15, 0.0 }
 0x3ac   :  { %v4305_v36 = vpop.permute.xlu2 %2028 }
 0x3ad   :  { %v2000_v7 = vmul.f32 %v4301_v4, %v1990_v5 }
 0x3af   :  { %v2008_v54 = vadd.f32 %v2000_v7, %v1902_v31  ;;  %v1904_v31 = vmul.f32 %v4299_v1, %v1894_v30 }
 0x3b0   :  { %v2022_v33 = vpop.permute.xlu1 %2021 }
 0x3b1   :  { %v2080_v53 = vsub.f32 %v2022_v33, %v2072_v11 }
 0x3b2   :  { %2070 = vperm.xlu2 %3073, %v2065_v12  }
 0x3b3   :  { %v2088_v14 = vmax.f32 %v2080_v53, 0.0  ;;  %v4324_v53 = vpop.f32.mrf.mxu2 }
 0x3b4   :  { %v4311_v19 = vpop.permute.xlu2 %2126 }
 0x3b5   :  { %v2098_v46 = vmul.f32 %v4308_v18, %v2088_v14 }
 0x3b7   :  { %v2106_v24 = vadd.f32 %v2098_v46, %v2008_v54  ;;  %v2173_v54 = vperm.slane %v1793_v22, 3  ;;  %v1792_v22 = vrot.slane %v4289_v23, 4 }
 0x3b8   :  { %v2120_v26 = vpop.permute.xlu1 %2119 }
 0x3b9   :  { %v2178_v37 = vsub.f32 %v2120_v26, %v2170_v21  ;;  %v1395_v26 = vperm.slane %v4293_v55, %v4185_v2  ;;  %v2073_v50 = vperm.slane %v1792_v22, 2 }
 0x3bb   :  { %v2186_v38 = vmax.f32 %v2178_v37, 0.0 }
 0x3bc   :  { %v1847_v32 = vpop.permute.xlu2 %1846 }
 0x3bd   :  { %v2196_v29 = vmul.f32 %v4314_v58, %v2186_v38  ;;  %v1887_v13 = vsub.f32 %v1847_v32, %v1879_v27  ;;  %v4330_v27 = vrot.slane %v4324_v53, 4 }
 0x3bf   :  { %v4317_v41 = vadd.f32 %v2196_v29, %v2106_v24  ;;  %v1895_v42 = vmax.f32 %v1887_v13, 0.0  ;;  %v2172_v24 = vperm.slane %v1678_v20, 3  ;;  %v1402_v20 = vsel %vm183_vm6, %v1395_v26, %v4242_v62 }
 0x3c0   :  { %v1833_v34 = vpop.permute.xlu1 %1832 }
 0x3c1   :  { %v1905_v52 = vmul.f32 %v4299_v1, %v1895_v42  ;;  %v1975_v42 = vperm.slane %v1792_v22, 1 }
 0x3c4   :  { %v1945_v40 = vpop.permute.xlu2 %1944 }
 0x3c5   :  { %v1985_v0 = vsub.f32 %v1945_v40, %v1977_v39  ;;  %v1881_v40 = vperm.slane %v4330_v27, 0 }
 0x3c7   :  { %v1993_v48 = vmax.f32 %v1985_v0, 0.0 }
 0x3c8   :  { %v1938_v49 = vpop.permute.xlu1 %1937 }
 0x3c9   :  { %v1984_v43 = vsub.f32 %v1938_v49, %v1976_v9  ;;  %v2003_v47 = vmul.f32 %v4301_v4, %v1993_v48  ;;  %v1877_v9 = vperm.slane %v1792_v22, 0 }
 0x3cb   :  { %v2011_v56 = vadd.f32 %v2003_v47, %v1905_v52  ;;  %v1992_v59 = vmax.f32 %v1984_v43, 0.0  ;;  %v1983_v43 = vsub.f32 %v4296_v17, %v1975_v42  ;;  %v1979_v52 = vperm.slane %v4330_v27, 1 }
 0x3cc   :  { %v2043_v60 = vpop.permute.xlu2 %2042 }
 0x3cd   :  { %v2083_v63 = vsub.f32 %v2043_v60, %v2075_v51  ;;  %v2002_v5 = vmul.f32 %v4301_v4, %v1992_v59  ;;  %v1991_v47 = vmax.f32 %v1983_v43, 0.0  ;;  %v2081_v51 = vsub.f32 %v4305_v36, %v2073_v50 }
 0x3ce   :  { %v2171_v59 = vperm.slane %v1792_v22, 3  ;;  %v1978_v36 = vperm.slane %v4324_v53, 1 }
 0x3cf   :  { %v2091_v15 = vmax.f32 %v2083_v63, 0.0  ;;  %v2010_v14 = vadd.f32 %v2002_v5, %v1904_v31 }
 0x3d0   :  { %v2036_v57 = vpop.permute.xlu1 %2035  ;;  %v2179_v17 = vsub.f32 %v4311_v19, %v2171_v59 }
 0x3d1   :  { %v2082_v7 = vsub.f32 %v2036_v57, %v2074_v44  ;;  %v2101_v11 = vmul.f32 %v4308_v18, %v2091_v15  ;;  %v2089_v57 = vmax.f32 %v2081_v51, 0.0 }
 0x3d3   :  { %v2090_v33 = vmax.f32 %v2082_v7, 0.0  ;;  %v2109_v12 = vadd.f32 %v2101_v11, %v2011_v56  ;;  %v2077_v7 = vperm.slane %v4330_v27, 2 }
 0x3d4   :  { %v2141_v21 = vpop.permute.xlu2 %2140 }
 0x3d5   :  { %v2100_v46 = vmul.f32 %v4308_v18, %v2090_v33  ;;  %v2181_v37 = vsub.f32 %v2141_v21, %v2173_v54  ;;  %v1880_v33 = vperm.slane %v4324_v53, 0  ;;  %v2187_v21 = vmax.f32 %v2179_v17, 0.0 }
 0x3d7   :  { %v2108_v38 = vadd.f32 %v2100_v46, %v2010_v14  ;;  %v2189_v29 = vmax.f32 %v2181_v37, 0.0  ;;  %v2076_v14 = vperm.slane %v4324_v53, 2  ;;  %v2099_v46 = vmul.f32 %v4308_v18, %v2089_v57 }
 0x3d8   :  { %v2134_v32 = vpop.permute.xlu1 %2133  ;;  %1476 = vxpose.xlu2.b32.start.end [1/1] (short) (narrow) %v4262_v61, 8  ;;  %v1885_v61 = vsub.f32 %v1833_v34, %v1877_v9  ;;  %v2001_v34 = vmul.f32 %v4301_v4, %v1991_v47  ;;  %v2197_v22 = vmul.f32 %v4314_v58, %v2187_v21 }
 0x3d9   :  { %v2180_v13 = vsub.f32 %v2134_v32, %v2172_v24  ;;  %v2199_v39 = vmul.f32 %v4314_v58, %v2189_v29 }
 0x3da   :  { %v1893_v62 = vmax.f32 %v1885_v61, 0.0 }
 0x3db   :  { %v2188_v55 = vmax.f32 %v2180_v13, 0.0  ;;  %1404 = vxpose.xlu1.b32.start.end [1/1] (short) (narrow) %v1402_v20, 8  ;;  %v4338_v45 = vadd.f32 %v2199_v39, %v2109_v12  ;;  %v2175_v39 = vperm.slane %v4330_v27, 3 }
 0x3dc   :  { %v1861_v35 = vpop.permute.xlu2 %1860  ;;  %v1903_v44 = vmul.f32 %v4299_v1, %v1893_v62 }
 0x3dd   :  { %v2198_v0 = vmul.f32 %v4314_v58, %v2188_v55  ;;  %v1889_v23 = vsub.f32 %v1861_v35, %v1881_v40  ;;  %v2174_v35 = vperm.slane %v4324_v53, 3 }
 0x3de   :  { %v2009_v11 = vadd.f32 %v2001_v34, %v1903_v44 }
 0x3df   :  { %v4341_v48 = vadd.f32 %v2198_v0, %v2108_v38  ;;  %v1897_v30 = vmax.f32 %v1889_v23, 0.0 }
 0x3e0   :  { %v1854_v49 = vpop.permute.xlu1 %1853  ;;  %v2107_v26 = vadd.f32 %v2099_v46, %v2009_v11 }
 0x3e1   :  { %v1907_v5 = vmul.f32 %v4299_v1, %v1897_v30  ;;  %v1888_v29 = vsub.f32 %v1854_v49, %v1880_v33 }
 0x3e2   :  { %v2205_v55 = vadd.f32 %v2197_v22, %v2107_v26 }
 0x3e3   :  { %v1896_v9 = vmax.f32 %v1888_v29, 0.0 }
 0x3e4   :  { %v1959_v56 = vpop.permute.xlu2 %1958  ;;  %v2213_v50 = vadd.f32 %v2205_v55, %v3648_v3 }
 0x3e5   :  { %v1987_v60 = vsub.f32 %v1959_v56, %v1979_v52  ;;  %v1906_v52 = vmul.f32 %v4299_v1, %v1896_v9 }
 0x3e6   :  { %v2221_v30 = vmax.f32 %v2213_v50, 0.0 }
 0x3e7   :  { %v1995_v63 = vmax.f32 %v1987_v60, 0.0 }
 0x3e8   :  { %v1952_v15 = vpop.permute.xlu1 %1951  ;;  %v2229_v34 = vmul.f32 %v2221_v30, %v3651_v10 }
 0x3e9   :  { %v2005_v31 = vmul.f32 %v4301_v4, %v1995_v63  ;;  %v1986_v19 = vsub.f32 %v1952_v15, %v1978_v36 }
 0x3ea   :  { %v4372_v17 = vadd.f32 %v2229_v34, %v3655_v16 }
 0x3eb   :  { %v2013_v54 = vadd.f32 %v2005_v31, %v1907_v5  ;;  %v1994_v40 = vmax.f32 %v1986_v19, 0.0 }
 0x3ec   :  { %v2057_v12 = vpop.permute.xlu2 %2056  ;;  %v2247_v36 = vsel %vm889_vm8, %v4372_v17, -inf }
 0x3ed   :  { %v2085_v24 = vsub.f32 %v2057_v12, %v2077_v7  ;;  %v2004_v61 = vmul.f32 %v4301_v4, %v1994_v40  ;;  %v1684_v7 = vpop.f32.mrf.mxu2 }
 0x3ee   :  { %v1795_v33 = vrot.slane %v1684_v7, 4  ;;  %v1882_v30 = vperm.slane %v1684_v7, 0 }
 0x3ef   :  { %v2093_v37 = vmax.f32 %v2085_v24, 0.0  ;;  %v2012_v51 = vadd.f32 %v2004_v61, %v1906_v52 }
 0x3f0   :  { %v2050_v38 = vpop.permute.xlu1 %2049  ;;  %v1981_v12 = vperm.slane %v1795_v33, 1  ;;  %v1883_v46 = vperm.slane %v1795_v33, 0  ;;  %v2079_v21 = vperm.slane %v1795_v33, 2 }
 0x3f1   :  { %v2084_v32 = vsub.f32 %v2050_v38, %v2076_v14  ;;  %v2103_v13 = vmul.f32 %v4308_v18, %v2093_v37 }
 0x3f3   :  { %v2111_v20 = vadd.f32 %v2103_v13, %v2013_v54  ;;  %v2092_v42 = vmax.f32 %v2084_v32, 0.0 }
 0x3f4   :  { %v2155_v0 = vpop.permute.xlu2 %2154 }
 0x3f5   :  { %v2183_v23 = vsub.f32 %v2155_v0, %v2175_v39  ;;  %v2102_v62 = vmul.f32 %v4308_v18, %v2092_v42  ;;  %v2177_v39 = vperm.slane %v1795_v33, 3 }
 0x3f7   :  { %v2191_v43 = vmax.f32 %v2183_v23, 0.0  ;;  %v2110_v53 = vadd.f32 %v2102_v62, %v2012_v51 }
 0x3f8   :  { %v2148_v49 = vpop.permute.xlu1 %2147 }
 0x3f9   :  { %v2182_v27 = vsub.f32 %v2148_v49, %v2174_v35  ;;  %v2201_v47 = vmul.f32 %v4314_v58, %v2191_v43 }
 0x3fb   :  { %v2190_v56 = vmax.f32 %v2182_v27, 0.0  ;;  %v4365_v59 = vadd.f32 %v2201_v47, %v2111_v20  ;;  %v2214_v47 = vadd.f32 %v4341_v48, %v3648_v3  ;;  %v2212_v48 = vadd.f32 %v4317_v41, %v3648_v3 }
 0x3fc   :  { %v1875_v44 = vpop.permute.xlu2 %1874  ;;  %v2215_v41 = vadd.f32 %v4338_v45, %v3648_v3 }
 0x3fd   :  { %v2200_v60 = vmul.f32 %v4314_v58, %v2190_v56  ;;  %v1891_v38 = vsub.f32 %v1875_v44, %v1883_v46  ;;  %v2222_v51 = vmax.f32 %v2214_v47, 0.0  ;;  %v1980_v56 = vperm.slane %v1684_v7, 1 }
 0x3fe   :  { %3075 = vset.pattern.permute.xlu0 %v3290_v6 }
 0x3ff   :  { %v2208_v63 = vadd.f32 %v2200_v60, %v2110_v53  ;;  %v1899_v22 = vmax.f32 %v1891_v38, 0.0  ;;  %v2078_v53 = vperm.slane %v1684_v7, 2  ;;  %v2230_v60 = vmul.f32 %v2222_v51, %v3651_v10 }
 0x400   :  { %v1868_v15 = vpop.permute.xlu1 %1867 }
 0x401   :  { %v2216_v57 = vadd.f32 %v2208_v63, %v3648_v3  ;;  %v1909_v55 = vmul.f32 %v4299_v1, %v1899_v22  ;;  %v1890_v63 = vsub.f32 %v1868_v15, %v1882_v30 }
 0x403   :  { %v2224_v5 = vmax.f32 %v2216_v57, 0.0  ;;  %v4398_v57 = vadd.f32 %v2230_v60, %v3655_v16  ;;  %v2217_v60 = vadd.f32 %v4365_v59, %v3648_v3 }
 0x404   :  { %v1973_v31 = vpop.permute.xlu2 %1972 }
 0x405   :  { %v2232_v54 = vmul.f32 %v2224_v5, %v3651_v10  ;;  %v1989_v19 = vsub.f32 %v1973_v31, %v1981_v12  ;;  %v2176_v5 = vperm.slane %v1684_v7, 3  ;;  %v2250_v12 = vsel %vm889_vm8, %v4398_v57, -inf }
 0x407   :  { %v4378_v14 = vadd.f32 %v2232_v54, %v3655_v16  ;;  %v1997_v32 = vmax.f32 %v1989_v19, 0.0  ;;  %v1898_v54 = vmax.f32 %v1890_v63, 0.0 }
 0x408   :  { %v1966_v11 = vpop.permute.xlu1 %1965  ;;  %2248 = vmax.xlane.f32.xlu0 %v2247_v36  ;;  %v2162_v36 = vpop.permute.xlu0 %2161 }
 0x409   :  { %v2256_v26 = vsel %vm889_vm8, %v4378_v14, -inf  ;;  %v2007_v40 = vmul.f32 %v4301_v4, %v1997_v32  ;;  %v1988_v44 = vsub.f32 %v1966_v11, %v1980_v56  ;;  %v2184_v46 = vsub.f32 %v2162_v36, %v2176_v5 }
 0x40a   :  { %v1908_v15 = vmul.f32 %v4299_v1, %v1898_v54  ;;  %v2220_v11 = vmax.f32 %v2212_v48, 0.0  ;;  %v2223_v32 = vmax.f32 %v2215_v41, 0.0 }
 0x40b   :  { %v2015_v0 = vadd.f32 %v2007_v40, %v1909_v55  ;;  %v1996_v31 = vmax.f32 %v1988_v44, 0.0  ;;  %v2225_v44 = vmax.f32 %v2217_v60, 0.0 }
 0x40c   :  { %v2071_v24 = vpop.permute.xlu2 %2070  ;;  %v2231_v1 = vmul.f32 %v2223_v32, %v3651_v10 }
 0x40d   :  { %v2087_v29 = vsub.f32 %v2071_v24, %v2079_v21  ;;  %v2006_v21 = vmul.f32 %v4301_v4, %v1996_v31  ;;  %v2192_v24 = vmax.f32 %v2184_v46, 0.0  ;;  %v2233_v31 = vmul.f32 %v2225_v44, %v3651_v10 }
 0x40f   :  { %v2095_v13 = vmax.f32 %v2087_v29, 0.0  ;;  %v2014_v19 = vadd.f32 %v2006_v21, %v1908_v15  ;;  %v2202_v38 = vmul.f32 %v4314_v58, %v2192_v24 }
 0x410   :  { %v2064_v37 = vpop.permute.xlu1 %2063  ;;  %2257 = vmax.xlane.f32.xlu0 %v2256_v26 }
 0x411   :  { %v2105_v9 = vmul.f32 %v4308_v18, %v2095_v13  ;;  %v2086_v34 = vsub.f32 %v2064_v37, %v2078_v53  ;;  %v2228_v37 = vmul.f32 %v2220_v11, %v3651_v10  ;;  %v2239_v13 = vadd.f32 %v2231_v1, %v3655_v16 }
 0x413   :  { %v2113_v23 = vadd.f32 %v2105_v9, %v2015_v0  ;;  %v2094_v33 = vmax.f32 %v2086_v34, 0.0  ;;  %v2236_v4 = vadd.f32 %v2228_v37, %v3655_v16  ;;  %v2253_v40 = vsel %vm889_vm8, %v2239_v13, -inf  ;;  %v1687_v37 = vpop.f32.mrf.mxu2 }
 0x414   :  { %3016 = vmatpush.xpose.msk.msra.mxu1 %vm889_vm8, %v1687_v37 }
 0x415   :  { %v2104_v7 = vmul.f32 %v4308_v18, %v2094_v33  ;;  %v2244_v22 = vsel %vm889_vm8, %v2236_v4, -inf }
 0x417   :  { %v2112_v26 = vadd.f32 %v2104_v7, %v2014_v19 }
 0x418   :  { %v2169_v20 = vpop.permute.xlu1 %2168 }
 0x419   :  { %v2185_v42 = vsub.f32 %v2169_v20, %v2177_v39  ;;  %v2210_v29 = vadd.f32 %v2202_v38, %v2112_v26  ;;  %v1804_v38 = vrot.slane %v1687_v37, 4 }
 0x41b   :  { %v2193_v35 = vmax.f32 %v2185_v42, 0.0  ;;  %v2218_v18 = vadd.f32 %v2210_v29, %v3648_v3  ;;  %v4467_v41 = vpop.f32.mrf.mxu2  ;;  %3018 = vmatpush.xpose.msk.msrb.mxu1 %vm889_vm8, %v1804_v38 }
 0x41d   :  { %v2203_v61 = vmul.f32 %v4314_v58, %v2193_v35  ;;  %v2226_v39 = vmax.f32 %v2218_v18, 0.0 }
 0x41f   :  { %v2211_v43 = vadd.f32 %v2203_v61, %v2113_v23  ;;  %v2234_v45 = vmul.f32 %v2226_v39, %v3651_v10 }
 0x421   :  { %v2219_v49 = vadd.f32 %v2211_v43, %v3648_v3  ;;  %v2242_v58 = vadd.f32 %v2234_v45, %v3655_v16 }
 0x423   :  { %v2227_v50 = vmax.f32 %v2219_v49, 0.0  ;;  %v2262_v20 = vsel %vm889_vm8, %v2242_v58, -inf }
 0x425   :  { %v2235_v52 = vmul.f32 %v2227_v50, %v3651_v10 }
 0x427   :  { %v4389_v62 = vadd.f32 %v2235_v52, %v3655_v16 }
 0x429   :  { %v2265_v27 = vsel %vm889_vm8, %v4389_v62, -inf }
 0x42a   :  { %2266 = vmax.xlane.f32.xlu0 %v2265_v27 }
 0x42e   :  { %3078 = vset.pattern.permute.xlu1 %v3290_v6 }
 0x433   :  { %v4421_v55 = vpop.trf.xlu0 }
 0x43a   :  { %3076 = vset.pattern.permute.xlu2 %v3292_v8 }
 0x43b   :  { %2251 = vmax.xlane.f32.xlu1 %v2250_v12  ;;  %v1564_v9 = vpop.trf.xlu0 }
 0x449   :  { %2245 = vmax.xlane.f32.xlu2 %v2244_v22 }
 0x451   :  { %2254 = vmax.xlane.f32.xlu2 %v2253_v40 }
 0x459   :  { %2263 = vmax.xlane.f32.xlu2 %v2262_v20 }
 0x471   :  { %v1492_v49 = vpop.trf.xlu2 }
 0x47b   :  { %v2249_v42 = vpop.xlane.xlu0 %2248 }
 0x47c   :  { %v2269_v0 = vsub.f32 %v4372_v17, %v2249_v42 }
 0x47e   :  { %v2278_v35 = vmul.f32 1.442695, %v2269_v0 }
 0x47f   :  { %v1420_v23 = vpop.trf.xlu1 }
 0x480   :  { %1581 = vrot.lane.b32.xlu1 %v1420_v23, %s3294_s26  ;;  %3130 = vpow2.f32 %v2278_v35 }
 0x483   :  { %v2258_v61 = vpop.xlane.xlu0 %2257 }
 0x484   :  { %v2272_v43 = vsub.f32 %v4378_v14, %v2258_v61 }
 0x486   :  { %v4426_v50 = vpop.eup %3130  ;;  %v2284_v52 = vmul.f32 1.442695, %v2272_v43 }
 0x487   :  { %v2295_v27 = vsel %vm889_vm8, %v4426_v50, 0.0 }
 0x488   :  { %1585 = vrot.lane.b32.xlu1 %v1492_v49, %s3295_s27  ;;  %3132 = vpow2.f32 %v2284_v52  ;;  %2296 = vadd.xlane.f32.xlu2 %v2295_v27 }
 0x48e   :  { %v4431_v17 = vpop.eup %3132 }
 0x48f   :  { %v2304_v47 = vsel %vm889_vm8, %v4431_v17, 0.0 }
 0x490   :  { %1589 = vrot.lane.b32.xlu1 %v1564_v9, %s3296_s1  ;;  %2305 = vadd.xlane.f32.xlu2 %v2304_v47 }
 0x49d   :  { %v2267_v14 = vpop.xlane.xlu0 %2266 }
 0x49e   :  { %v2275_v51 = vsub.f32 %v4389_v62, %v2267_v14  ;;  %v4446_v62 = vadd.f32 %v2233_v31, %v3655_v16 }
 0x4a0   :  { %v2290_v56 = vmul.f32 1.442695, %v2275_v51  ;;  %v2259_v54 = vsel %vm889_vm8, %v4446_v62, -inf }
 0x4a2   :  { %3134 = vpow2.f32 %v2290_v56 }
 0x4a8   :  { %v4437_v30 = vpop.eup %3134 }
 0x4a9   :  { %v2313_v53 = vsel %vm889_vm8, %v4437_v30, 0.0 }
 0x4aa   :  { %2314 = vadd.xlane.f32.xlu2 %v2313_v53 }
 0x4ae   :  { %v2252_v63 = vpop.xlane.xlu1 %2251 }
 0x4af   :  { %v2270_v34 = vsub.f32 %v4398_v57, %v2252_v63 }
 0x4b1   :  { %v2280_v5 = vmul.f32 1.442695, %v2270_v34 }
 0x4b3   :  { %3136 = vpow2.f32 %v2280_v5 }
 0x4b9   :  { %v4448_v36 = vpop.eup %3136 }
 0x4ba   :  { %2260 = vmax.xlane.f32.xlu1 %v2259_v54  ;;  %v2298_v3 = vsel %vm889_vm8, %v4448_v36, 0.0 }
 0x4bb   :  { %2299 = vadd.xlane.f32.xlu0 %v2298_v3 }
 0x4bc   :  { %v2246_v59 = vpop.xlane.xlu2 %2245 }
 0x4bd   :  { %v2268_v33 = vsub.f32 %v2236_v4, %v2246_v59  ;;  %v1693_v4 = vpop.f32.mrf.mxu2 }
 0x4be   :  { %v1806_v32 = vrot.slane %v1693_v4, 4  ;;  %3024 = vmatpush.xpose.msk.msrb.mxu3 %vm889_vm8, %v1693_v4 }
 0x4bf   :  { %v2276_v57 = vmul.f32 1.442695, %v2268_v33 }
 0x4c0   :  { %3026 = vmatpush.xpose.msk.msra.mxu0 %vm889_vm8, %v1806_v32 }
 0x4c1   :  { %3138 = vpow2.f32 %v2276_v57 }
 0x4c4   :  { %v2255_v48 = vpop.xlane.xlu2 %2254 }
 0x4c5   :  { %v2271_v10 = vsub.f32 %v2239_v13, %v2255_v48  ;;  %v4479_v9 = vpop.f32.mrf.mxu2 }
 0x4c6   :  { %v1807_v0 = vrot.slane %v4479_v9, 4 }
 0x4c7   :  { %v4454_v12 = vpop.eup %3138  ;;  %v2282_v16 = vmul.f32 1.442695, %v2271_v10 }
 0x4c8   :  { %v2292_v46 = vsel %vm889_vm8, %v4454_v12, 0.0  ;;  %3030 = vmatpush.xpose.msk.msra.mxu3 %vm889_vm8, %v1807_v0 }
 0x4c9   :  { %3140 = vpow2.f32 %v2282_v16  ;;  %2293 = vadd.xlane.f32.xlu1 %v2292_v46 }
 0x4cc   :  { %v2264_v21 = vpop.xlane.xlu2 %2263 }
 0x4cd   :  { %v2274_v15 = vsub.f32 %v2242_v58, %v2264_v21 }
 0x4cf   :  { %v4458_v7 = vpop.eup %3140  ;;  %v2288_v11 = vmul.f32 1.442695, %v2274_v15 }
 0x4d0   :  { %v2301_v24 = vsel %vm889_vm8, %v4458_v7, 0.0 }
 0x4d1   :  { %3142 = vpow2.f32 %v2288_v11  ;;  %2302 = vadd.xlane.f32.xlu1 %v2301_v24 }
 0x4d7   :  { %v4462_v19 = vpop.eup %3142 }
 0x4d8   :  { %v2310_v26 = vsel %vm889_vm8, %v4462_v19, 0.0 }
 0x4d9   :  { %2311 = vadd.xlane.f32.xlu1 %v2310_v26 }
 0x4f2   :  { %v1582_v29 = vpop.permute.xlu1 %1581 }
 0x4f3   :  { %v1593_v18 = vsel %vm1592_vm13, %v4421_v55, %v1582_v29 }
 0x4fa   :  { %v1586_v22 = vpop.permute.xlu1 %1585 }
 0x4fb   :  { %v4472_v1 = vpop.xlane.xlu2 %2296  ;;  %v1594_v13 = vsel %vm889_vm8, %v1593_v18, %v1586_v22 }
 0x502   :  { %v1590_v39 = vpop.permute.xlu1 %1589 }
 0x503   :  { %v1596_v40 = vsel %vm4640_vm14, %v1594_v13, %v1590_v39  ;;  %v2306_v45 = vpop.xlane.xlu2 %2305 }
 0x504   :  { %1597 = vst.msk [vmem:[#allocation8] sm:$0xff] %vm4639_vm7, %v1596_v40  ;;  %3144 = vrcp.f32 %v2306_v45  ;;  %v2383_v35 = vand.u32 2147483648, %v2306_v45  ;;  %v2381_v55 = vand.u32 2147483647, %v2306_v45  ;;  %vm2377_vm9 = vweird.f32 %v2306_v45 }
 0x506   :  { %v2384_v43 = vor.u32 1.1754944e-38, %v2383_v35  ;;  %vm2382_vm11 = vcmp.eq.f32.partialorder %v2381_v55, 8.507059e+37 }
 0x50a   :  { %v3145_v58 = vpop.eup %3144 }
 0x50b   :  { %v2373_v20 = vmul.f32 %v3145_v58, %v2306_v45  ;;  %vm2378_vm15 = vweird.f32 %v3145_v58 }
 0x50c   :  { %vm2379_vm10 = vmor %vm2377_vm9, %vm2378_vm15 }
 0x50d   :  { %v2374_v42 = vsub.f32 1.0, %v2373_v20 }
 0x50f   :  { %v2375_v23 = vmul.f32 %v3145_v58, %v2374_v42  ;;  %v2339_v42 = vand.u32 2147483647, %v4472_v1 }
 0x511   :  { %v2376_v61 = vadd.f32 %v3145_v58, %v2375_v23 }
 0x513   :  { %v2380_v49 = vsel %vm2379_vm10, %v3145_v58, %v2376_v61  ;;  %v2341_v58 = vand.u32 2147483648, %v4472_v1 }
 0x514   :  { %v2385_v52 = vsel %vm2382_vm11, %v2384_v43, %v2380_v49 }
 0x515   :  { %v2432_v27 = vmul.f32 %v4431_v17, %v2385_v52  ;;  %v2342_v61 = vor.u32 1.1754944e-38, %v2341_v58 }
 0x517   :  { %3025 = vmatmul.msk.f32.vlgmr.msrb.gmra.mxu3 %vm889_vm8, %v2432_v27 }
 0x51d   :  { %v2315_v47 = vpop.xlane.xlu2 %2314 }
 0x51e   :  { %3146 = vrcp.f32 %v2315_v47  ;;  %v2425_v53 = vand.u32 2147483648, %v2315_v47  ;;  %v2423_v44 = vand.u32 2147483647, %v2315_v47  ;;  %vm2419_vm7 = vweird.f32 %v2315_v47 }
 0x520   :  { %v2426_v34 = vor.u32 1.1754944e-38, %v2425_v53  ;;  %vm2424_vm9 = vcmp.eq.f32.partialorder %v2423_v44, 8.507059e+37 }
 0x524   :  { %v3147_v14 = vpop.eup %3146 }
 0x525   :  { %v2415_v51 = vmul.f32 %v3147_v14, %v2315_v47  ;;  %vm2420_vm12 = vweird.f32 %v3147_v14 }
 0x526   :  { %vm2421_vm15 = vmor %vm2419_vm7, %vm2420_vm12 }
 0x527   :  { %v2416_v56 = vsub.f32 1.0, %v2415_v51 }
 0x529   :  { %v2417_v60 = vmul.f32 %v3147_v14, %v2416_v56 }
 0x52b   :  { %v2418_v63 = vadd.f32 %v3147_v14, %v2417_v60 }
 0x52d   :  { %v2422_v5 = vsel %vm2421_vm15, %v3147_v14, %v2418_v63  ;;  %v2261_v31 = vpop.xlane.xlu1 %2260 }
 0x52e   :  { %v2427_v54 = vsel %vm2424_vm9, %v2426_v34, %v2422_v5  ;;  %v2273_v17 = vsub.f32 %v4446_v62, %v2261_v31  ;;  %v2300_v10 = vpop.xlane.xlu0 %2299  ;;  %vm2335_vm9 = vweird.f32 %v4472_v1 }
 0x52f   :  { %v2435_v59 = vmul.f32 %v4437_v30, %v2427_v54  ;;  %v2355_v27 = vand.u32 2147483648, %v2300_v10  ;;  %v2353_v47 = vand.u32 2147483647, %v2300_v10 }
 0x530   :  { %v2286_v3 = vmul.f32 1.442695, %v2273_v17 }
 0x531   :  { %3031 = vmatmul.msk.f32.vlgmr.msra.gmra.mxu3 %vm889_vm8, %v2435_v59  ;;  %v2356_v60 = vor.u32 1.1754944e-38, %v2355_v27 }
 0x532   :  { %3148 = vpow2.f32 %v2286_v3 }
 0x533   :  { %3150 = vrcp.f32 %v4472_v1 }
 0x538   :  { %v4489_v33 = vpop.eup %3148 }
 0x539   :  { %v2307_v57 = vsel %vm889_vm8, %v4489_v33, 0.0  ;;  %v3151_v48 = vpop.eup %3150 }
 0x53a   :  { %2308 = vadd.xlane.f32.xlu0 %v2307_v57  ;;  %v2331_v62 = vmul.f32 %v3151_v48, %v4472_v1  ;;  %vm2336_vm11 = vweird.f32 %v3151_v48 }
 0x53b   :  { %vm2337_vm14 = vmor %vm2335_vm9, %vm2336_vm11  ;;  %vm2349_vm11 = vweird.f32 %v2300_v10 }
 0x53c   :  { %v2294_v16 = vpop.xlane.xlu1 %2293  ;;  %v2332_v30 = vsub.f32 1.0, %v2331_v62 }
 0x53d   :  { %3152 = vrcp.f32 %v2294_v16  ;;  %v2327_v37 = vand.u32 2147483648, %v2294_v16  ;;  %v2325_v4 = vand.u32 2147483647, %v2294_v16  ;;  %vm2321_vm10 = vweird.f32 %v2294_v16 }
 0x53e   :  { %3154 = vrcp.f32 %v2300_v10  ;;  %v2333_v26 = vmul.f32 %v3151_v48, %v2332_v30 }
 0x53f   :  { %v2328_v22 = vor.u32 1.1754944e-38, %v2327_v37  ;;  %vm2326_vm15 = vcmp.eq.f32.partialorder %v2325_v4, 8.507059e+37 }
 0x540   :  { %v2334_v18 = vadd.f32 %v3151_v48, %v2333_v26 }
 0x542   :  { %v2338_v35 = vsel %vm2337_vm14, %v3151_v48, %v2334_v18 }
 0x543   :  { %v3153_v46 = vpop.eup %3152 }
 0x544   :  { %v2317_v21 = vmul.f32 %v3153_v46, %v2294_v16  ;;  %v4494_v15 = vpop.xlane.xlu1 %2302  ;;  %v3155_v11 = vpop.eup %3154  ;;  %vm2322_vm7 = vweird.f32 %v3153_v46 }
 0x545   :  { %3156 = vrcp.f32 %v4494_v15  ;;  %v2345_v38 = vmul.f32 %v3155_v11, %v2300_v10  ;;  %vm2323_vm12 = vmor %vm2321_vm10, %vm2322_vm7  ;;  %vm2340_vm7 = vcmp.eq.f32.partialorder %v2339_v42, 8.507059e+37  ;;  %vm2350_vm10 = vweird.f32 %v3155_v11 }
 0x546   :  { %v2318_v24 = vsub.f32 1.0, %v2317_v21  ;;  %v2343_v43 = vsel %vm2340_vm7, %v2342_v61, %v2338_v35  ;;  %vm2351_vm14 = vmor %vm2349_vm11, %vm2350_vm10  ;;  %vm2363_vm9 = vweird.f32 %v4494_v15 }
 0x547   :  { %v2346_v13 = vsub.f32 1.0, %v2345_v38  ;;  %v2429_v14 = vmul.f32 %v4426_v50, %v2343_v43  ;;  %v2367_v50 = vand.u32 2147483647, %v4494_v15 }
 0x548   :  { %v2319_v29 = vmul.f32 %v3153_v46, %v2318_v24 }
 0x549   :  { %v2347_v23 = vmul.f32 %v3155_v11, %v2346_v13  ;;  %vm2368_vm10 = vcmp.eq.f32.partialorder %v2367_v50, 8.507059e+37 }
 0x54a   :  { %v2320_v32 = vadd.f32 %v3153_v46, %v2319_v29 }
 0x54b   :  { %v3157_v45 = vpop.eup %3156  ;;  %v2348_v49 = vadd.f32 %v3155_v11, %v2347_v23 }
 0x54c   :  { %v2324_v39 = vsel %vm2323_vm12, %v3153_v46, %v2320_v32  ;;  %v2312_v40 = vpop.xlane.xlu1 %2311  ;;  %v2359_v55 = vmul.f32 %v3157_v45, %v4494_v15  ;;  %vm2354_vm12 = vcmp.eq.f32.partialorder %v2353_v47, 8.507059e+37 }
 0x54d   :  { %v2329_v20 = vsel %vm2326_vm15, %v2328_v22, %v2324_v39  ;;  %3158 = vrcp.f32 %v2312_v40  ;;  %v2352_v51 = vsel %vm2351_vm14, %v3155_v11, %v2348_v49  ;;  %vm2364_vm15 = vweird.f32 %v3157_v45 }
 0x54e   :  { %v2428_v0 = vmul.f32 %v4454_v12, %v2329_v20  ;;  %v2360_v52 = vsub.f32 1.0, %v2359_v55  ;;  %v1805_v12 = vrot.slane %v4467_v41, 4  ;;  %v2357_v44 = vsel %vm2354_vm12, %v2356_v60, %v2352_v51  ;;  %vm2365_vm7 = vmor %vm2363_vm9, %vm2364_vm15 }
 0x54f   :  { %v2430_v5 = vmul.f32 %v4448_v36, %v2357_v44  ;;  %v2411_v57 = vand.u32 2147483648, %v2312_v40  ;;  %vm2405_vm14 = vweird.f32 %v2312_v40  ;;  %v2409_v48 = vand.u32 2147483647, %v2312_v40 }
 0x550   :  { %3017 = vmatmul.msk.f32.vlgmr.msra.gmra.mxu1 %vm889_vm8, %v2428_v0  ;;  %v2361_v56 = vmul.f32 %v3157_v45, %v2360_v52 }
 0x551   :  { %3020 = vmatpush.xpose.msk.msra.mxu1 %vm889_vm8, %v4467_v41  ;;  %v2369_v41 = vand.u32 2147483648, %v4494_v15  ;;  %v2412_v16 = vor.u32 1.1754944e-38, %v2411_v57  ;;  %vm2410_vm15 = vcmp.eq.f32.partialorder %v2409_v48, 8.507059e+37 }
 0x552   :  { %v2362_v63 = vadd.f32 %v3157_v45, %v2361_v56 }
 0x553   :  { %v3159_v1 = vpop.eup %3158  ;;  %v2370_v17 = vor.u32 1.1754944e-38, %v2369_v41 }
 0x554   :  { %v2401_v53 = vmul.f32 %v3159_v1, %v2312_v40  ;;  %v2366_v31 = vsel %vm2365_vm7, %v3157_v45, %v2362_v63  ;;  %vm2406_vm11 = vweird.f32 %v3159_v1 }
 0x555   :  { %v2371_v3 = vsel %vm2368_vm10, %v2370_v17, %v2366_v31  ;;  %vm2407_vm12 = vmor %vm2405_vm14, %vm2406_vm11 }
 0x556   :  { %v2402_v34 = vsub.f32 1.0, %v2401_v53  ;;  %v2431_v10 = vmul.f32 %v4458_v7, %v2371_v3 }
 0x558   :  { %3019 = vmatmul.msk.f32.vlgmr.msrb.gmra.mxu1 %vm889_vm8, %v2429_v14  ;;  %v2403_v54 = vmul.f32 %v3159_v1, %v2402_v34 }
 0x559   :  { %3022 = vmatpush.xpose.msk.msrb.mxu1 %vm889_vm8, %v1805_v12 }
 0x55a   :  { %v2404_v59 = vadd.f32 %v3159_v1, %v2403_v54 }
 0x55c   :  { %v2408_v36 = vsel %vm2407_vm12, %v3159_v1, %v2404_v59 }
 0x55d   :  { %v2413_v62 = vsel %vm2410_vm15, %v2412_v16, %v2408_v36 }
 0x55e   :  { %v2434_v46 = vmul.f32 %v4462_v19, %v2413_v62 }
 0x560   :  { %3021 = vmatmul.msk.f32.vlgmr.msra.gmra.mxu1 %vm889_vm8, %v2430_v5 }
 0x561   :  { %3028 = vmatpush.xpose.msk.msra.mxu1 %vm889_vm8, %v4479_v9 }
 0x568   :  { %3023 = vmatmul.msk.f32.vlgmr.msrb.gmra.mxu1 %vm889_vm8, %v2431_v10 }
 0x570   :  { %3029 = vmatmul.msk.f32.vlgmr.msra.gmra.mxu1 %vm889_vm8, %v2434_v46 }
 0x59a   :  { %v2558_v42 = vpop.f32.mrf.mxu3 }
 0x5ad   :  { %v2309_v9 = vpop.xlane.xlu0 %2308 }
 0x5ae   :  { %3160 = vrcp.f32 %v2309_v9  ;;  %v2397_v11 = vand.u32 2147483648, %v2309_v9  ;;  %v2395_v7 = vand.u32 2147483647, %v2309_v9  ;;  %vm2391_vm7 = vweird.f32 %v2309_v9 }
 0x5b0   :  { %v2398_v37 = vor.u32 1.1754944e-38, %v2397_v11  ;;  %vm2396_vm11 = vcmp.eq.f32.partialorder %v2395_v7, 8.507059e+37 }
 0x5b4   :  { %v3161_v30 = vpop.eup %3160  ;;  %v2633_v0 = vpop.f32.mrf.mxu3 }
 0x5b5   :  { %v2387_v21 = vmul.f32 %v3161_v30, %v2309_v9  ;;  %vm2392_vm9 = vweird.f32 %v3161_v30 }
 0x5b6   :  { %vm2393_vm10 = vmor %vm2391_vm7, %vm2392_vm9 }
 0x5b7   :  { %v2388_v15 = vsub.f32 1.0, %v2387_v21 }
 0x5b9   :  { %v2389_v24 = vmul.f32 %v3161_v30, %v2388_v15 }
 0x5bb   :  { %v2390_v26 = vadd.f32 %v3161_v30, %v2389_v24 }
 0x5bd   :  { %v2394_v38 = vsel %vm2393_vm10, %v3161_v30, %v2390_v26 }
 0x5be   :  { %v2399_v29 = vsel %vm2396_vm11, %v2398_v37, %v2394_v38 }
 0x5bf   :  { %v2433_v19 = vmul.f32 %v4489_v33, %v2399_v29 }
 0x5c1   :  { %3027 = vmatmul.msk.f32.vlgmr.msra.gmra.mxu0 %vm889_vm8, %v2433_v19 }
 0x5cd   :  { %v4522_v4 = vpop.f32.mrf.mxu1 }
 0x5ce   :  { %2717 = vperm.xlu2 %3076, %v4522_v4   ;;  %2645 = vperm.xlu0 %3075, %v4522_v4  }
 0x5d5   :  { %v2483_v32 = vpop.f32.mrf.mxu1 }
 0x5d6   :  { %3077 = vset.pattern.permute.xlu2 %v3291_v25  ;;  %3079 = vset.pattern.permute.xlu0 %v3292_v8 }
 0x5d7   :  { %2648 = vperm.xlu1 %3078, %v2483_v32   ;;  %2789 = vperm.xlu2 %3077, %v4522_v4  }
 0x5d8   :  { %2720 = vperm.xlu0 %3079, %v2483_v32  }
 0x5dd   :  { %v2508_v22 = vpop.f32.mrf.mxu1 }
 0x5df   :  { %3082 = vset.pattern.permute.xlu1 %v3291_v25  ;;  %2792 = vperm.xlu2 %3077, %v2483_v32  }
 0x5e0   :  { %2795 = vperm.xlu1 %3082, %v2508_v22   ;;  %3084 = vset.pattern.permute.xlu0 %v3291_v25 }
 0x5e5   :  { %v2533_v20 = vpop.f32.mrf.mxu1 }
 0x5e7   :  { %3080 = vset.pattern.permute.xlu2 %v3290_v6 }
 0x5e8   :  { %2651 = vperm.xlu2 %3080, %v2508_v22   ;;  %3083 = vset.pattern.permute.xlu1 %v3290_v6 }
 0x5ed   :  { %v4546_v35 = vpop.f32.mrf.mxu1 }
 0x5f0   :  { %3081 = vset.pattern.permute.xlu2 %v3292_v8 }
 0x5f1   :  { %2723 = vperm.xlu2 %3081, %v2508_v22  }
 0x628   :  { %v4534_v33 = vpop.permute.xlu2 %2717 }
 0x629   :  { %v2740_v17 = vperm.slane %v4534_v33, %v4185_v2 }
 0x631   :  { %v2790_v18 = vpop.permute.xlu2 %2789 }
 0x632   :  { %v2812_v39 = vperm.slane %v2790_v18, %v4185_v2 }
 0x639   :  { %v2793_v13 = vpop.permute.xlu2 %2792 }
 0x63a   :  { %v2813_v40 = vperm.slane %v2793_v13, %v4185_v2 }
 0x63c   :  { %v4539_v45 = vsel %vm165_vm0, %v2813_v40, %v2812_v39 }
 0x63e   :  { %v2583_v58 = vpop.f32.mrf.mxu0 }
 0x63f   :  { %2804 = vperm.xlu0 %3084, %v2583_v58   ;;  %2660 = vperm.xlu1 %3083, %v2583_v58  }
 0x640   :  { %2732 = vperm.xlu2 %3081, %v2583_v58   ;;  %v2646_v43 = vpop.permute.xlu0 %2645 }
 0x642   :  { %v2652_v23 = vpop.permute.xlu2 %2651 }
 0x643   :  { %v2670_v63 = vperm.slane %v2652_v23, %v4185_v2 }
 0x647   :  { %3086 = vset.pattern.permute.xlu0 %v3292_v8  ;;  %2654 = vperm.xlu1 %3083, %v2533_v20  }
 0x648   :  { %3085 = vset.pattern.permute.xlu2 %v3290_v6  ;;  %2729 = vperm.xlu0 %3086, %v2558_v42  }
 0x649   :  { %2657 = vperm.xlu2 %3085, %v2558_v42   ;;  %v2649_v49 = vpop.permute.xlu1 %2648 }
 0x64a   :  { %v2721_v1 = vpop.permute.xlu0 %2720  ;;  %v2669_v51 = vperm.slane %v2649_v49, %v4185_v2 }
 0x64b   :  { %v2724_v55 = vpop.permute.xlu2 %2723  ;;  %v2741_v31 = vperm.slane %v2721_v1, %v4185_v2 }
 0x64c   :  { %v2742_v57 = vperm.slane %v2724_v55, %v4185_v2 }
 0x64d   :  { %v2748_v10 = vsel %vm165_vm0, %v2741_v31, %v2740_v17 }
 0x64e   :  { %v2749_v21 = vsel %vm168_vm1, %v2742_v57, %v2748_v10 }
 0x64f   :  { %3096 = vset.pattern.permute.xlu1 %v3293_v28 }
 0x650   :  { %2864 = vperm.xlu1 %3096, %v2483_v32   ;;  %3091 = vset.pattern.permute.xlu0 %v3290_v6 }
 0x651   :  { %3087 = vset.pattern.permute.xlu2 %v3291_v25  ;;  %2666 = vperm.xlu0 %3091, %v2633_v0  }
 0x652   :  { %2801 = vperm.xlu2 %3087, %v2558_v42  }
 0x658   :  { %2867 = vperm.xlu1 %3096, %v2508_v22  }
 0x659   :  { %3092 = vset.pattern.permute.xlu0 %v3292_v8 }
 0x65a   :  { %3088 = vset.pattern.permute.xlu2 %v3292_v8  ;;  %2735 = vperm.xlu0 %3092, %v4546_v35  }
 0x65b   :  { %2726 = vperm.xlu2 %3088, %v2533_v20  }
 0x660   :  { %2870 = vperm.xlu1 %3096, %v2533_v20  }
 0x663   :  { %3089 = vset.pattern.permute.xlu2 %v3291_v25 }
 0x664   :  { %2798 = vperm.xlu2 %3089, %v2533_v20  }
 0x668   :  { %2873 = vperm.xlu1 %3096, %v2558_v42  }
 0x66c   :  { %3090 = vset.pattern.permute.xlu2 %v3290_v6  ;;  %v2796_v6 = vpop.permute.xlu1 %2795 }
 0x66d   :  { %2663 = vperm.xlu2 %3090, %v4546_v35   ;;  %v2814_v22 = vperm.slane %v2796_v6, %v4185_v2 }
 0x66f   :  { %v2821_v13 = vsel %vm168_vm1, %v2814_v22, %v4539_v45 }
 0x670   :  { %2876 = vperm.xlu1 %3096, %v2583_v58  }
 0x675   :  { %3093 = vset.pattern.permute.xlu2 %v3292_v8 }
 0x676   :  { %2738 = vperm.xlu2 %3093, %v2633_v0  }
 0x678   :  { %2882 = vperm.xlu1 %3096, %v2633_v0  }
 0x67e   :  { %3094 = vset.pattern.permute.xlu2 %v3291_v25  ;;  %v2668_v25 = vperm.slane %v2646_v43, %v4185_v2 }
 0x67f   :  { %2807 = vperm.xlu2 %3094, %v4546_v35  }
 0x680   :  { %v2676_v60 = vsel %vm165_vm0, %v2669_v51, %v2668_v25 }
 0x681   :  { %v2677_v34 = vsel %vm168_vm1, %v2670_v63, %v2676_v60 }
 0x687   :  { %2810 = vperm.xlu2 %3094, %v2633_v0  }
 0x69a   :  { %v2733_v61 = vpop.permute.xlu2 %2732 }
 0x69b   :  { %v2745_v26 = vperm.slane %v2733_v61, %v4185_v2 }
 0x6a3   :  { %v2658_v52 = vpop.permute.xlu2 %2657 }
 0x6a4   :  { %v2672_v5 = vperm.slane %v2658_v52, %v4185_v2 }
 0x6ac   :  { %v2802_v12 = vpop.permute.xlu2 %2801 }
 0x6ad   :  { %v2816_v40 = vperm.slane %v2802_v12, %v4185_v2 }
 0x6b1   :  { %v2805_v27 = vpop.permute.xlu0 %2804  ;;  %v2661_v47 = vpop.permute.xlu1 %2660 }
 0x6b2   :  { %v2673_v3 = vperm.slane %v2661_v47, %v4185_v2  ;;  %v2817_v42 = vperm.slane %v2805_v27, %v4185_v2 }
 0x6b5   :  { %v2727_v14 = vpop.permute.xlu2 %2726 }
 0x6b6   :  { %v2743_v36 = vperm.slane %v2727_v14, %v4185_v2 }
 0x6b8   :  { %v2750_v11 = vsel %vm171_vm2, %v2743_v36, %v2749_v21 }
 0x6b9   :  { %v2655_v56 = vpop.permute.xlu1 %2654 }
 0x6ba   :  { %v2730_v8 = vpop.permute.xlu0 %2729  ;;  %v2671_v44 = vperm.slane %v2655_v56, %v4185_v2 }
 0x6bb   :  { %v2744_v46 = vperm.slane %v2730_v8, %v4185_v2 }
 0x6bc   :  { %v2678_v41 = vsel %vm171_vm2, %v2671_v44, %v2677_v34 }
 0x6bd   :  { %v2679_v54 = vsel %vm174_vm3, %v2672_v5, %v2678_v41  ;;  %v2751_v24 = vsel %vm174_vm3, %v2744_v46, %v2750_v11 }
 0x6be   :  { %v2799_v53 = vpop.permute.xlu2 %2798  ;;  %v2680_v62 = vsel %vm177_vm4, %v2673_v3, %v2679_v54  ;;  %v2752_v38 = vsel %vm177_vm4, %v2745_v26, %v2751_v24 }
 0x6bf   :  { %v2815_v33 = vperm.slane %v2799_v53, %v4185_v2 }
 0x6c1   :  { %v2822_v39 = vsel %vm171_vm2, %v2815_v33, %v2821_v13 }
 0x6c2   :  { %v2823_v58 = vsel %vm174_vm3, %v2816_v40, %v2822_v39  ;;  %v2865_v52 = vpop.permute.xlu1 %2864 }
 0x6c3   :  { %v2667_v50 = vpop.permute.xlu0 %2666  ;;  %v2824_v23 = vsel %vm177_vm4, %v2817_v42, %v2823_v58  ;;  %v2885_v47 = vperm.slane %v2865_v52, %v4185_v2 }
 0x6c4   :  { %v2675_v16 = vperm.slane %v2667_v50, %v4185_v2 }
 0x6c7   :  { %v2664_v59 = vpop.permute.xlu2 %2663 }
 0x6c8   :  { %v2674_v48 = vperm.slane %v2664_v59, %v4185_v2 }
 0x6ca   :  { %v2681_v9 = vsel %vm180_vm5, %v2674_v48, %v2680_v62  ;;  %v2868_v1 = vpop.permute.xlu1 %2867 }
 0x6cb   :  { %v2682_v30 = vsel %vm183_vm6, %v2675_v16, %v2681_v9 }
 0x6cc   :  { %2684 = vxpose.xlu1.b32.start.end [1/1] (short) (narrow) %v2682_v30, 8  ;;  %v2736_v15 = vpop.permute.xlu0 %2735 }
 0x6cd   :  { %v2746_v7 = vperm.slane %v2736_v15, %v4185_v2 }
 0x6cf   :  { %v2753_v19 = vsel %vm180_vm5, %v2746_v7, %v2752_v38 }
 0x6d0   :  { %v2739_v37 = vpop.permute.xlu2 %2738 }
 0x6d1   :  { %v2747_v29 = vperm.slane %v2739_v37, %v4185_v2 }
 0x6d2   :  { %v2871_v6 = vpop.permute.xlu1 %2870 }
 0x6d3   :  { %v2754_v32 = vsel %vm183_vm6, %v2747_v29, %v2753_v19  ;;  %v2887_v51 = vperm.slane %v2871_v6, %v4185_v2 }
 0x6d4   :  { %2756 = vxpose.xlu0.b32.start.end [1/1] (short) (narrow) %v2754_v32, 8 }
 0x6d9   :  { %v2808_v18 = vpop.permute.xlu2 %2807 }
 0x6da   :  { %v2818_v20 = vperm.slane %v2808_v18, %v4185_v2  ;;  %v2874_v12 = vpop.permute.xlu1 %2873 }
 0x6db   :  { %v2888_v25 = vperm.slane %v2874_v12, %v4185_v2 }
 0x6dc   :  { %v2825_v61 = vsel %vm180_vm5, %v2818_v20, %v2824_v23 }
 0x6e1   :  { %v2811_v0 = vpop.permute.xlu2 %2810 }
 0x6e2   :  { %v2819_v55 = vperm.slane %v2811_v0, %v4185_v2  ;;  %v2877_v14 = vpop.permute.xlu1 %2876 }
 0x6e3   :  { %v2889_v44 = vperm.slane %v2877_v14, %v4185_v2 }
 0x6e4   :  { %v2826_v43 = vsel %vm183_vm6, %v2819_v55, %v2825_v61 }
 0x6e5   :  { %2828 = vxpose.xlu2.b32.start.end [1/1] (short) (narrow) %v2826_v43, 8 }
 0x6ea   :  { %v2883_v53 = vpop.permute.xlu1 %2882 }
 0x6eb   :  { %v2891_v41 = vperm.slane %v2883_v53, %v4185_v2 }
 0x73b   :  { %3097 = vset.pattern.permute.xlu0 %v3293_v28 }
 0x742   :  { %2879 = vperm.xlu0 %3097, %v4546_v35  }
 0x747   :  { %3095 = vset.pattern.permute.xlu2 %v3293_v28  ;;  %v2886_v28 = vperm.slane %v2868_v1, %v4185_v2 }
 0x74e   :  { %2861 = vperm.xlu2 %3095, %v4522_v4  }
 0x770   :  { %v2700_v54 = vpop.trf.xlu1 }
 0x778   :  { %v2772_v45 = vpop.trf.xlu0 }
 0x779   :  { %2933 = vrot.lane.b32.xlu0 %v2772_v45, %s3294_s26 }
 0x77e   :  { %v2844_v49 = vpop.trf.xlu2 }
 0x781   :  { %2937 = vrot.lane.b32.xlu0 %v2844_v49, %s3295_s27 }
 0x7a8   :  { %v2862_v27 = vpop.permute.xlu2 %2861 }
 0x7a9   :  { %v2884_v35 = vperm.slane %v2862_v27, %v4185_v2 }
 0x7ab   :  { %v2892_v4 = vsel %vm165_vm0, %v2885_v47, %v2884_v35  ;;  %vm4643_vm0 = vcmask 195584  }
 0x7ac   :  { %v2893_v8 = vsel %vm168_vm1, %v2886_v28, %v2892_v4  ;;  %vm4644_vm1 = vcmask 261120  }
 0x7ad   :  { %v2894_v56 = vsel %vm171_vm2, %v2887_v51, %v2893_v8 }
 0x7ae   :  { %v2895_v60 = vsel %vm174_vm3, %v2888_v25, %v2894_v56 }
 0x7af   :  { %v2896_v50 = vsel %vm177_vm4, %v2889_v44, %v2895_v60 }
 0x7b4   :  { %v2880_v63 = vpop.permute.xlu0 %2879 }
 0x7b5   :  { %v2890_v34 = vperm.slane %v2880_v63, %v4185_v2 }
 0x7b7   :  { %v2897_v5 = vsel %vm180_vm5, %v2890_v34, %v2896_v50 }
 0x7b8   :  { %v2898_v31 = vsel %vm183_vm6, %v2891_v41, %v2897_v5 }
 0x7b9   :  { %2900 = vxpose.xlu1.b32.start.end [1/1] (short) (narrow) %v2898_v31, 8 }
 0x7eb   :  { %v2934_v3 = vpop.permute.xlu0 %2933 }
 0x7ec   :  { %v2944_v57 = vsel %vm1592_vm13, %v2700_v54, %v2934_v3 }
 0x7f3   :  { %v2938_v59 = vpop.permute.xlu0 %2937 }
 0x7f4   :  { %v2945_v2 = vsel %vm889_vm8, %v2944_v57, %v2938_v59 }
 0x85d   :  { %v2916_v17 = vpop.trf.xlu1 }
 0x85e   :  { %2941 = vrot.lane.b32.xlu0 %v2916_v17, %s3296_s1 }
 0x8d0   :  { %v2942_v48 = vpop.permute.xlu0 %2941 }
 0x8d1   :  { %v2946_v10 = vsel %vm4643_vm0, %v2945_v2, %v2942_v48 }
 0x8d2   :  { %2948 = vst.msk [vmem:[#allocation8 + $0x8] sm:$0xff] %vm4644_vm1, %v2946_v10 }
 0x8d3   :  { %2961 = dma.vmem_to_hbm [thread:$0]  %s2954_s9, 256, %s2956_s30, [#allocation4], %s3298_s10, %s3298_s10, %s3294_s26  }
 0x8d4   :  { %3286 = dma.done.wait [#allocation4], 256  }
 0x8d5   :  { %3287 = vsyncadd [#allocation4], 4294967040 }
 0x8d6   :  { %2966 = vsyncpa [#allocation4], 1 }
 0x8d7   :  { %2967 = vsyncpa [#allocation5], 1 }
 0x8d8   :  { %2968 = vsyncpa [#allocation7], 1 }

</bundles_post_ra>
